<compile_context>
chip_gen: v7x
topology: tpu7x:2x2x1
jax: 0.10.0
libtpu: 0.0.40
codegen_flags: <defaults>
</compile_context>

<pallas_src>
import functools

import jax
import jax.numpy as jnp
from jax.experimental import pallas as pl
from jax.experimental.pallas import tpu as pltpu


def _round_up(x, m):
    return (x + m - 1) // m * m


# ----------------------------------------------------------------------------
# Pallas kernel: one LSTM layer, grid over time CHUNKS; the recurrent carry
# lives in the resident h_n / c_n output blocks; serial recurrence unrolled.
# ----------------------------------------------------------------------------
def _lstm_layer_kernel(nvalid_ref,          # SMEM (1,) i32: #chunks with any valid step
                       x_ref,               # (TC, Bp, Dp)  layer input, time-major
                       m_ref,               # (TC, Bp, 1)   f32 mask (1.0 while t < len[b])
                       wih_ref,             # (Dp, 4*Hp)    resident
                       whh_ref,             # (Hp, 4*Hp)    resident
                       b_ref,               # (1, 4*Hp)     f32, b_ih + b_hh merged
                       out_ref,             # (TC, Bp, Hp)
                       hN_ref,              # (Bp, Hp) f32  resident; doubles as h carry
                       cN_ref,              # (Bp, Hp) f32  resident; doubles as c carry
                       gx_ref,              # VMEM scratch (TC, Bp, 4*Hp) f32
                       *, tc, hp):
    c = pl.program_id(0)

    @pl.when(c == 0)
    def _():
        hN_ref[...] = jnp.zeros_like(hN_ref)
        cN_ref[...] = jnp.zeros_like(cN_ref)

    @pl.when(c >= nvalid_ref[0])            # whole chunk is padding: zero output only
    def _():
        out_ref[...] = jnp.zeros_like(out_ref)

    @pl.when(c < nvalid_ref[0])
    def _():
        tc_, bp, dp = x_ref.shape
        # Hoisted input projection: one lane-dense MXU matmul for the whole chunk.
        x2d = x_ref[...].reshape(tc_ * bp, dp)
        gx = jnp.dot(x2d, wih_ref[...], preferred_element_type=jnp.float32)
        gx_ref[...] = (gx + b_ref[...]).reshape(tc_, bp, 4 * hp)

        h = hN_ref[...]                     # (Bp, Hp) f32 carry
        cs = cN_ref[...]
        w_dt = whh_ref.dtype
        for t in range(tc):                 # static, unrolled serial recurrence
            gates = gx_ref[t] + jnp.dot(h.astype(w_dt), whh_ref[...],
                                        preferred_element_type=jnp.float32)
            # PyTorch gate order: i, f, g, o  (each slice is a full lane tile).
            i_g = jax.nn.sigmoid(gates[:, 0:hp])
            f_g = jax.nn.sigmoid(gates[:, hp:2 * hp])
            g_g = jnp.tanh(gates[:, 2 * hp:3 * hp])
            o_g = jax.nn.sigmoid(gates[:, 3 * hp:4 * hp])
            c_new = f_g * cs + i_g * g_g
            h_new = o_g * jnp.tanh(c_new)
            m = m_ref[t]                    # (Bp, 1): 1.0 while t < length[b], else 0.0
            h = m * h_new + (1.0 - m) * h   # freeze state past sequence end
            cs = m * c_new + (1.0 - m) * cs
            out_ref[t] = (m * h_new).astype(out_ref.dtype)   # zeros on padding
        hN_ref[...] = h
        cN_ref[...] = cs


def _lstm_layer(x_p, mask_p, w_ih_p, w_hh_p, b_p, nvalid, *, tc, out_dtype):
    """One LSTM layer on padded, time-major data. x_p: (Tp, Bp, Dp)."""
    Tp, Bp, Dp = x_p.shape
    Hp = w_hh_p.shape[0]
    n_chunks = Tp // tc

    kernel = functools.partial(_lstm_layer_kernel, tc=tc, hp=Hp)
    out, hN, cN = pl.pallas_call(
        kernel,
        out_shape=(jax.ShapeDtypeStruct((Tp, Bp, Hp), out_dtype),
                   jax.ShapeDtypeStruct((Bp, Hp), jnp.float32),
                   jax.ShapeDtypeStruct((Bp, Hp), jnp.float32)),
        grid_spec=pltpu.PrefetchScalarGridSpec(
            num_scalar_prefetch=1,
            grid=(n_chunks,),
            in_specs=[
                pl.BlockSpec((tc, Bp, Dp), lambda c, nv: (c, 0, 0)),    # x chunk
                pl.BlockSpec((tc, Bp, 1), lambda c, nv: (c, 0, 0)),     # mask chunk
                pl.BlockSpec((Dp, 4 * Hp), lambda c, nv: (0, 0)),       # W_ih (resident)
                pl.BlockSpec((Hp, 4 * Hp), lambda c, nv: (0, 0)),       # W_hh (resident)
                pl.BlockSpec((1, 4 * Hp), lambda c, nv: (0, 0)),        # bias (resident)
            ],
            out_specs=[
                pl.BlockSpec((tc, Bp, Hp), lambda c, nv: (c, 0, 0)),    # outputs
                pl.BlockSpec((Bp, Hp), lambda c, nv: (0, 0)),           # h_n (carry)
                pl.BlockSpec((Bp, Hp), lambda c, nv: (0, 0)),           # c_n (carry)
            ],
            scratch_shapes=[pltpu.VMEM((tc, Bp, 4 * Hp), jnp.float32)],
        ),
        compiler_params=pltpu.CompilerParams(
            dimension_semantics=("arbitrary",),          # time recurrence is serial
            vmem_limit_bytes=32 * 1024 * 1024),
    )(nvalid, x_p, mask_p, w_ih_p, w_hh_p, b_p)
    return out, hN, cN


def _pad_lstm_weights(w_ih, w_hh, b, Dp, Hp, dtype):
    """Pad (Din,4H)/(H,4H)/(4H,) to lane-dense (Dp,4Hp)/(Hp,4Hp)/(1,4Hp), keeping
    gate order i,f,g,o and zero-padding per gate block so padded hidden units
    stay exactly zero through the recurrence."""
    Din, H4 = w_ih.shape
    H = H4 // 4
    w_ih_p = (jnp.zeros((Dp, 4, Hp), dtype)
              .at[:Din, :, :H].set(w_ih.reshape(Din, 4, H).astype(dtype))
              .reshape(Dp, 4 * Hp))
    w_hh_p = (jnp.zeros((Hp, 4, Hp), dtype)
              .at[:H, :, :H].set(w_hh.reshape(H, 4, H).astype(dtype))
              .reshape(Hp, 4 * Hp))
    b_p = (jnp.zeros((1, 4, Hp), jnp.float32)
           .at[:, :, :H].set(b.reshape(1, 4, H).astype(jnp.float32))
           .reshape(1, 4 * Hp))
    return w_ih_p, w_hh_p, b_p


# ----------------------------------------------------------------------------
# Encoder forward (eval mode): embedding + dropout(identity) + LSTM stack.
# ----------------------------------------------------------------------------
def encoder_forward(params, x_tokens, lengths, *,
                    time_chunk=16, compute_dtype=jnp.float32):
    """x_tokens: (B, T) int32, lengths: (B,) int32.
    Returns (outputs (B, T, H), (h_n (L, B, H), c_n (L, B, H)))."""
    B, T = x_tokens.shape
    E = params["embedding"].shape[1]
    H = params["layers"][0][1].shape[0]
    lengths = lengths.astype(jnp.int32)

    Bp = _round_up(B, 8)                    # sublane-dense batch
    Hp = _round_up(H, 128)                  # lane-dense hidden
    Ep = _round_up(E, 128)                  # lane-dense embedding
    tc = min(time_chunk, _round_up(T, 8))   # time-chunk size
    Tp = _round_up(T, tc)

    # Embedding lookup directly time-major (transpose the tiny token matrix,
    # not the activation).  nn.Dropout in eval mode is the identity.
    emb_tm = jnp.take(params["embedding"], x_tokens.T, axis=0)       # (T, B, E) glue gather
    layer_in = (jnp.zeros((Tp, Bp, Ep), compute_dtype)
                .at[:T, :B, :E].set(emb_tm.astype(compute_dtype)))

    # pack_padded_sequence semantics: per-(t,b) validity mask + number of time
    # chunks containing any valid step (kernel skips all-padding chunks).
    lens_p = jnp.zeros((Bp,), jnp.int32).at[:B].set(lengths)
    t_ids = jnp.arange(Tp, dtype=jnp.int32)
    mask = (t_ids[:, None] < lens_p[None, :]).astype(jnp.float32)[:, :, None]  # (Tp,Bp,1)
    nvalid = jnp.reshape((jnp.max(lengths) + tc - 1) // tc, (1,)).astype(jnp.int32)

    h_list, c_list = [], []
    for (w_ih, w_hh, b) in params["layers"]:
        Dp = layer_in.shape[-1]
        w_ih_p, w_hh_p, b_p = _pad_lstm_weights(w_ih, w_hh, b, Dp, Hp, compute_dtype)
        layer_in, hN, cN = _lstm_layer(layer_in, mask, w_ih_p, w_hh_p, b_p, nvalid,
                                       tc=tc, out_dtype=compute_dtype)
        h_list.append(hN[:B, :H])
        c_list.append(cN[:B, :H])

    outputs = jnp.transpose(layer_in[:T, :B, :H], (1, 0, 2)).astype(jnp.float32)  # (B,T,H)
    h_n = jnp.stack(h_list, axis=0)                                  # (L, B, H)
    c_n = jnp.stack(c_list, axis=0)                                  # (L, B, H)
    return outputs, (h_n, c_n)


def init_encoder_params(key, vocab_size, embed_dim, hidden_dim, num_layers):
    keys = jax.random.split(key, 1 + 3 * num_layers)
    params = {"embedding": 0.1 * jax.random.normal(
        keys[0], (vocab_size, embed_dim), jnp.float32)}
    layers = []
    for l in range(num_layers):
        in_dim = embed_dim if l == 0 else hidden_dim
        kw, ku, kb = keys[1 + 3 * l:4 + 3 * l]
        # Stored transposed relative to PyTorch: (in_dim, 4H) so the kernel does x @ W.
        w_ih = 0.1 * jax.random.normal(kw, (in_dim, 4 * hidden_dim), jnp.float32)
        w_hh = 0.1 * jax.random.normal(ku, (hidden_dim, 4 * hidden_dim), jnp.float32)
        b = 0.1 * jax.random.normal(kb, (4 * hidden_dim,), jnp.float32)  # b_ih + b_hh merged
        layers.append((w_ih, w_hh, b))
    params["layers"] = layers
    return params


if __name__ == "__main__":
    VOCAB, EMBED, HIDDEN, LAYERS = 50, 32, 32, 2
    B, T = 4, 8

    key = jax.random.PRNGKey(0)
    k_par, k_tok = jax.random.split(key)
    params = init_encoder_params(k_par, VOCAB, EMBED, HIDDEN, LAYERS)

    x = jax.random.randint(k_tok, (B, T), 0, VOCAB, dtype=jnp.int32)
    # max(lengths) == T so the padded output length matches pad_packed_sequence.
    lengths = jnp.array([8, 5, 3, 8], dtype=jnp.int32)

    fwd = jax.jit(functools.partial(encoder_forward, params))
    outputs, (h_n, c_n) = jax.block_until_ready(fwd(x, lengths))

    assert outputs.shape == (B, T, HIDDEN)
    assert h_n.shape == (LAYERS, B, HIDDEN) and c_n.shape == (LAYERS, B, HIDDEN)
    assert bool(jnp.all(jnp.isfinite(outputs)))
    print("KERNEL_OK")
</pallas_src>

<mosaic_0001>
module attributes {stable_mosaic.version = 11 : i64} {
  func.func @_lstm_layer_kernel(%arg0: i32, %arg1: memref<1xi32, #tpu.memory_space<smem>>, %arg2: memref<8x8x128xf32, #tpu.memory_space<vmem>>, %arg3: memref<8x8x1xf32, #tpu.memory_space<vmem>>, %arg4: memref<128x512xf32, #tpu.memory_space<vmem>>, %arg5: memref<128x512xf32, #tpu.memory_space<vmem>>, %arg6: memref<1x512xf32, #tpu.memory_space<vmem>>, %arg7: memref<8x8x128xf32, #tpu.memory_space<vmem>>, %arg8: memref<8x128xf32, #tpu.memory_space<vmem>>, %arg9: memref<8x128xf32, #tpu.memory_space<vmem>>, %arg10: memref<8x8x512xf32, #tpu.memory_space<vmem>>) attributes {dimension_semantics = [#tpu.dimension_semantics<arbitrary>], iteration_bounds = array<i64: 1>, scalar_prefetch = 1 : i64, scratch_operands = 1 : i64, tpu.core_type = #tpu.core_type<tc>, window_params = [{transform_indices = @transform_0, window_bounds = array<i64: 8, 8, 128>}, {transform_indices = @transform_1, window_bounds = array<i64: 8, 8, 1>}, {pipeline_mode = #tpu.pipeline_mode<synchronous>, transform_indices = @transform_2, window_bounds = array<i64: 128, 512>}, {pipeline_mode = #tpu.pipeline_mode<synchronous>, transform_indices = @transform_3, window_bounds = array<i64: 128, 512>}, {pipeline_mode = #tpu.pipeline_mode<synchronous>, transform_indices = @transform_4, window_bounds = array<i64: 1, 512>}, {transform_indices = @transform_5, window_bounds = array<i64: 8, 8, 128>}, {pipeline_mode = #tpu.pipeline_mode<synchronous>, transform_indices = @transform_6, window_bounds = array<i64: 8, 128>}, {pipeline_mode = #tpu.pipeline_mode<synchronous>, transform_indices = @transform_7, window_bounds = array<i64: 8, 128>}]} {
    %c0_i32 = arith.constant 0 : i32
    %0 = arith.cmpi eq, %arg0, %c0_i32 : i32
    %1 = arith.extui %0 : i1 to i32
    %c0_i32_0 = arith.constant 0 : i32
    %2 = arith.cmpi ne, %1, %c0_i32_0 : i32
    scf.if %2 {
      %cst = arith.constant 0.000000e+00 : f32
      %11 = vector.broadcast %cst : f32 to vector<8x128xf32>
      %c0_4 = arith.constant 0 : index
      %c0_5 = arith.constant 0 : index
      %12 = vector.load %arg8[%c0_4, %c0_5] : memref<8x128xf32, #tpu.memory_space<vmem>>, vector<8x128xf32>
      tpu.vector_store %arg8[%c0_4, %c0_5], %11 {strides = array<i32>} : memref<8x128xf32, #tpu.memory_space<vmem>>, vector<8x128xf32>,
      %cst_6 = arith.constant 0.000000e+00 : f32
      %13 = vector.broadcast %cst_6 : f32 to vector<8x128xf32>
      %c0_7 = arith.constant 0 : index
      %c0_8 = arith.constant 0 : index
      %14 = vector.load %arg9[%c0_7, %c0_8] : memref<8x128xf32, #tpu.memory_space<vmem>>, vector<8x128xf32>
      tpu.vector_store %arg9[%c0_7, %c0_8], %13 {strides = array<i32>} : memref<8x128xf32, #tpu.memory_space<vmem>>, vector<8x128xf32>,
    } else {
    }
    %c0 = arith.constant 0 : index
    %3 = memref.load %arg1[%c0] : memref<1xi32, #tpu.memory_space<smem>>
    %4 = arith.cmpi sge, %arg0, %3 : i32
    %5 = arith.extui %4 : i1 to i32
    %c0_i32_1 = arith.constant 0 : i32
    %6 = arith.cmpi ne, %5, %c0_i32_1 : i32
    scf.if %6 {
      %cst = arith.constant 0.000000e+00 : f32
      %11 = vector.broadcast %cst : f32 to vector<8x8x128xf32>
      %c0_4 = arith.constant 0 : index
      %c0_5 = arith.constant 0 : index
      %c0_6 = arith.constant 0 : index
      %12 = vector.load %arg7[%c0_4, %c0_5, %c0_6] : memref<8x8x128xf32, #tpu.memory_space<vmem>>, vector<8x8x128xf32>
      tpu.vector_store %arg7[%c0_4, %c0_5, %c0_6], %11 {strides = array<i32>} : memref<8x8x128xf32, #tpu.memory_space<vmem>>, vector<8x8x128xf32>,
    } else {
    }
    %c0_2 = arith.constant 0 : index
    %7 = memref.load %arg1[%c0_2] : memref<1xi32, #tpu.memory_space<smem>>
    %8 = arith.cmpi slt, %arg0, %7 : i32
    %9 = arith.extui %8 : i1 to i32
    %c0_i32_3 = arith.constant 0 : i32
    %10 = arith.cmpi ne, %9, %c0_i32_3 : i32
    scf.if %10 {
      %c0_4 = arith.constant 0 : index
      %c0_5 = arith.constant 0 : index
      %c0_6 = arith.constant 0 : index
      %11 = vector.load %arg2[%c0_4, %c0_5, %c0_6] : memref<8x8x128xf32, #tpu.memory_space<vmem>>, vector<8x8x128xf32>
      %12 = vector.shape_cast %11 : vector<8x8x128xf32> to vector<64x128xf32>
      %c0_7 = arith.constant 0 : index
      %c0_8 = arith.constant 0 : index
      %13 = vector.load %arg4[%c0_7, %c0_8] : memref<128x512xf32, #tpu.memory_space<vmem>>, vector<128x512xf32>
      %cst = arith.constant dense<0.000000e+00> : vector<64x512xf32>
      %14 = tpu.matmul %12, %13, %cst {dimension_numbers = #tpu.dot_dimension_numbers<[1], [0], [0], [1], [0, 0, 1, 1], [], []>} : vector<64x128xf32>, vector<128x512xf32>, vector<64x512xf32> -> vector<64x512xf32>
      %c0_9 = arith.constant 0 : index
      %c0_10 = arith.constant 0 : index
      %15 = vector.load %arg6[%c0_9, %c0_10] : memref<1x512xf32, #tpu.memory_space<vmem>>, vector<1x512xf32>
      %16 = vector.broadcast %15 : vector<1x512xf32> to vector<64x512xf32>
      %17 = arith.addf %14, %16 : vector<64x512xf32>
      %18 = vector.shape_cast %17 : vector<64x512xf32> to vector<8x8x512xf32>
      %c0_11 = arith.constant 0 : index
      %c0_12 = arith.constant 0 : index
      %c0_13 = arith.constant 0 : index
      %19 = vector.load %arg10[%c0_11, %c0_12, %c0_13] : memref<8x8x512xf32, #tpu.memory_space<vmem>>, vector<8x8x512xf32>
      tpu.vector_store %arg10[%c0_11, %c0_12, %c0_13], %18 {strides = array<i32>} : memref<8x8x512xf32, #tpu.memory_space<vmem>>, vector<8x8x512xf32>,
      %c0_14 = arith.constant 0 : index
      %c0_15 = arith.constant 0 : index
      %20 = vector.load %arg8[%c0_14, %c0_15] : memref<8x128xf32, #tpu.memory_space<vmem>>, vector<8x128xf32>
      %c0_16 = arith.constant 0 : index
      %c0_17 = arith.constant 0 : index
      %21 = vector.load %arg9[%c0_16, %c0_17] : memref<8x128xf32, #tpu.memory_space<vmem>>, vector<8x128xf32>
      %c0_18 = arith.constant 0 : index
      %c0_19 = arith.constant 0 : index
      %c0_20 = arith.constant 0 : index
      %22 = vector.load %arg10[%c0_18, %c0_19, %c0_20] : memref<8x8x512xf32, #tpu.memory_space<vmem>>, vector<1x8x512xf32>
      %23 = vector.shape_cast %22 : vector<1x8x512xf32> to vector<8x512xf32>
      %c0_21 = arith.constant 0 : index
      %c0_22 = arith.constant 0 : index
      %24 = vector.load %arg5[%c0_21, %c0_22] : memref<128x512xf32, #tpu.memory_space<vmem>>, vector<128x512xf32>
      %cst_23 = arith.constant dense<0.000000e+00> : vector<8x512xf32>
      %25 = tpu.matmul %20, %24, %cst_23 {dimension_numbers = #tpu.dot_dimension_numbers<[1], [0], [0], [1], [0, 0, 1, 1], [], []>} : vector<8x128xf32>, vector<128x512xf32>, vector<8x512xf32> -> vector<8x512xf32>
      %26 = arith.addf %23, %25 : vector<8x512xf32>
      %27 = vector.extract_strided_slice %26 {offsets = [0, 0], sizes = [8, 128], strides = [1, 1]} : vector<8x512xf32> to vector<8x128xf32>
      %28 = arith.negf %27 : vector<8x128xf32>
      %29 = math.exp %28 : vector<8x128xf32>
      %cst_24 = arith.constant 1.000000e+00 : f32
      %30 = vector.broadcast %cst_24 : f32 to vector<8x128xf32>
      %31 = arith.addf %30, %29 : vector<8x128xf32>
      %32 = arith.divf %30, %31 : vector<8x128xf32>
      %33 = vector.extract_strided_slice %26 {offsets = [0, 128], sizes = [8, 128], strides = [1, 1]} : vector<8x512xf32> to vector<8x128xf32>
      %34 = arith.negf %33 : vector<8x128xf32>
      %35 = math.exp %34 : vector<8x128xf32>
      %cst_25 = arith.constant 1.000000e+00 : f32
      %36 = vector.broadcast %cst_25 : f32 to vector<8x128xf32>
      %37 = arith.addf %36, %35 : vector<8x128xf32>
      %38 = arith.divf %36, %37 : vector<8x128xf32>
      %39 = vector.extract_strided_slice %26 {offsets = [0, 256], sizes = [8, 128], strides = [1, 1]} : vector<8x512xf32> to vector<8x128xf32>
      %40 = math.tanh %39 : vector<8x128xf32>
      %41 = vector.extract_strided_slice %26 {offsets = [0, 384], sizes = [8, 128], strides = [1, 1]} : vector<8x512xf32> to vector<8x128xf32>
      %42 = arith.negf %41 : vector<8x128xf32>
      %43 = math.exp %42 : vector<8x128xf32>
      %cst_26 = arith.constant 1.000000e+00 : f32
      %44 = vector.broadcast %cst_26 : f32 to vector<8x128xf32>
      %45 = arith.addf %44, %43 : vector<8x128xf32>
      %46 = arith.divf %44, %45 : vector<8x128xf32>
      %47 = arith.mulf %38, %21 : vector<8x128xf32>
      %48 = arith.mulf %32, %40 : vector<8x128xf32>
      %49 = arith.addf %47, %48 : vector<8x128xf32>
      %50 = math.tanh %49 : vector<8x128xf32>
      %51 = arith.mulf %46, %50 : vector<8x128xf32>
      %c0_27 = arith.constant 0 : index
      %c0_28 = arith.constant 0 : index
      %c0_29 = arith.constant 0 : index
      %52 = vector.load %arg3[%c0_27, %c0_28, %c0_29] : memref<8x8x1xf32, #tpu.memory_space<vmem>>, vector<1x8x1xf32>
      %53 = vector.shape_cast %52 : vector<1x8x1xf32> to vector<8x1xf32>
      %54 = vector.broadcast %53 : vector<8x1xf32> to vector<8x128xf32>
      %55 = arith.mulf %54, %51 : vector<8x128xf32>
      %cst_30 = arith.constant 1.000000e+00 : f32
      %56 = vector.broadcast %cst_30 : f32 to vector<8x1xf32>
      %57 = arith.subf %56, %53 : vector<8x1xf32>
      %58 = vector.broadcast %57 : vector<8x1xf32> to vector<8x128xf32>
      %59 = arith.mulf %58, %20 : vector<8x128xf32>
      %60 = arith.addf %55, %59 : vector<8x128xf32>
      %61 = vector.broadcast %53 : vector<8x1xf32> to vector<8x128xf32>
      %62 = arith.mulf %61, %49 : vector<8x128xf32>
      %cst_31 = arith.constant 1.000000e+00 : f32
      %63 = vector.broadcast %cst_31 : f32 to vector<8x1xf32>
      %64 = arith.subf %63, %53 : vector<8x1xf32>
      %65 = vector.broadcast %64 : vector<8x1xf32> to vector<8x128xf32>
      %66 = arith.mulf %65, %21 : vector<8x128xf32>
      %67 = arith.addf %62, %66 : vector<8x128xf32>
      %68 = vector.broadcast %53 : vector<8x1xf32> to vector<8x128xf32>
      %69 = arith.mulf %68, %51 : vector<8x128xf32>
      %c0_32 = arith.constant 0 : index
      %c0_33 = arith.constant 0 : index
      %c0_34 = arith.constant 0 : index
      %70 = vector.load %arg7[%c0_32, %c0_33, %c0_34] : memref<8x8x128xf32, #tpu.memory_space<vmem>>, vector<1x8x128xf32>
      %71 = vector.shape_cast %70 : vector<1x8x128xf32> to vector<8x128xf32>
      %72 = vector.shape_cast %69 : vector<8x128xf32> to vector<1x8x128xf32>
      tpu.vector_store %arg7[%c0_32, %c0_33, %c0_34], %72 {strides = array<i32>} : memref<8x8x128xf32, #tpu.memory_space<vmem>>, vector<1x8x128xf32>,
      %c1 = arith.constant 1 : index
      %c0_35 = arith.constant 0 : index
      %c0_36 = arith.constant 0 : index
      %73 = vector.load %arg10[%c1, %c0_35, %c0_36] : memref<8x8x512xf32, #tpu.memory_space<vmem>>, vector<1x8x512xf32>
      %74 = vector.shape_cast %73 : vector<1x8x512xf32> to vector<8x512xf32>
      %c0_37 = arith.constant 0 : index
      %c0_38 = arith.constant 0 : index
      %75 = vector.load %arg5[%c0_37, %c0_38] : memref<128x512xf32, #tpu.memory_space<vmem>>, vector<128x512xf32>
      %cst_39 = arith.constant dense<0.000000e+00> : vector<8x512xf32>
      %76 = tpu.matmul %60, %75, %cst_39 {dimension_numbers = #tpu.dot_dimension_numbers<[1], [0], [0], [1], [0, 0, 1, 1], [], []>} : vector<8x128xf32>, vector<128x512xf32>, vector<8x512xf32> -> vector<8x512xf32>
      %77 = arith.addf %74, %76 : vector<8x512xf32>
      %78 = vector.extract_strided_slice %77 {offsets = [0, 0], sizes = [8, 128], strides = [1, 1]} : vector<8x512xf32> to vector<8x128xf32>
      %79 = arith.negf %78 : vector<8x128xf32>
      %80 = math.exp %79 : vector<8x128xf32>
      %cst_40 = arith.constant 1.000000e+00 : f32
      %81 = vector.broadcast %cst_40 : f32 to vector<8x128xf32>
      %82 = arith.addf %81, %80 : vector<8x128xf32>
      %83 = arith.divf %81, %82 : vector<8x128xf32>
      %84 = vector.extract_strided_slice %77 {offsets = [0, 128], sizes = [8, 128], strides = [1, 1]} : vector<8x512xf32> to vector<8x128xf32>
      %85 = arith.negf %84 : vector<8x128xf32>
      %86 = math.exp %85 : vector<8x128xf32>
      %cst_41 = arith.constant 1.000000e+00 : f32
      %87 = vector.broadcast %cst_41 : f32 to vector<8x128xf32>
      %88 = arith.addf %87, %86 : vector<8x128xf32>
      %89 = arith.divf %87, %88 : vector<8x128xf32>
      %90 = vector.extract_strided_slice %77 {offsets = [0, 256], sizes = [8, 128], strides = [1, 1]} : vector<8x512xf32> to vector<8x128xf32>
      %91 = math.tanh %90 : vector<8x128xf32>
      %92 = vector.extract_strided_slice %77 {offsets = [0, 384], sizes = [8, 128], strides = [1, 1]} : vector<8x512xf32> to vector<8x128xf32>
      %93 = arith.negf %92 : vector<8x128xf32>
      %94 = math.exp %93 : vector<8x128xf32>
      %cst_42 = arith.constant 1.000000e+00 : f32
      %95 = vector.broadcast %cst_42 : f32 to vector<8x128xf32>
      %96 = arith.addf %95, %94 : vector<8x128xf32>
      %97 = arith.divf %95, %96 : vector<8x128xf32>
      %98 = arith.mulf %89, %67 : vector<8x128xf32>
      %99 = arith.mulf %83, %91 : vector<8x128xf32>
      %100 = arith.addf %98, %99 : vector<8x128xf32>
      %101 = math.tanh %100 : vector<8x128xf32>
      %102 = arith.mulf %97, %101 : vector<8x128xf32>
      %c1_43 = arith.constant 1 : index
      %c0_44 = arith.constant 0 : index
      %c0_45 = arith.constant 0 : index
      %103 = vector.load %arg3[%c1_43, %c0_44, %c0_45] : memref<8x8x1xf32, #tpu.memory_space<vmem>>, vector<1x8x1xf32>
      %104 = vector.shape_cast %103 : vector<1x8x1xf32> to vector<8x1xf32>
      %105 = vector.broadcast %104 : vector<8x1xf32> to vector<8x128xf32>
      %106 = arith.mulf %105, %102 : vector<8x128xf32>
      %cst_46 = arith.constant 1.000000e+00 : f32
      %107 = vector.broadcast %cst_46 : f32 to vector<8x1xf32>
      %108 = arith.subf %107, %104 : vector<8x1xf32>
      %109 = vector.broadcast %108 : vector<8x1xf32> to vector<8x128xf32>
      %110 = arith.mulf %109, %60 : vector<8x128xf32>
      %111 = arith.addf %106, %110 : vector<8x128xf32>
      %112 = vector.broadcast %104 : vector<8x1xf32> to vector<8x128xf32>
      %113 = arith.mulf %112, %100 : vector<8x128xf32>
      %cst_47 = arith.constant 1.000000e+00 : f32
      %114 = vector.broadcast %cst_47 : f32 to vector<8x1xf32>
      %115 = arith.subf %114, %104 : vector<8x1xf32>
      %116 = vector.broadcast %115 : vector<8x1xf32> to vector<8x128xf32>
      %117 = arith.mulf %116, %67 : vector<8x128xf32>
      %118 = arith.addf %113, %117 : vector<8x128xf32>
      %119 = vector.broadcast %104 : vector<8x1xf32> to vector<8x128xf32>
      %120 = arith.mulf %119, %102 : vector<8x128xf32>
      %c1_48 = arith.constant 1 : index
      %c0_49 = arith.constant 0 : index
      %c0_50 = arith.constant 0 : index
      %121 = vector.load %arg7[%c1_48, %c0_49, %c0_50] : memref<8x8x128xf32, #tpu.memory_space<vmem>>, vector<1x8x128xf32>
      %122 = vector.shape_cast %121 : vector<1x8x128xf32> to vector<8x128xf32>
      %123 = vector.shape_cast %120 : vector<8x128xf32> to vector<1x8x128xf32>
      tpu.vector_store %arg7[%c1_48, %c0_49, %c0_50], %123 {strides = array<i32>} : memref<8x8x128xf32, #tpu.memory_space<vmem>>, vector<1x8x128xf32>,
      %c2 = arith.constant 2 : index
      %c0_51 = arith.constant 0 : index
      %c0_52 = arith.constant 0 : index
      %124 = vector.load %arg10[%c2, %c0_51, %c0_52] : memref<8x8x512xf32, #tpu.memory_space<vmem>>, vector<1x8x512xf32>
      %125 = vector.shape_cast %124 : vector<1x8x512xf32> to vector<8x512xf32>
      %c0_53 = arith.constant 0 : index
      %c0_54 = arith.constant 0 : index
      %126 = vector.load %arg5[%c0_53, %c0_54] : memref<128x512xf32, #tpu.memory_space<vmem>>, vector<128x512xf32>
      %cst_55 = arith.constant dense<0.000000e+00> : vector<8x512xf32>
      %127 = tpu.matmul %111, %126, %cst_55 {dimension_numbers = #tpu.dot_dimension_numbers<[1], [0], [0], [1], [0, 0, 1, 1], [], []>} : vector<8x128xf32>, vector<128x512xf32>, vector<8x512xf32> -> vector<8x512xf32>
      %128 = arith.addf %125, %127 : vector<8x512xf32>
      %129 = vector.extract_strided_slice %128 {offsets = [0, 0], sizes = [8, 128], strides = [1, 1]} : vector<8x512xf32> to vector<8x128xf32>
      %130 = arith.negf %129 : vector<8x128xf32>
      %131 = math.exp %130 : vector<8x128xf32>
      %cst_56 = arith.constant 1.000000e+00 : f32
      %132 = vector.broadcast %cst_56 : f32 to vector<8x128xf32>
      %133 = arith.addf %132, %131 : vector<8x128xf32>
      %134 = arith.divf %132, %133 : vector<8x128xf32>
      %135 = vector.extract_strided_slice %128 {offsets = [0, 128], sizes = [8, 128], strides = [1, 1]} : vector<8x512xf32> to vector<8x128xf32>
      %136 = arith.negf %135 : vector<8x128xf32>
      %137 = math.exp %136 : vector<8x128xf32>
      %cst_57 = arith.constant 1.000000e+00 : f32
      %138 = vector.broadcast %cst_57 : f32 to vector<8x128xf32>
      %139 = arith.addf %138, %137 : vector<8x128xf32>
      %140 = arith.divf %138, %139 : vector<8x128xf32>
      %141 = vector.extract_strided_slice %128 {offsets = [0, 256], sizes = [8, 128], strides = [1, 1]} : vector<8x512xf32> to vector<8x128xf32>
      %142 = math.tanh %141 : vector<8x128xf32>
      %143 = vector.extract_strided_slice %128 {offsets = [0, 384], sizes = [8, 128], strides = [1, 1]} : vector<8x512xf32> to vector<8x128xf32>
      %144 = arith.negf %143 : vector<8x128xf32>
      %145 = math.exp %144 : vector<8x128xf32>
      %cst_58 = arith.constant 1.000000e+00 : f32
      %146 = vector.broadcast %cst_58 : f32 to vector<8x128xf32>
      %147 = arith.addf %146, %145 : vector<8x128xf32>
      %148 = arith.divf %146, %147 : vector<8x128xf32>
      %149 = arith.mulf %140, %118 : vector<8x128xf32>
      %150 = arith.mulf %134, %142 : vector<8x128xf32>
      %151 = arith.addf %149, %150 : vector<8x128xf32>
      %152 = math.tanh %151 : vector<8x128xf32>
      %153 = arith.mulf %148, %152 : vector<8x128xf32>
      %c2_59 = arith.constant 2 : index
      %c0_60 = arith.constant 0 : index
      %c0_61 = arith.constant 0 : index
      %154 = vector.load %arg3[%c2_59, %c0_60, %c0_61] : memref<8x8x1xf32, #tpu.memory_space<vmem>>, vector<1x8x1xf32>
      %155 = vector.shape_cast %154 : vector<1x8x1xf32> to vector<8x1xf32>
      %156 = vector.broadcast %155 : vector<8x1xf32> to vector<8x128xf32>
      %157 = arith.mulf %156, %153 : vector<8x128xf32>
      %cst_62 = arith.constant 1.000000e+00 : f32
      %158 = vector.broadcast %cst_62 : f32 to vector<8x1xf32>
      %159 = arith.subf %158, %155 : vector<8x1xf32>
      %160 = vector.broadcast %159 : vector<8x1xf32> to vector<8x128xf32>
      %161 = arith.mulf %160, %111 : vector<8x128xf32>
      %162 = arith.addf %157, %161 : vector<8x128xf32>
      %163 = vector.broadcast %155 : vector<8x1xf32> to vector<8x128xf32>
      %164 = arith.mulf %163, %151 : vector<8x128xf32>
      %cst_63 = arith.constant 1.000000e+00 : f32
      %165 = vector.broadcast %cst_63 : f32 to vector<8x1xf32>
      %166 = arith.subf %165, %155 : vector<8x1xf32>
      %167 = vector.broadcast %166 : vector<8x1xf32> to vector<8x128xf32>
      %168 = arith.mulf %167, %118 : vector<8x128xf32>
      %169 = arith.addf %164, %168 : vector<8x128xf32>
      %170 = vector.broadcast %155 : vector<8x1xf32> to vector<8x128xf32>
      %171 = arith.mulf %170, %153 : vector<8x128xf32>
      %c2_64 = arith.constant 2 : index
      %c0_65 = arith.constant 0 : index
      %c0_66 = arith.constant 0 : index
      %172 = vector.load %arg7[%c2_64, %c0_65, %c0_66] : memref<8x8x128xf32, #tpu.memory_space<vmem>>, vector<1x8x128xf32>
      %173 = vector.shape_cast %172 : vector<1x8x128xf32> to vector<8x128xf32>
      %174 = vector.shape_cast %171 : vector<8x128xf32> to vector<1x8x128xf32>
      tpu.vector_store %arg7[%c2_64, %c0_65, %c0_66], %174 {strides = array<i32>} : memref<8x8x128xf32, #tpu.memory_space<vmem>>, vector<1x8x128xf32>,
      %c3 = arith.constant 3 : index
      %c0_67 = arith.constant 0 : index
      %c0_68 = arith.constant 0 : index
      %175 = vector.load %arg10[%c3, %c0_67, %c0_68] : memref<8x8x512xf32, #tpu.memory_space<vmem>>, vector<1x8x512xf32>
      %176 = vector.shape_cast %175 : vector<1x8x512xf32> to vector<8x512xf32>
      %c0_69 = arith.constant 0 : index
      %c0_70 = arith.constant 0 : index
      %177 = vector.load %arg5[%c0_69, %c0_70] : memref<128x512xf32, #tpu.memory_space<vmem>>, vector<128x512xf32>
      %cst_71 = arith.constant dense<0.000000e+00> : vector<8x512xf32>
      %178 = tpu.matmul %162, %177, %cst_71 {dimension_numbers = #tpu.dot_dimension_numbers<[1], [0], [0], [1], [0, 0, 1, 1], [], []>} : vector<8x128xf32>, vector<128x512xf32>, vector<8x512xf32> -> vector<8x512xf32>
      %179 = arith.addf %176, %178 : vector<8x512xf32>
      %180 = vector.extract_strided_slice %179 {offsets = [0, 0], sizes = [8, 128], strides = [1, 1]} : vector<8x512xf32> to vector<8x128xf32>
      %181 = arith.negf %180 : vector<8x128xf32>
      %182 = math.exp %181 : vector<8x128xf32>
      %cst_72 = arith.constant 1.000000e+00 : f32
      %183 = vector.broadcast %cst_72 : f32 to vector<8x128xf32>
      %184 = arith.addf %183, %182 : vector<8x128xf32>
      %185 = arith.divf %183, %184 : vector<8x128xf32>
      %186 = vector.extract_strided_slice %179 {offsets = [0, 128], sizes = [8, 128], strides = [1, 1]} : vector<8x512xf32> to vector<8x128xf32>
      %187 = arith.negf %186 : vector<8x128xf32>
      %188 = math.exp %187 : vector<8x128xf32>
      %cst_73 = arith.constant 1.000000e+00 : f32
      %189 = vector.broadcast %cst_73 : f32 to vector<8x128xf32>
      %190 = arith.addf %189, %188 : vector<8x128xf32>
      %191 = arith.divf %189, %190 : vector<8x128xf32>
      %192 = vector.extract_strided_slice %179 {offsets = [0, 256], sizes = [8, 128], strides = [1, 1]} : vector<8x512xf32> to vector<8x128xf32>
      %193 = math.tanh %192 : vector<8x128xf32>
      %194 = vector.extract_strided_slice %179 {offsets = [0, 384], sizes = [8, 128], strides = [1, 1]} : vector<8x512xf32> to vector<8x128xf32>
      %195 = arith.negf %194 : vector<8x128xf32>
      %196 = math.exp %195 : vector<8x128xf32>
      %cst_74 = arith.constant 1.000000e+00 : f32
      %197 = vector.broadcast %cst_74 : f32 to vector<8x128xf32>
      %198 = arith.addf %197, %196 : vector<8x128xf32>
      %199 = arith.divf %197, %198 : vector<8x128xf32>
      %200 = arith.mulf %191, %169 : vector<8x128xf32>
      %201 = arith.mulf %185, %193 : vector<8x128xf32>
      %202 = arith.addf %200, %201 : vector<8x128xf32>
      %203 = math.tanh %202 : vector<8x128xf32>
      %204 = arith.mulf %199, %203 : vector<8x128xf32>
      %c3_75 = arith.constant 3 : index
      %c0_76 = arith.constant 0 : index
      %c0_77 = arith.constant 0 : index
      %205 = vector.load %arg3[%c3_75, %c0_76, %c0_77] : memref<8x8x1xf32, #tpu.memory_space<vmem>>, vector<1x8x1xf32>
      %206 = vector.shape_cast %205 : vector<1x8x1xf32> to vector<8x1xf32>
      %207 = vector.broadcast %206 : vector<8x1xf32> to vector<8x128xf32>
      %208 = arith.mulf %207, %204 : vector<8x128xf32>
      %cst_78 = arith.constant 1.000000e+00 : f32
      %209 = vector.broadcast %cst_78 : f32 to vector<8x1xf32>
      %210 = arith.subf %209, %206 : vector<8x1xf32>
      %211 = vector.broadcast %210 : vector<8x1xf32> to vector<8x128xf32>
      %212 = arith.mulf %211, %162 : vector<8x128xf32>
      %213 = arith.addf %208, %212 : vector<8x128xf32>
      %214 = vector.broadcast %206 : vector<8x1xf32> to vector<8x128xf32>
      %215 = arith.mulf %214, %202 : vector<8x128xf32>
      %cst_79 = arith.constant 1.000000e+00 : f32
      %216 = vector.broadcast %cst_79 : f32 to vector<8x1xf32>
      %217 = arith.subf %216, %206 : vector<8x1xf32>
      %218 = vector.broadcast %217 : vector<8x1xf32> to vector<8x128xf32>
      %219 = arith.mulf %218, %169 : vector<8x128xf32>
      %220 = arith.addf %215, %219 : vector<8x128xf32>
      %221 = vector.broadcast %206 : vector<8x1xf32> to vector<8x128xf32>
      %222 = arith.mulf %221, %204 : vector<8x128xf32>
      %c3_80 = arith.constant 3 : index
      %c0_81 = arith.constant 0 : index
      %c0_82 = arith.constant 0 : index
      %223 = vector.load %arg7[%c3_80, %c0_81, %c0_82] : memref<8x8x128xf32, #tpu.memory_space<vmem>>, vector<1x8x128xf32>
      %224 = vector.shape_cast %223 : vector<1x8x128xf32> to vector<8x128xf32>
      %225 = vector.shape_cast %222 : vector<8x128xf32> to vector<1x8x128xf32>
      tpu.vector_store %arg7[%c3_80, %c0_81, %c0_82], %225 {strides = array<i32>} : memref<8x8x128xf32, #tpu.memory_space<vmem>>, vector<1x8x128xf32>,
      %c4 = arith.constant 4 : index
      %c0_83 = arith.constant 0 : index
      %c0_84 = arith.constant 0 : index
      %226 = vector.load %arg10[%c4, %c0_83, %c0_84] : memref<8x8x512xf32, #tpu.memory_space<vmem>>, vector<1x8x512xf32>
      %227 = vector.shape_cast %226 : vector<1x8x512xf32> to vector<8x512xf32>
      %c0_85 = arith.constant 0 : index
      %c0_86 = arith.constant 0 : index
      %228 = vector.load %arg5[%c0_85, %c0_86] : memref<128x512xf32, #tpu.memory_space<vmem>>, vector<128x512xf32>
      %cst_87 = arith.constant dense<0.000000e+00> : vector<8x512xf32>
      %229 = tpu.matmul %213, %228, %cst_87 {dimension_numbers = #tpu.dot_dimension_numbers<[1], [0], [0], [1], [0, 0, 1, 1], [], []>} : vector<8x128xf32>, vector<128x512xf32>, vector<8x512xf32> -> vector<8x512xf32>
      %230 = arith.addf %227, %229 : vector<8x512xf32>
      %231 = vector.extract_strided_slice %230 {offsets = [0, 0], sizes = [8, 128], strides = [1, 1]} : vector<8x512xf32> to vector<8x128xf32>
      %232 = arith.negf %231 : vector<8x128xf32>
      %233 = math.exp %232 : vector<8x128xf32>
      %cst_88 = arith.constant 1.000000e+00 : f32
      %234 = vector.broadcast %cst_88 : f32 to vector<8x128xf32>
      %235 = arith.addf %234, %233 : vector<8x128xf32>
      %236 = arith.divf %234, %235 : vector<8x128xf32>
      %237 = vector.extract_strided_slice %230 {offsets = [0, 128], sizes = [8, 128], strides = [1, 1]} : vector<8x512xf32> to vector<8x128xf32>
      %238 = arith.negf %237 : vector<8x128xf32>
      %239 = math.exp %238 : vector<8x128xf32>
      %cst_89 = arith.constant 1.000000e+00 : f32
      %240 = vector.broadcast %cst_89 : f32 to vector<8x128xf32>
      %241 = arith.addf %240, %239 : vector<8x128xf32>
      %242 = arith.divf %240, %241 : vector<8x128xf32>
      %243 = vector.extract_strided_slice %230 {offsets = [0, 256], sizes = [8, 128], strides = [1, 1]} : vector<8x512xf32> to vector<8x128xf32>
      %244 = math.tanh %243 : vector<8x128xf32>
      %245 = vector.extract_strided_slice %230 {offsets = [0, 384], sizes = [8, 128], strides = [1, 1]} : vector<8x512xf32> to vector<8x128xf32>
      %246 = arith.negf %245 : vector<8x128xf32>
      %247 = math.exp %246 : vector<8x128xf32>
      %cst_90 = arith.constant 1.000000e+00 : f32
      %248 = vector.broadcast %cst_90 : f32 to vector<8x128xf32>
      %249 = arith.addf %248, %247 : vector<8x128xf32>
      %250 = arith.divf %248, %249 : vector<8x128xf32>
      %251 = arith.mulf %242, %220 : vector<8x128xf32>
      %252 = arith.mulf %236, %244 : vector<8x128xf32>
      %253 = arith.addf %251, %252 : vector<8x128xf32>
      %254 = math.tanh %253 : vector<8x128xf32>
      %255 = arith.mulf %250, %254 : vector<8x128xf32>
      %c4_91 = arith.constant 4 : index
      %c0_92 = arith.constant 0 : index
      %c0_93 = arith.constant 0 : index
      %256 = vector.load %arg3[%c4_91, %c0_92, %c0_93] : memref<8x8x1xf32, #tpu.memory_space<vmem>>, vector<1x8x1xf32>
      %257 = vector.shape_cast %256 : vector<1x8x1xf32> to vector<8x1xf32>
      %258 = vector.broadcast %257 : vector<8x1xf32> to vector<8x128xf32>
      %259 = arith.mulf %258, %255 : vector<8x128xf32>
      %cst_94 = arith.constant 1.000000e+00 : f32
      %260 = vector.broadcast %cst_94 : f32 to vector<8x1xf32>
      %261 = arith.subf %260, %257 : vector<8x1xf32>
      %262 = vector.broadcast %261 : vector<8x1xf32> to vector<8x128xf32>
      %263 = arith.mulf %262, %213 : vector<8x128xf32>
      %264 = arith.addf %259, %263 : vector<8x128xf32>
      %265 = vector.broadcast %257 : vector<8x1xf32> to vector<8x128xf32>
      %266 = arith.mulf %265, %253 : vector<8x128xf32>
      %cst_95 = arith.constant 1.000000e+00 : f32
      %267 = vector.broadcast %cst_95 : f32 to vector<8x1xf32>
      %268 = arith.subf %267, %257 : vector<8x1xf32>
      %269 = vector.broadcast %268 : vector<8x1xf32> to vector<8x128xf32>
      %270 = arith.mulf %269, %220 : vector<8x128xf32>
      %271 = arith.addf %266, %270 : vector<8x128xf32>
      %272 = vector.broadcast %257 : vector<8x1xf32> to vector<8x128xf32>
      %273 = arith.mulf %272, %255 : vector<8x128xf32>
      %c4_96 = arith.constant 4 : index
      %c0_97 = arith.constant 0 : index
      %c0_98 = arith.constant 0 : index
      %274 = vector.load %arg7[%c4_96, %c0_97, %c0_98] : memref<8x8x128xf32, #tpu.memory_space<vmem>>, vector<1x8x128xf32>
      %275 = vector.shape_cast %274 : vector<1x8x128xf32> to vector<8x128xf32>
      %276 = vector.shape_cast %273 : vector<8x128xf32> to vector<1x8x128xf32>
      tpu.vector_store %arg7[%c4_96, %c0_97, %c0_98], %276 {strides = array<i32>} : memref<8x8x128xf32, #tpu.memory_space<vmem>>, vector<1x8x128xf32>,
      %c5 = arith.constant 5 : index
      %c0_99 = arith.constant 0 : index
      %c0_100 = arith.constant 0 : index
      %277 = vector.load %arg10[%c5, %c0_99, %c0_100] : memref<8x8x512xf32, #tpu.memory_space<vmem>>, vector<1x8x512xf32>
      %278 = vector.shape_cast %277 : vector<1x8x512xf32> to vector<8x512xf32>
      %c0_101 = arith.constant 0 : index
      %c0_102 = arith.constant 0 : index
      %279 = vector.load %arg5[%c0_101, %c0_102] : memref<128x512xf32, #tpu.memory_space<vmem>>, vector<128x512xf32>
      %cst_103 = arith.constant dense<0.000000e+00> : vector<8x512xf32>
      %280 = tpu.matmul %264, %279, %cst_103 {dimension_numbers = #tpu.dot_dimension_numbers<[1], [0], [0], [1], [0, 0, 1, 1], [], []>} : vector<8x128xf32>, vector<128x512xf32>, vector<8x512xf32> -> vector<8x512xf32>
      %281 = arith.addf %278, %280 : vector<8x512xf32>
      %282 = vector.extract_strided_slice %281 {offsets = [0, 0], sizes = [8, 128], strides = [1, 1]} : vector<8x512xf32> to vector<8x128xf32>
      %283 = arith.negf %282 : vector<8x128xf32>
      %284 = math.exp %283 : vector<8x128xf32>
      %cst_104 = arith.constant 1.000000e+00 : f32
      %285 = vector.broadcast %cst_104 : f32 to vector<8x128xf32>
      %286 = arith.addf %285, %284 : vector<8x128xf32>
      %287 = arith.divf %285, %286 : vector<8x128xf32>
      %288 = vector.extract_strided_slice %281 {offsets = [0, 128], sizes = [8, 128], strides = [1, 1]} : vector<8x512xf32> to vector<8x128xf32>
      %289 = arith.negf %288 : vector<8x128xf32>
      %290 = math.exp %289 : vector<8x128xf32>
      %cst_105 = arith.constant 1.000000e+00 : f32
      %291 = vector.broadcast %cst_105 : f32 to vector<8x128xf32>
      %292 = arith.addf %291, %290 : vector<8x128xf32>
      %293 = arith.divf %291, %292 : vector<8x128xf32>
      %294 = vector.extract_strided_slice %281 {offsets = [0, 256], sizes = [8, 128], strides = [1, 1]} : vector<8x512xf32> to vector<8x128xf32>
      %295 = math.tanh %294 : vector<8x128xf32>
      %296 = vector.extract_strided_slice %281 {offsets = [0, 384], sizes = [8, 128], strides = [1, 1]} : vector<8x512xf32> to vector<8x128xf32>
      %297 = arith.negf %296 : vector<8x128xf32>
      %298 = math.exp %297 : vector<8x128xf32>
      %cst_106 = arith.constant 1.000000e+00 : f32
      %299 = vector.broadcast %cst_106 : f32 to vector<8x128xf32>
      %300 = arith.addf %299, %298 : vector<8x128xf32>
      %301 = arith.divf %299, %300 : vector<8x128xf32>
      %302 = arith.mulf %293, %271 : vector<8x128xf32>
      %303 = arith.mulf %287, %295 : vector<8x128xf32>
      %304 = arith.addf %302, %303 : vector<8x128xf32>
      %305 = math.tanh %304 : vector<8x128xf32>
      %306 = arith.mulf %301, %305 : vector<8x128xf32>
      %c5_107 = arith.constant 5 : index
      %c0_108 = arith.constant 0 : index
      %c0_109 = arith.constant 0 : index
      %307 = vector.load %arg3[%c5_107, %c0_108, %c0_109] : memref<8x8x1xf32, #tpu.memory_space<vmem>>, vector<1x8x1xf32>
      %308 = vector.shape_cast %307 : vector<1x8x1xf32> to vector<8x1xf32>
      %309 = vector.broadcast %308 : vector<8x1xf32> to vector<8x128xf32>
      %310 = arith.mulf %309, %306 : vector<8x128xf32>
      %cst_110 = arith.constant 1.000000e+00 : f32
      %311 = vector.broadcast %cst_110 : f32 to vector<8x1xf32>
      %312 = arith.subf %311, %308 : vector<8x1xf32>
      %313 = vector.broadcast %312 : vector<8x1xf32> to vector<8x128xf32>
      %314 = arith.mulf %313, %264 : vector<8x128xf32>
      %315 = arith.addf %310, %314 : vector<8x128xf32>
      %316 = vector.broadcast %308 : vector<8x1xf32> to vector<8x128xf32>
      %317 = arith.mulf %316, %304 : vector<8x128xf32>
      %cst_111 = arith.constant 1.000000e+00 : f32
      %318 = vector.broadcast %cst_111 : f32 to vector<8x1xf32>
      %319 = arith.subf %318, %308 : vector<8x1xf32>
      %320 = vector.broadcast %319 : vector<8x1xf32> to vector<8x128xf32>
      %321 = arith.mulf %320, %271 : vector<8x128xf32>
      %322 = arith.addf %317, %321 : vector<8x128xf32>
      %323 = vector.broadcast %308 : vector<8x1xf32> to vector<8x128xf32>
      %324 = arith.mulf %323, %306 : vector<8x128xf32>
      %c5_112 = arith.constant 5 : index
      %c0_113 = arith.constant 0 : index
      %c0_114 = arith.constant 0 : index
      %325 = vector.load %arg7[%c5_112, %c0_113, %c0_114] : memref<8x8x128xf32, #tpu.memory_space<vmem>>, vector<1x8x128xf32>
      %326 = vector.shape_cast %325 : vector<1x8x128xf32> to vector<8x128xf32>
      %327 = vector.shape_cast %324 : vector<8x128xf32> to vector<1x8x128xf32>
      tpu.vector_store %arg7[%c5_112, %c0_113, %c0_114], %327 {strides = array<i32>} : memref<8x8x128xf32, #tpu.memory_space<vmem>>, vector<1x8x128xf32>,
      %c6 = arith.constant 6 : index
      %c0_115 = arith.constant 0 : index
      %c0_116 = arith.constant 0 : index
      %328 = vector.load %arg10[%c6, %c0_115, %c0_116] : memref<8x8x512xf32, #tpu.memory_space<vmem>>, vector<1x8x512xf32>
      %329 = vector.shape_cast %328 : vector<1x8x512xf32> to vector<8x512xf32>
      %c0_117 = arith.constant 0 : index
      %c0_118 = arith.constant 0 : index
      %330 = vector.load %arg5[%c0_117, %c0_118] : memref<128x512xf32, #tpu.memory_space<vmem>>, vector<128x512xf32>
      %cst_119 = arith.constant dense<0.000000e+00> : vector<8x512xf32>
      %331 = tpu.matmul %315, %330, %cst_119 {dimension_numbers = #tpu.dot_dimension_numbers<[1], [0], [0], [1], [0, 0, 1, 1], [], []>} : vector<8x128xf32>, vector<128x512xf32>, vector<8x512xf32> -> vector<8x512xf32>
      %332 = arith.addf %329, %331 : vector<8x512xf32>
      %333 = vector.extract_strided_slice %332 {offsets = [0, 0], sizes = [8, 128], strides = [1, 1]} : vector<8x512xf32> to vector<8x128xf32>
      %334 = arith.negf %333 : vector<8x128xf32>
      %335 = math.exp %334 : vector<8x128xf32>
      %cst_120 = arith.constant 1.000000e+00 : f32
      %336 = vector.broadcast %cst_120 : f32 to vector<8x128xf32>
      %337 = arith.addf %336, %335 : vector<8x128xf32>
      %338 = arith.divf %336, %337 : vector<8x128xf32>
      %339 = vector.extract_strided_slice %332 {offsets = [0, 128], sizes = [8, 128], strides = [1, 1]} : vector<8x512xf32> to vector<8x128xf32>
      %340 = arith.negf %339 : vector<8x128xf32>
      %341 = math.exp %340 : vector<8x128xf32>
      %cst_121 = arith.constant 1.000000e+00 : f32
      %342 = vector.broadcast %cst_121 : f32 to vector<8x128xf32>
      %343 = arith.addf %342, %341 : vector<8x128xf32>
      %344 = arith.divf %342, %343 : vector<8x128xf32>
      %345 = vector.extract_strided_slice %332 {offsets = [0, 256], sizes = [8, 128], strides = [1, 1]} : vector<8x512xf32> to vector<8x128xf32>
      %346 = math.tanh %345 : vector<8x128xf32>
      %347 = vector.extract_strided_slice %332 {offsets = [0, 384], sizes = [8, 128], strides = [1, 1]} : vector<8x512xf32> to vector<8x128xf32>
      %348 = arith.negf %347 : vector<8x128xf32>
      %349 = math.exp %348 : vector<8x128xf32>
      %cst_122 = arith.constant 1.000000e+00 : f32
      %350 = vector.broadcast %cst_122 : f32 to vector<8x128xf32>
      %351 = arith.addf %350, %349 : vector<8x128xf32>
      %352 = arith.divf %350, %351 : vector<8x128xf32>
      %353 = arith.mulf %344, %322 : vector<8x128xf32>
      %354 = arith.mulf %338, %346 : vector<8x128xf32>
      %355 = arith.addf %353, %354 : vector<8x128xf32>
      %356 = math.tanh %355 : vector<8x128xf32>
      %357 = arith.mulf %352, %356 : vector<8x128xf32>
      %c6_123 = arith.constant 6 : index
      %c0_124 = arith.constant 0 : index
      %c0_125 = arith.constant 0 : index
      %358 = vector.load %arg3[%c6_123, %c0_124, %c0_125] : memref<8x8x1xf32, #tpu.memory_space<vmem>>, vector<1x8x1xf32>
      %359 = vector.shape_cast %358 : vector<1x8x1xf32> to vector<8x1xf32>
      %360 = vector.broadcast %359 : vector<8x1xf32> to vector<8x128xf32>
      %361 = arith.mulf %360, %357 : vector<8x128xf32>
      %cst_126 = arith.constant 1.000000e+00 : f32
      %362 = vector.broadcast %cst_126 : f32 to vector<8x1xf32>
      %363 = arith.subf %362, %359 : vector<8x1xf32>
      %364 = vector.broadcast %363 : vector<8x1xf32> to vector<8x128xf32>
      %365 = arith.mulf %364, %315 : vector<8x128xf32>
      %366 = arith.addf %361, %365 : vector<8x128xf32>
      %367 = vector.broadcast %359 : vector<8x1xf32> to vector<8x128xf32>
      %368 = arith.mulf %367, %355 : vector<8x128xf32>
      %cst_127 = arith.constant 1.000000e+00 : f32
      %369 = vector.broadcast %cst_127 : f32 to vector<8x1xf32>
      %370 = arith.subf %369, %359 : vector<8x1xf32>
      %371 = vector.broadcast %370 : vector<8x1xf32> to vector<8x128xf32>
      %372 = arith.mulf %371, %322 : vector<8x128xf32>
      %373 = arith.addf %368, %372 : vector<8x128xf32>
      %374 = vector.broadcast %359 : vector<8x1xf32> to vector<8x128xf32>
      %375 = arith.mulf %374, %357 : vector<8x128xf32>
      %c6_128 = arith.constant 6 : index
      %c0_129 = arith.constant 0 : index
      %c0_130 = arith.constant 0 : index
      %376 = vector.load %arg7[%c6_128, %c0_129, %c0_130] : memref<8x8x128xf32, #tpu.memory_space<vmem>>, vector<1x8x128xf32>
      %377 = vector.shape_cast %376 : vector<1x8x128xf32> to vector<8x128xf32>
      %378 = vector.shape_cast %375 : vector<8x128xf32> to vector<1x8x128xf32>
      tpu.vector_store %arg7[%c6_128, %c0_129, %c0_130], %378 {strides = array<i32>} : memref<8x8x128xf32, #tpu.memory_space<vmem>>, vector<1x8x128xf32>,
      %c7 = arith.constant 7 : index
      %c0_131 = arith.constant 0 : index
      %c0_132 = arith.constant 0 : index
      %379 = vector.load %arg10[%c7, %c0_131, %c0_132] : memref<8x8x512xf32, #tpu.memory_space<vmem>>, vector<1x8x512xf32>
      %380 = vector.shape_cast %379 : vector<1x8x512xf32> to vector<8x512xf32>
      %c0_133 = arith.constant 0 : index
      %c0_134 = arith.constant 0 : index
      %381 = vector.load %arg5[%c0_133, %c0_134] : memref<128x512xf32, #tpu.memory_space<vmem>>, vector<128x512xf32>
      %cst_135 = arith.constant dense<0.000000e+00> : vector<8x512xf32>
      %382 = tpu.matmul %366, %381, %cst_135 {dimension_numbers = #tpu.dot_dimension_numbers<[1], [0], [0], [1], [0, 0, 1, 1], [], []>} : vector<8x128xf32>, vector<128x512xf32>, vector<8x512xf32> -> vector<8x512xf32>
      %383 = arith.addf %380, %382 : vector<8x512xf32>
      %384 = vector.extract_strided_slice %383 {offsets = [0, 0], sizes = [8, 128], strides = [1, 1]} : vector<8x512xf32> to vector<8x128xf32>
      %385 = arith.negf %384 : vector<8x128xf32>
      %386 = math.exp %385 : vector<8x128xf32>
      %cst_136 = arith.constant 1.000000e+00 : f32
      %387 = vector.broadcast %cst_136 : f32 to vector<8x128xf32>
      %388 = arith.addf %387, %386 : vector<8x128xf32>
      %389 = arith.divf %387, %388 : vector<8x128xf32>
      %390 = vector.extract_strided_slice %383 {offsets = [0, 128], sizes = [8, 128], strides = [1, 1]} : vector<8x512xf32> to vector<8x128xf32>
      %391 = arith.negf %390 : vector<8x128xf32>
      %392 = math.exp %391 : vector<8x128xf32>
      %cst_137 = arith.constant 1.000000e+00 : f32
      %393 = vector.broadcast %cst_137 : f32 to vector<8x128xf32>
      %394 = arith.addf %393, %392 : vector<8x128xf32>
      %395 = arith.divf %393, %394 : vector<8x128xf32>
      %396 = vector.extract_strided_slice %383 {offsets = [0, 256], sizes = [8, 128], strides = [1, 1]} : vector<8x512xf32> to vector<8x128xf32>
      %397 = math.tanh %396 : vector<8x128xf32>
      %398 = vector.extract_strided_slice %383 {offsets = [0, 384], sizes = [8, 128], strides = [1, 1]} : vector<8x512xf32> to vector<8x128xf32>
      %399 = arith.negf %398 : vector<8x128xf32>
      %400 = math.exp %399 : vector<8x128xf32>
      %cst_138 = arith.constant 1.000000e+00 : f32
      %401 = vector.broadcast %cst_138 : f32 to vector<8x128xf32>
      %402 = arith.addf %401, %400 : vector<8x128xf32>
      %403 = arith.divf %401, %402 : vector<8x128xf32>
      %404 = arith.mulf %395, %373 : vector<8x128xf32>
      %405 = arith.mulf %389, %397 : vector<8x128xf32>
      %406 = arith.addf %404, %405 : vector<8x128xf32>
      %407 = math.tanh %406 : vector<8x128xf32>
      %408 = arith.mulf %403, %407 : vector<8x128xf32>
      %c7_139 = arith.constant 7 : index
      %c0_140 = arith.constant 0 : index
      %c0_141 = arith.constant 0 : index
      %409 = vector.load %arg3[%c7_139, %c0_140, %c0_141] : memref<8x8x1xf32, #tpu.memory_space<vmem>>, vector<1x8x1xf32>
      %410 = vector.shape_cast %409 : vector<1x8x1xf32> to vector<8x1xf32>
      %411 = vector.broadcast %410 : vector<8x1xf32> to vector<8x128xf32>
      %412 = arith.mulf %411, %408 : vector<8x128xf32>
      %cst_142 = arith.constant 1.000000e+00 : f32
      %413 = vector.broadcast %cst_142 : f32 to vector<8x1xf32>
      %414 = arith.subf %413, %410 : vector<8x1xf32>
      %415 = vector.broadcast %414 : vector<8x1xf32> to vector<8x128xf32>
      %416 = arith.mulf %415, %366 : vector<8x128xf32>
      %417 = arith.addf %412, %416 : vector<8x128xf32>
      %418 = vector.broadcast %410 : vector<8x1xf32> to vector<8x128xf32>
      %419 = arith.mulf %418, %406 : vector<8x128xf32>
      %cst_143 = arith.constant 1.000000e+00 : f32
      %420 = vector.broadcast %cst_143 : f32 to vector<8x1xf32>
      %421 = arith.subf %420, %410 : vector<8x1xf32>
      %422 = vector.broadcast %421 : vector<8x1xf32> to vector<8x128xf32>
      %423 = arith.mulf %422, %373 : vector<8x128xf32>
      %424 = arith.addf %419, %423 : vector<8x128xf32>
      %425 = vector.broadcast %410 : vector<8x1xf32> to vector<8x128xf32>
      %426 = arith.mulf %425, %408 : vector<8x128xf32>
      %c7_144 = arith.constant 7 : index
      %c0_145 = arith.constant 0 : index
      %c0_146 = arith.constant 0 : index
      %427 = vector.load %arg7[%c7_144, %c0_145, %c0_146] : memref<8x8x128xf32, #tpu.memory_space<vmem>>, vector<1x8x128xf32>
      %428 = vector.shape_cast %427 : vector<1x8x128xf32> to vector<8x128xf32>
      %429 = vector.shape_cast %426 : vector<8x128xf32> to vector<1x8x128xf32>
      tpu.vector_store %arg7[%c7_144, %c0_145, %c0_146], %429 {strides = array<i32>} : memref<8x8x128xf32, #tpu.memory_space<vmem>>, vector<1x8x128xf32>,
      %c0_147 = arith.constant 0 : index
      %c0_148 = arith.constant 0 : index
      %430 = vector.load %arg8[%c0_147, %c0_148] : memref<8x128xf32, #tpu.memory_space<vmem>>, vector<8x128xf32>
      tpu.vector_store %arg8[%c0_147, %c0_148], %417 {strides = array<i32>} : memref<8x128xf32, #tpu.memory_space<vmem>>, vector<8x128xf32>,
      %c0_149 = arith.constant 0 : index
      %c0_150 = arith.constant 0 : index
      %431 = vector.load %arg9[%c0_149, %c0_150] : memref<8x128xf32, #tpu.memory_space<vmem>>, vector<8x128xf32>
      tpu.vector_store %arg9[%c0_149, %c0_150], %424 {strides = array<i32>} : memref<8x128xf32, #tpu.memory_space<vmem>>, vector<8x128xf32>,
    } else {
    }
    return
  }
  func.func @transform_0(%arg0: i32, %arg1: memref<1xi32, #tpu.memory_space<smem>>) -> (i32, i32, i32) {
    %c0_i32 = arith.constant 0 : i32
    %c0_i32_0 = arith.constant 0 : i32
    %c0_i32_1 = arith.constant 0 : i32
    return %arg0, %c0_i32, %c0_i32_0 : i32, i32, i32
  }
  func.func @transform_1(%arg0: i32, %arg1: memref<1xi32, #tpu.memory_space<smem>>) -> (i32, i32, i32) {
    %c0_i32 = arith.constant 0 : i32
    %c0_i32_0 = arith.constant 0 : i32
    %c0_i32_1 = arith.constant 0 : i32
    return %arg0, %c0_i32, %c0_i32_0 : i32, i32, i32
  }
  func.func @transform_2(%arg0: i32, %arg1: memref<1xi32, #tpu.memory_space<smem>>) -> (i32, i32) {
    %c0_i32 = arith.constant 0 : i32
    %c0_i32_0 = arith.constant 0 : i32
    %c0_i32_1 = arith.constant 0 : i32
    return %c0_i32, %c0_i32_0 : i32, i32
  }
  func.func @transform_3(%arg0: i32, %arg1: memref<1xi32, #tpu.memory_space<smem>>) -> (i32, i32) {
    %c0_i32 = arith.constant 0 : i32
    %c0_i32_0 = arith.constant 0 : i32
    %c0_i32_1 = arith.constant 0 : i32
    return %c0_i32, %c0_i32_0 : i32, i32
  }
  func.func @transform_4(%arg0: i32, %arg1: memref<1xi32, #tpu.memory_space<smem>>) -> (i32, i32) {
    %c0_i32 = arith.constant 0 : i32
    %c0_i32_0 = arith.constant 0 : i32
    %c0_i32_1 = arith.constant 0 : i32
    return %c0_i32, %c0_i32_0 : i32, i32
  }
  func.func @transform_5(%arg0: i32, %arg1: memref<1xi32, #tpu.memory_space<smem>>) -> (i32, i32, i32) {
    %c0_i32 = arith.constant 0 : i32
    %c0_i32_0 = arith.constant 0 : i32
    %c0_i32_1 = arith.constant 0 : i32
    return %arg0, %c0_i32, %c0_i32_0 : i32, i32, i32
  }
  func.func @transform_6(%arg0: i32, %arg1: memref<1xi32, #tpu.memory_space<smem>>) -> (i32, i32) {
    %c0_i32 = arith.constant 0 : i32
    %c0_i32_0 = arith.constant 0 : i32
    %c0_i32_1 = arith.constant 0 : i32
    return %c0_i32, %c0_i32_0 : i32, i32
  }
  func.func @transform_7(%arg0: i32, %arg1: memref<1xi32, #tpu.memory_space<smem>>) -> (i32, i32) {
    %c0_i32 = arith.constant 0 : i32
    %c0_i32_0 = arith.constant 0 : i32
    %c0_i32_1 = arith.constant 0 : i32
    return %c0_i32, %c0_i32_0 : i32, i32
  }
}

module attributes {stable_mosaic.version = 11 : i64} {
  func.func @_lstm_layer_kernel(%arg0: i32, %arg1: memref<1xi32, #tpu.memory_space<smem>>, %arg2: memref<8x8x128xf32, #tpu.memory_space<vmem>>, %arg3: memref<8x8x1xf32, #tpu.memory_space<vmem>>, %arg4: memref<128x512xf32, #tpu.memory_space<vmem>>, %arg5: memref<128x512xf32, #tpu.memory_space<vmem>>, %arg6: memref<1x512xf32, #tpu.memory_space<vmem>>, %arg7: memref<8x8x128xf32, #tpu.memory_space<vmem>>, %arg8: memref<8x128xf32, #tpu.memory_space<vmem>>, %arg9: memref<8x128xf32, #tpu.memory_space<vmem>>, %arg10: memref<8x8x512xf32, #tpu.memory_space<vmem>>) attributes {dimension_semantics = [#tpu.dimension_semantics<arbitrary>], iteration_bounds = array<i64: 1>, scalar_prefetch = 1 : i64, scratch_operands = 1 : i64, tpu.core_type = #tpu.core_type<tc>, window_params = [{transform_indices = @transform_0, window_bounds = array<i64: 8, 8, 128>}, {transform_indices = @transform_1, window_bounds = array<i64: 8, 8, 1>}, {pipeline_mode = #tpu.pipeline_mode<synchronous>, transform_indices = @transform_2, window_bounds = array<i64: 128, 512>}, {pipeline_mode = #tpu.pipeline_mode<synchronous>, transform_indices = @transform_3, window_bounds = array<i64: 128, 512>}, {pipeline_mode = #tpu.pipeline_mode<synchronous>, transform_indices = @transform_4, window_bounds = array<i64: 1, 512>}, {transform_indices = @transform_5, window_bounds = array<i64: 8, 8, 128>}, {pipeline_mode = #tpu.pipeline_mode<synchronous>, transform_indices = @transform_6, window_bounds = array<i64: 8, 128>}, {pipeline_mode = #tpu.pipeline_mode<synchronous>, transform_indices = @transform_7, window_bounds = array<i64: 8, 128>}]} {
    %c0_i32 = arith.constant 0 : i32
    %0 = arith.cmpi eq, %arg0, %c0_i32 : i32
    %1 = arith.extui %0 : i1 to i32
    %c0_i32_0 = arith.constant 0 : i32
    %2 = arith.cmpi ne, %1, %c0_i32_0 : i32
    scf.if %2 {
      %cst = arith.constant 0.000000e+00 : f32
      %11 = vector.broadcast %cst : f32 to vector<8x128xf32>
      %c0_4 = arith.constant 0 : index
      %c0_5 = arith.constant 0 : index
      %12 = vector.load %arg8[%c0_4, %c0_5] : memref<8x128xf32, #tpu.memory_space<vmem>>, vector<8x128xf32>
      tpu.vector_store %arg8[%c0_4, %c0_5], %11 {strides = array<i32>} : memref<8x128xf32, #tpu.memory_space<vmem>>, vector<8x128xf32>,
      %cst_6 = arith.constant 0.000000e+00 : f32
      %13 = vector.broadcast %cst_6 : f32 to vector<8x128xf32>
      %c0_7 = arith.constant 0 : index
      %c0_8 = arith.constant 0 : index
      %14 = vector.load %arg9[%c0_7, %c0_8] : memref<8x128xf32, #tpu.memory_space<vmem>>, vector<8x128xf32>
      tpu.vector_store %arg9[%c0_7, %c0_8], %13 {strides = array<i32>} : memref<8x128xf32, #tpu.memory_space<vmem>>, vector<8x128xf32>,
    } else {
    }
    %c0 = arith.constant 0 : index
    %3 = memref.load %arg1[%c0] : memref<1xi32, #tpu.memory_space<smem>>
    %4 = arith.cmpi sge, %arg0, %3 : i32
    %5 = arith.extui %4 : i1 to i32
    %c0_i32_1 = arith.constant 0 : i32
    %6 = arith.cmpi ne, %5, %c0_i32_1 : i32
    scf.if %6 {
      %cst = arith.constant 0.000000e+00 : f32
      %11 = vector.broadcast %cst : f32 to vector<8x8x128xf32>
      %c0_4 = arith.constant 0 : index
      %c0_5 = arith.constant 0 : index
      %c0_6 = arith.constant 0 : index
      %12 = vector.load %arg7[%c0_4, %c0_5, %c0_6] : memref<8x8x128xf32, #tpu.memory_space<vmem>>, vector<8x8x128xf32>
      tpu.vector_store %arg7[%c0_4, %c0_5, %c0_6], %11 {strides = array<i32>} : memref<8x8x128xf32, #tpu.memory_space<vmem>>, vector<8x8x128xf32>,
    } else {
    }
    %c0_2 = arith.constant 0 : index
    %7 = memref.load %arg1[%c0_2] : memref<1xi32, #tpu.memory_space<smem>>
    %8 = arith.cmpi slt, %arg0, %7 : i32
    %9 = arith.extui %8 : i1 to i32
    %c0_i32_3 = arith.constant 0 : i32
    %10 = arith.cmpi ne, %9, %c0_i32_3 : i32
    scf.if %10 {
      %c0_4 = arith.constant 0 : index
      %c0_5 = arith.constant 0 : index
      %c0_6 = arith.constant 0 : index
      %11 = vector.load %arg2[%c0_4, %c0_5, %c0_6] : memref<8x8x128xf32, #tpu.memory_space<vmem>>, vector<8x8x128xf32>
      %12 = vector.shape_cast %11 : vector<8x8x128xf32> to vector<64x128xf32>
      %c0_7 = arith.constant 0 : index
      %c0_8 = arith.constant 0 : index
      %13 = vector.load %arg4[%c0_7, %c0_8] : memref<128x512xf32, #tpu.memory_space<vmem>>, vector<128x512xf32>
      %cst = arith.constant dense<0.000000e+00> : vector<64x512xf32>
      %14 = tpu.matmul %12, %13, %cst {dimension_numbers = #tpu.dot_dimension_numbers<[1], [0], [0], [1], [0, 0, 1, 1], [], []>} : vector<64x128xf32>, vector<128x512xf32>, vector<64x512xf32> -> vector<64x512xf32>
      %c0_9 = arith.constant 0 : index
      %c0_10 = arith.constant 0 : index
      %15 = vector.load %arg6[%c0_9, %c0_10] : memref<1x512xf32, #tpu.memory_space<vmem>>, vector<1x512xf32>
      %16 = vector.broadcast %15 : vector<1x512xf32> to vector<64x512xf32>
      %17 = arith.addf %14, %16 : vector<64x512xf32>
      %18 = vector.shape_cast %17 : vector<64x512xf32> to vector<8x8x512xf32>
      %c0_11 = arith.constant 0 : index
      %c0_12 = arith.constant 0 : index
      %c0_13 = arith.constant 0 : index
      %19 = vector.load %arg10[%c0_11, %c0_12, %c0_13] : memref<8x8x512xf32, #tpu.memory_space<vmem>>, vector<8x8x512xf32>
      tpu.vector_store %arg10[%c0_11, %c0_12, %c0_13], %18 {strides = array<i32>} : memref<8x8x512xf32, #tpu.memory_space<vmem>>, vector<8x8x512xf32>,
      %c0_14 = arith.constant 0 : index
      %c0_15 = arith.constant 0 : index
      %20 = vector.load %arg8[%c0_14, %c0_15] : memref<8x128xf32, #tpu.memory_space<vmem>>, vector<8x128xf32>
      %c0_16 = arith.constant 0 : index
      %c0_17 = arith.constant 0 : index
      %21 = vector.load %arg9[%c0_16, %c0_17] : memref<8x128xf32, #tpu.memory_space<vmem>>, vector<8x128xf32>
      %c0_18 = arith.constant 0 : index
      %c0_19 = arith.constant 0 : index
      %c0_20 = arith.constant 0 : index
      %22 = vector.load %arg10[%c0_18, %c0_19, %c0_20] : memref<8x8x512xf32, #tpu.memory_space<vmem>>, vector<1x8x512xf32>
      %23 = vector.shape_cast %22 : vector<1x8x512xf32> to vector<8x512xf32>
      %c0_21 = arith.constant 0 : index
      %c0_22 = arith.constant 0 : index
      %24 = vector.load %arg5[%c0_21, %c0_22] : memref<128x512xf32, #tpu.memory_space<vmem>>, vector<128x512xf32>
      %cst_23 = arith.constant dense<0.000000e+00> : vector<8x512xf32>
      %25 = tpu.matmul %20, %24, %cst_23 {dimension_numbers = #tpu.dot_dimension_numbers<[1], [0], [0], [1], [0, 0, 1, 1], [], []>} : vector<8x128xf32>, vector<128x512xf32>, vector<8x512xf32> -> vector<8x512xf32>
      %26 = arith.addf %23, %25 : vector<8x512xf32>
      %27 = vector.extract_strided_slice %26 {offsets = [0, 0], sizes = [8, 128], strides = [1, 1]} : vector<8x512xf32> to vector<8x128xf32>
      %28 = arith.negf %27 : vector<8x128xf32>
      %29 = math.exp %28 : vector<8x128xf32>
      %cst_24 = arith.constant 1.000000e+00 : f32
      %30 = vector.broadcast %cst_24 : f32 to vector<8x128xf32>
      %31 = arith.addf %30, %29 : vector<8x128xf32>
      %32 = arith.divf %30, %31 : vector<8x128xf32>
      %33 = vector.extract_strided_slice %26 {offsets = [0, 128], sizes = [8, 128], strides = [1, 1]} : vector<8x512xf32> to vector<8x128xf32>
      %34 = arith.negf %33 : vector<8x128xf32>
      %35 = math.exp %34 : vector<8x128xf32>
      %cst_25 = arith.constant 1.000000e+00 : f32
      %36 = vector.broadcast %cst_25 : f32 to vector<8x128xf32>
      %37 = arith.addf %36, %35 : vector<8x128xf32>
      %38 = arith.divf %36, %37 : vector<8x128xf32>
      %39 = vector.extract_strided_slice %26 {offsets = [0, 256], sizes = [8, 128], strides = [1, 1]} : vector<8x512xf32> to vector<8x128xf32>
      %40 = math.tanh %39 : vector<8x128xf32>
      %41 = vector.extract_strided_slice %26 {offsets = [0, 384], sizes = [8, 128], strides = [1, 1]} : vector<8x512xf32> to vector<8x128xf32>
      %42 = arith.negf %41 : vector<8x128xf32>
      %43 = math.exp %42 : vector<8x128xf32>
      %cst_26 = arith.constant 1.000000e+00 : f32
      %44 = vector.broadcast %cst_26 : f32 to vector<8x128xf32>
      %45 = arith.addf %44, %43 : vector<8x128xf32>
      %46 = arith.divf %44, %45 : vector<8x128xf32>
      %47 = arith.mulf %38, %21 : vector<8x128xf32>
      %48 = arith.mulf %32, %40 : vector<8x128xf32>
      %49 = arith.addf %47, %48 : vector<8x128xf32>
      %50 = math.tanh %49 : vector<8x128xf32>
      %51 = arith.mulf %46, %50 : vector<8x128xf32>
      %c0_27 = arith.constant 0 : index
      %c0_28 = arith.constant 0 : index
      %c0_29 = arith.constant 0 : index
      %52 = vector.load %arg3[%c0_27, %c0_28, %c0_29] : memref<8x8x1xf32, #tpu.memory_space<vmem>>, vector<1x8x1xf32>
      %53 = vector.shape_cast %52 : vector<1x8x1xf32> to vector<8x1xf32>
      %54 = vector.broadcast %53 : vector<8x1xf32> to vector<8x128xf32>
      %55 = arith.mulf %54, %51 : vector<8x128xf32>
      %cst_30 = arith.constant 1.000000e+00 : f32
      %56 = vector.broadcast %cst_30 : f32 to vector<8x1xf32>
      %57 = arith.subf %56, %53 : vector<8x1xf32>
      %58 = vector.broadcast %57 : vector<8x1xf32> to vector<8x128xf32>
      %59 = arith.mulf %58, %20 : vector<8x128xf32>
      %60 = arith.addf %55, %59 : vector<8x128xf32>
      %61 = vector.broadcast %53 : vector<8x1xf32> to vector<8x128xf32>
      %62 = arith.mulf %61, %49 : vector<8x128xf32>
      %cst_31 = arith.constant 1.000000e+00 : f32
      %63 = vector.broadcast %cst_31 : f32 to vector<8x1xf32>
      %64 = arith.subf %63, %53 : vector<8x1xf32>
      %65 = vector.broadcast %64 : vector<8x1xf32> to vector<8x128xf32>
      %66 = arith.mulf %65, %21 : vector<8x128xf32>
      %67 = arith.addf %62, %66 : vector<8x128xf32>
      %68 = vector.broadcast %53 : vector<8x1xf32> to vector<8x128xf32>
      %69 = arith.mulf %68, %51 : vector<8x128xf32>
      %c0_32 = arith.constant 0 : index
      %c0_33 = arith.constant 0 : index
      %c0_34 = arith.constant 0 : index
      %70 = vector.load %arg7[%c0_32, %c0_33, %c0_34] : memref<8x8x128xf32, #tpu.memory_space<vmem>>, vector<1x8x128xf32>
      %71 = vector.shape_cast %70 : vector<1x8x128xf32> to vector<8x128xf32>
      %72 = vector.shape_cast %69 : vector<8x128xf32> to vector<1x8x128xf32>
      tpu.vector_store %arg7[%c0_32, %c0_33, %c0_34], %72 {strides = array<i32>} : memref<8x8x128xf32, #tpu.memory_space<vmem>>, vector<1x8x128xf32>,
      %c1 = arith.constant 1 : index
      %c0_35 = arith.constant 0 : index
      %c0_36 = arith.constant 0 : index
      %73 = vector.load %arg10[%c1, %c0_35, %c0_36] : memref<8x8x512xf32, #tpu.memory_space<vmem>>, vector<1x8x512xf32>
      %74 = vector.shape_cast %73 : vector<1x8x512xf32> to vector<8x512xf32>
      %c0_37 = arith.constant 0 : index
      %c0_38 = arith.constant 0 : index
      %75 = vector.load %arg5[%c0_37, %c0_38] : memref<128x512xf32, #tpu.memory_space<vmem>>, vector<128x512xf32>
      %cst_39 = arith.constant dense<0.000000e+00> : vector<8x512xf32>
      %76 = tpu.matmul %60, %75, %cst_39 {dimension_numbers = #tpu.dot_dimension_numbers<[1], [0], [0], [1], [0, 0, 1, 1], [], []>} : vector<8x128xf32>, vector<128x512xf32>, vector<8x512xf32> -> vector<8x512xf32>
      %77 = arith.addf %74, %76 : vector<8x512xf32>
      %78 = vector.extract_strided_slice %77 {offsets = [0, 0], sizes = [8, 128], strides = [1, 1]} : vector<8x512xf32> to vector<8x128xf32>
      %79 = arith.negf %78 : vector<8x128xf32>
      %80 = math.exp %79 : vector<8x128xf32>
      %cst_40 = arith.constant 1.000000e+00 : f32
      %81 = vector.broadcast %cst_40 : f32 to vector<8x128xf32>
      %82 = arith.addf %81, %80 : vector<8x128xf32>
      %83 = arith.divf %81, %82 : vector<8x128xf32>
      %84 = vector.extract_strided_slice %77 {offsets = [0, 128], sizes = [8, 128], strides = [1, 1]} : vector<8x512xf32> to vector<8x128xf32>
      %85 = arith.negf %84 : vector<8x128xf32>
      %86 = math.exp %85 : vector<8x128xf32>
      %cst_41 = arith.constant 1.000000e+00 : f32
      %87 = vector.broadcast %cst_41 : f32 to vector<8x128xf32>
      %88 = arith.addf %87, %86 : vector<8x128xf32>
      %89 = arith.divf %87, %88 : vector<8x128xf32>
      %90 = vector.extract_strided_slice %77 {offsets = [0, 256], sizes = [8, 128], strides = [1, 1]} : vector<8x512xf32> to vector<8x128xf32>
      %91 = math.tanh %90 : vector<8x128xf32>
      %92 = vector.extract_strided_slice %77 {offsets = [0, 384], sizes = [8, 128], strides = [1, 1]} : vector<8x512xf32> to vector<8x128xf32>
      %93 = arith.negf %92 : vector<8x128xf32>
      %94 = math.exp %93 : vector<8x128xf32>
      %cst_42 = arith.constant 1.000000e+00 : f32
      %95 = vector.broadcast %cst_42 : f32 to vector<8x128xf32>
      %96 = arith.addf %95, %94 : vector<8x128xf32>
      %97 = arith.divf %95, %96 : vector<8x128xf32>
      %98 = arith.mulf %89, %67 : vector<8x128xf32>
      %99 = arith.mulf %83, %91 : vector<8x128xf32>
      %100 = arith.addf %98, %99 : vector<8x128xf32>
      %101 = math.tanh %100 : vector<8x128xf32>
      %102 = arith.mulf %97, %101 : vector<8x128xf32>
      %c1_43 = arith.constant 1 : index
      %c0_44 = arith.constant 0 : index
      %c0_45 = arith.constant 0 : index
      %103 = vector.load %arg3[%c1_43, %c0_44, %c0_45] : memref<8x8x1xf32, #tpu.memory_space<vmem>>, vector<1x8x1xf32>
      %104 = vector.shape_cast %103 : vector<1x8x1xf32> to vector<8x1xf32>
      %105 = vector.broadcast %104 : vector<8x1xf32> to vector<8x128xf32>
      %106 = arith.mulf %105, %102 : vector<8x128xf32>
      %cst_46 = arith.constant 1.000000e+00 : f32
      %107 = vector.broadcast %cst_46 : f32 to vector<8x1xf32>
      %108 = arith.subf %107, %104 : vector<8x1xf32>
      %109 = vector.broadcast %108 : vector<8x1xf32> to vector<8x128xf32>
      %110 = arith.mulf %109, %60 : vector<8x128xf32>
      %111 = arith.addf %106, %110 : vector<8x128xf32>
      %112 = vector.broadcast %104 : vector<8x1xf32> to vector<8x128xf32>
      %113 = arith.mulf %112, %100 : vector<8x128xf32>
      %cst_47 = arith.constant 1.000000e+00 : f32
      %114 = vector.broadcast %cst_47 : f32 to vector<8x1xf32>
      %115 = arith.subf %114, %104 : vector<8x1xf32>
      %116 = vector.broadcast %115 : vector<8x1xf32> to vector<8x128xf32>
      %117 = arith.mulf %116, %67 : vector<8x128xf32>
      %118 = arith.addf %113, %117 : vector<8x128xf32>
      %119 = vector.broadcast %104 : vector<8x1xf32> to vector<8x128xf32>
      %120 = arith.mulf %119, %102 : vector<8x128xf32>
      %c1_48 = arith.constant 1 : index
      %c0_49 = arith.constant 0 : index
      %c0_50 = arith.constant 0 : index
      %121 = vector.load %arg7[%c1_48, %c0_49, %c0_50] : memref<8x8x128xf32, #tpu.memory_space<vmem>>, vector<1x8x128xf32>
      %122 = vector.shape_cast %121 : vector<1x8x128xf32> to vector<8x128xf32>
      %123 = vector.shape_cast %120 : vector<8x128xf32> to vector<1x8x128xf32>
      tpu.vector_store %arg7[%c1_48, %c0_49, %c0_50], %123 {strides = array<i32>} : memref<8x8x128xf32, #tpu.memory_space<vmem>>, vector<1x8x128xf32>,
      %c2 = arith.constant 2 : index
      %c0_51 = arith.constant 0 : index
      %c0_52 = arith.constant 0 : index
      %124 = vector.load %arg10[%c2, %c0_51, %c0_52] : memref<8x8x512xf32, #tpu.memory_space<vmem>>, vector<1x8x512xf32>
      %125 = vector.shape_cast %124 : vector<1x8x512xf32> to vector<8x512xf32>
      %c0_53 = arith.constant 0 : index
      %c0_54 = arith.constant 0 : index
      %126 = vector.load %arg5[%c0_53, %c0_54] : memref<128x512xf32, #tpu.memory_space<vmem>>, vector<128x512xf32>
      %cst_55 = arith.constant dense<0.000000e+00> : vector<8x512xf32>
      %127 = tpu.matmul %111, %126, %cst_55 {dimension_numbers = #tpu.dot_dimension_numbers<[1], [0], [0], [1], [0, 0, 1, 1], [], []>} : vector<8x128xf32>, vector<128x512xf32>, vector<8x512xf32> -> vector<8x512xf32>
      %128 = arith.addf %125, %127 : vector<8x512xf32>
      %129 = vector.extract_strided_slice %128 {offsets = [0, 0], sizes = [8, 128], strides = [1, 1]} : vector<8x512xf32> to vector<8x128xf32>
      %130 = arith.negf %129 : vector<8x128xf32>
      %131 = math.exp %130 : vector<8x128xf32>
      %cst_56 = arith.constant 1.000000e+00 : f32
      %132 = vector.broadcast %cst_56 : f32 to vector<8x128xf32>
      %133 = arith.addf %132, %131 : vector<8x128xf32>
      %134 = arith.divf %132, %133 : vector<8x128xf32>
      %135 = vector.extract_strided_slice %128 {offsets = [0, 128], sizes = [8, 128], strides = [1, 1]} : vector<8x512xf32> to vector<8x128xf32>
      %136 = arith.negf %135 : vector<8x128xf32>
      %137 = math.exp %136 : vector<8x128xf32>
      %cst_57 = arith.constant 1.000000e+00 : f32
      %138 = vector.broadcast %cst_57 : f32 to vector<8x128xf32>
      %139 = arith.addf %138, %137 : vector<8x128xf32>
      %140 = arith.divf %138, %139 : vector<8x128xf32>
      %141 = vector.extract_strided_slice %128 {offsets = [0, 256], sizes = [8, 128], strides = [1, 1]} : vector<8x512xf32> to vector<8x128xf32>
      %142 = math.tanh %141 : vector<8x128xf32>
      %143 = vector.extract_strided_slice %128 {offsets = [0, 384], sizes = [8, 128], strides = [1, 1]} : vector<8x512xf32> to vector<8x128xf32>
      %144 = arith.negf %143 : vector<8x128xf32>
      %145 = math.exp %144 : vector<8x128xf32>
      %cst_58 = arith.constant 1.000000e+00 : f32
      %146 = vector.broadcast %cst_58 : f32 to vector<8x128xf32>
      %147 = arith.addf %146, %145 : vector<8x128xf32>
      %148 = arith.divf %146, %147 : vector<8x128xf32>
      %149 = arith.mulf %140, %118 : vector<8x128xf32>
      %150 = arith.mulf %134, %142 : vector<8x128xf32>
      %151 = arith.addf %149, %150 : vector<8x128xf32>
      %152 = math.tanh %151 : vector<8x128xf32>
      %153 = arith.mulf %148, %152 : vector<8x128xf32>
      %c2_59 = arith.constant 2 : index
      %c0_60 = arith.constant 0 : index
      %c0_61 = arith.constant 0 : index
      %154 = vector.load %arg3[%c2_59, %c0_60, %c0_61] : memref<8x8x1xf32, #tpu.memory_space<vmem>>, vector<1x8x1xf32>
      %155 = vector.shape_cast %154 : vector<1x8x1xf32> to vector<8x1xf32>
      %156 = vector.broadcast %155 : vector<8x1xf32> to vector<8x128xf32>
      %157 = arith.mulf %156, %153 : vector<8x128xf32>
      %cst_62 = arith.constant 1.000000e+00 : f32
      %158 = vector.broadcast %cst_62 : f32 to vector<8x1xf32>
      %159 = arith.subf %158, %155 : vector<8x1xf32>
      %160 = vector.broadcast %159 : vector<8x1xf32> to vector<8x128xf32>
      %161 = arith.mulf %160, %111 : vector<8x128xf32>
      %162 = arith.addf %157, %161 : vector<8x128xf32>
      %163 = vector.broadcast %155 : vector<8x1xf32> to vector<8x128xf32>
      %164 = arith.mulf %163, %151 : vector<8x128xf32>
      %cst_63 = arith.constant 1.000000e+00 : f32
      %165 = vector.broadcast %cst_63 : f32 to vector<8x1xf32>
      %166 = arith.subf %165, %155 : vector<8x1xf32>
      %167 = vector.broadcast %166 : vector<8x1xf32> to vector<8x128xf32>
      %168 = arith.mulf %167, %118 : vector<8x128xf32>
      %169 = arith.addf %164, %168 : vector<8x128xf32>
      %170 = vector.broadcast %155 : vector<8x1xf32> to vector<8x128xf32>
      %171 = arith.mulf %170, %153 : vector<8x128xf32>
      %c2_64 = arith.constant 2 : index
      %c0_65 = arith.constant 0 : index
      %c0_66 = arith.constant 0 : index
      %172 = vector.load %arg7[%c2_64, %c0_65, %c0_66] : memref<8x8x128xf32, #tpu.memory_space<vmem>>, vector<1x8x128xf32>
      %173 = vector.shape_cast %172 : vector<1x8x128xf32> to vector<8x128xf32>
      %174 = vector.shape_cast %171 : vector<8x128xf32> to vector<1x8x128xf32>
      tpu.vector_store %arg7[%c2_64, %c0_65, %c0_66], %174 {strides = array<i32>} : memref<8x8x128xf32, #tpu.memory_space<vmem>>, vector<1x8x128xf32>,
      %c3 = arith.constant 3 : index
      %c0_67 = arith.constant 0 : index
      %c0_68 = arith.constant 0 : index
      %175 = vector.load %arg10[%c3, %c0_67, %c0_68] : memref<8x8x512xf32, #tpu.memory_space<vmem>>, vector<1x8x512xf32>
      %176 = vector.shape_cast %175 : vector<1x8x512xf32> to vector<8x512xf32>
      %c0_69 = arith.constant 0 : index
      %c0_70 = arith.constant 0 : index
      %177 = vector.load %arg5[%c0_69, %c0_70] : memref<128x512xf32, #tpu.memory_space<vmem>>, vector<128x512xf32>
      %cst_71 = arith.constant dense<0.000000e+00> : vector<8x512xf32>
      %178 = tpu.matmul %162, %177, %cst_71 {dimension_numbers = #tpu.dot_dimension_numbers<[1], [0], [0], [1], [0, 0, 1, 1], [], []>} : vector<8x128xf32>, vector<128x512xf32>, vector<8x512xf32> -> vector<8x512xf32>
      %179 = arith.addf %176, %178 : vector<8x512xf32>
      %180 = vector.extract_strided_slice %179 {offsets = [0, 0], sizes = [8, 128], strides = [1, 1]} : vector<8x512xf32> to vector<8x128xf32>
      %181 = arith.negf %180 : vector<8x128xf32>
      %182 = math.exp %181 : vector<8x128xf32>
      %cst_72 = arith.constant 1.000000e+00 : f32
      %183 = vector.broadcast %cst_72 : f32 to vector<8x128xf32>
      %184 = arith.addf %183, %182 : vector<8x128xf32>
      %185 = arith.divf %183, %184 : vector<8x128xf32>
      %186 = vector.extract_strided_slice %179 {offsets = [0, 128], sizes = [8, 128], strides = [1, 1]} : vector<8x512xf32> to vector<8x128xf32>
      %187 = arith.negf %186 : vector<8x128xf32>
      %188 = math.exp %187 : vector<8x128xf32>
      %cst_73 = arith.constant 1.000000e+00 : f32
      %189 = vector.broadcast %cst_73 : f32 to vector<8x128xf32>
      %190 = arith.addf %189, %188 : vector<8x128xf32>
      %191 = arith.divf %189, %190 : vector<8x128xf32>
      %192 = vector.extract_strided_slice %179 {offsets = [0, 256], sizes = [8, 128], strides = [1, 1]} : vector<8x512xf32> to vector<8x128xf32>
      %193 = math.tanh %192 : vector<8x128xf32>
      %194 = vector.extract_strided_slice %179 {offsets = [0, 384], sizes = [8, 128], strides = [1, 1]} : vector<8x512xf32> to vector<8x128xf32>
      %195 = arith.negf %194 : vector<8x128xf32>
      %196 = math.exp %195 : vector<8x128xf32>
      %cst_74 = arith.constant 1.000000e+00 : f32
      %197 = vector.broadcast %cst_74 : f32 to vector<8x128xf32>
      %198 = arith.addf %197, %196 : vector<8x128xf32>
      %199 = arith.divf %197, %198 : vector<8x128xf32>
      %200 = arith.mulf %191, %169 : vector<8x128xf32>
      %201 = arith.mulf %185, %193 : vector<8x128xf32>
      %202 = arith.addf %200, %201 : vector<8x128xf32>
      %203 = math.tanh %202 : vector<8x128xf32>
      %204 = arith.mulf %199, %203 : vector<8x128xf32>
      %c3_75 = arith.constant 3 : index
      %c0_76 = arith.constant 0 : index
      %c0_77 = arith.constant 0 : index
      %205 = vector.load %arg3[%c3_75, %c0_76, %c0_77] : memref<8x8x1xf32, #tpu.memory_space<vmem>>, vector<1x8x1xf32>
      %206 = vector.shape_cast %205 : vector<1x8x1xf32> to vector<8x1xf32>
      %207 = vector.broadcast %206 : vector<8x1xf32> to vector<8x128xf32>
      %208 = arith.mulf %207, %204 : vector<8x128xf32>
      %cst_78 = arith.constant 1.000000e+00 : f32
      %209 = vector.broadcast %cst_78 : f32 to vector<8x1xf32>
      %210 = arith.subf %209, %206 : vector<8x1xf32>
      %211 = vector.broadcast %210 : vector<8x1xf32> to vector<8x128xf32>
      %212 = arith.mulf %211, %162 : vector<8x128xf32>
      %213 = arith.addf %208, %212 : vector<8x128xf32>
      %214 = vector.broadcast %206 : vector<8x1xf32> to vector<8x128xf32>
      %215 = arith.mulf %214, %202 : vector<8x128xf32>
      %cst_79 = arith.constant 1.000000e+00 : f32
      %216 = vector.broadcast %cst_79 : f32 to vector<8x1xf32>
      %217 = arith.subf %216, %206 : vector<8x1xf32>
      %218 = vector.broadcast %217 : vector<8x1xf32> to vector<8x128xf32>
      %219 = arith.mulf %218, %169 : vector<8x128xf32>
      %220 = arith.addf %215, %219 : vector<8x128xf32>
      %221 = vector.broadcast %206 : vector<8x1xf32> to vector<8x128xf32>
      %222 = arith.mulf %221, %204 : vector<8x128xf32>
      %c3_80 = arith.constant 3 : index
      %c0_81 = arith.constant 0 : index
      %c0_82 = arith.constant 0 : index
      %223 = vector.load %arg7[%c3_80, %c0_81, %c0_82] : memref<8x8x128xf32, #tpu.memory_space<vmem>>, vector<1x8x128xf32>
      %224 = vector.shape_cast %223 : vector<1x8x128xf32> to vector<8x128xf32>
      %225 = vector.shape_cast %222 : vector<8x128xf32> to vector<1x8x128xf32>
      tpu.vector_store %arg7[%c3_80, %c0_81, %c0_82], %225 {strides = array<i32>} : memref<8x8x128xf32, #tpu.memory_space<vmem>>, vector<1x8x128xf32>,
      %c4 = arith.constant 4 : index
      %c0_83 = arith.constant 0 : index
      %c0_84 = arith.constant 0 : index
      %226 = vector.load %arg10[%c4, %c0_83, %c0_84] : memref<8x8x512xf32, #tpu.memory_space<vmem>>, vector<1x8x512xf32>
      %227 = vector.shape_cast %226 : vector<1x8x512xf32> to vector<8x512xf32>
      %c0_85 = arith.constant 0 : index
      %c0_86 = arith.constant 0 : index
      %228 = vector.load %arg5[%c0_85, %c0_86] : memref<128x512xf32, #tpu.memory_space<vmem>>, vector<128x512xf32>
      %cst_87 = arith.constant dense<0.000000e+00> : vector<8x512xf32>
      %229 = tpu.matmul %213, %228, %cst_87 {dimension_numbers = #tpu.dot_dimension_numbers<[1], [0], [0], [1], [0, 0, 1, 1], [], []>} : vector<8x128xf32>, vector<128x512xf32>, vector<8x512xf32> -> vector<8x512xf32>
      %230 = arith.addf %227, %229 : vector<8x512xf32>
      %231 = vector.extract_strided_slice %230 {offsets = [0, 0], sizes = [8, 128], strides = [1, 1]} : vector<8x512xf32> to vector<8x128xf32>
      %232 = arith.negf %231 : vector<8x128xf32>
      %233 = math.exp %232 : vector<8x128xf32>
      %cst_88 = arith.constant 1.000000e+00 : f32
      %234 = vector.broadcast %cst_88 : f32 to vector<8x128xf32>
      %235 = arith.addf %234, %233 : vector<8x128xf32>
      %236 = arith.divf %234, %235 : vector<8x128xf32>
      %237 = vector.extract_strided_slice %230 {offsets = [0, 128], sizes = [8, 128], strides = [1, 1]} : vector<8x512xf32> to vector<8x128xf32>
      %238 = arith.negf %237 : vector<8x128xf32>
      %239 = math.exp %238 : vector<8x128xf32>
      %cst_89 = arith.constant 1.000000e+00 : f32
      %240 = vector.broadcast %cst_89 : f32 to vector<8x128xf32>
      %241 = arith.addf %240, %239 : vector<8x128xf32>
      %242 = arith.divf %240, %241 : vector<8x128xf32>
      %243 = vector.extract_strided_slice %230 {offsets = [0, 256], sizes = [8, 128], strides = [1, 1]} : vector<8x512xf32> to vector<8x128xf32>
      %244 = math.tanh %243 : vector<8x128xf32>
      %245 = vector.extract_strided_slice %230 {offsets = [0, 384], sizes = [8, 128], strides = [1, 1]} : vector<8x512xf32> to vector<8x128xf32>
      %246 = arith.negf %245 : vector<8x128xf32>
      %247 = math.exp %246 : vector<8x128xf32>
      %cst_90 = arith.constant 1.000000e+00 : f32
      %248 = vector.broadcast %cst_90 : f32 to vector<8x128xf32>
      %249 = arith.addf %248, %247 : vector<8x128xf32>
      %250 = arith.divf %248, %249 : vector<8x128xf32>
      %251 = arith.mulf %242, %220 : vector<8x128xf32>
      %252 = arith.mulf %236, %244 : vector<8x128xf32>
      %253 = arith.addf %251, %252 : vector<8x128xf32>
      %254 = math.tanh %253 : vector<8x128xf32>
      %255 = arith.mulf %250, %254 : vector<8x128xf32>
      %c4_91 = arith.constant 4 : index
      %c0_92 = arith.constant 0 : index
      %c0_93 = arith.constant 0 : index
      %256 = vector.load %arg3[%c4_91, %c0_92, %c0_93] : memref<8x8x1xf32, #tpu.memory_space<vmem>>, vector<1x8x1xf32>
      %257 = vector.shape_cast %256 : vector<1x8x1xf32> to vector<8x1xf32>
      %258 = vector.broadcast %257 : vector<8x1xf32> to vector<8x128xf32>
      %259 = arith.mulf %258, %255 : vector<8x128xf32>
      %cst_94 = arith.constant 1.000000e+00 : f32
      %260 = vector.broadcast %cst_94 : f32 to vector<8x1xf32>
      %261 = arith.subf %260, %257 : vector<8x1xf32>
      %262 = vector.broadcast %261 : vector<8x1xf32> to vector<8x128xf32>
      %263 = arith.mulf %262, %213 : vector<8x128xf32>
      %264 = arith.addf %259, %263 : vector<8x128xf32>
      %265 = vector.broadcast %257 : vector<8x1xf32> to vector<8x128xf32>
      %266 = arith.mulf %265, %253 : vector<8x128xf32>
      %cst_95 = arith.constant 1.000000e+00 : f32
      %267 = vector.broadcast %cst_95 : f32 to vector<8x1xf32>
      %268 = arith.subf %267, %257 : vector<8x1xf32>
      %269 = vector.broadcast %268 : vector<8x1xf32> to vector<8x128xf32>
      %270 = arith.mulf %269, %220 : vector<8x128xf32>
      %271 = arith.addf %266, %270 : vector<8x128xf32>
      %272 = vector.broadcast %257 : vector<8x1xf32> to vector<8x128xf32>
      %273 = arith.mulf %272, %255 : vector<8x128xf32>
      %c4_96 = arith.constant 4 : index
      %c0_97 = arith.constant 0 : index
      %c0_98 = arith.constant 0 : index
      %274 = vector.load %arg7[%c4_96, %c0_97, %c0_98] : memref<8x8x128xf32, #tpu.memory_space<vmem>>, vector<1x8x128xf32>
      %275 = vector.shape_cast %274 : vector<1x8x128xf32> to vector<8x128xf32>
      %276 = vector.shape_cast %273 : vector<8x128xf32> to vector<1x8x128xf32>
      tpu.vector_store %arg7[%c4_96, %c0_97, %c0_98], %276 {strides = array<i32>} : memref<8x8x128xf32, #tpu.memory_space<vmem>>, vector<1x8x128xf32>,
      %c5 = arith.constant 5 : index
      %c0_99 = arith.constant 0 : index
      %c0_100 = arith.constant 0 : index
      %277 = vector.load %arg10[%c5, %c0_99, %c0_100] : memref<8x8x512xf32, #tpu.memory_space<vmem>>, vector<1x8x512xf32>
      %278 = vector.shape_cast %277 : vector<1x8x512xf32> to vector<8x512xf32>
      %c0_101 = arith.constant 0 : index
      %c0_102 = arith.constant 0 : index
      %279 = vector.load %arg5[%c0_101, %c0_102] : memref<128x512xf32, #tpu.memory_space<vmem>>, vector<128x512xf32>
      %cst_103 = arith.constant dense<0.000000e+00> : vector<8x512xf32>
      %280 = tpu.matmul %264, %279, %cst_103 {dimension_numbers = #tpu.dot_dimension_numbers<[1], [0], [0], [1], [0, 0, 1, 1], [], []>} : vector<8x128xf32>, vector<128x512xf32>, vector<8x512xf32> -> vector<8x512xf32>
      %281 = arith.addf %278, %280 : vector<8x512xf32>
      %282 = vector.extract_strided_slice %281 {offsets = [0, 0], sizes = [8, 128], strides = [1, 1]} : vector<8x512xf32> to vector<8x128xf32>
      %283 = arith.negf %282 : vector<8x128xf32>
      %284 = math.exp %283 : vector<8x128xf32>
      %cst_104 = arith.constant 1.000000e+00 : f32
      %285 = vector.broadcast %cst_104 : f32 to vector<8x128xf32>
      %286 = arith.addf %285, %284 : vector<8x128xf32>
      %287 = arith.divf %285, %286 : vector<8x128xf32>
      %288 = vector.extract_strided_slice %281 {offsets = [0, 128], sizes = [8, 128], strides = [1, 1]} : vector<8x512xf32> to vector<8x128xf32>
      %289 = arith.negf %288 : vector<8x128xf32>
      %290 = math.exp %289 : vector<8x128xf32>
      %cst_105 = arith.constant 1.000000e+00 : f32
      %291 = vector.broadcast %cst_105 : f32 to vector<8x128xf32>
      %292 = arith.addf %291, %290 : vector<8x128xf32>
      %293 = arith.divf %291, %292 : vector<8x128xf32>
      %294 = vector.extract_strided_slice %281 {offsets = [0, 256], sizes = [8, 128], strides = [1, 1]} : vector<8x512xf32> to vector<8x128xf32>
      %295 = math.tanh %294 : vector<8x128xf32>
      %296 = vector.extract_strided_slice %281 {offsets = [0, 384], sizes = [8, 128], strides = [1, 1]} : vector<8x512xf32> to vector<8x128xf32>
      %297 = arith.negf %296 : vector<8x128xf32>
      %298 = math.exp %297 : vector<8x128xf32>
      %cst_106 = arith.constant 1.000000e+00 : f32
      %299 = vector.broadcast %cst_106 : f32 to vector<8x128xf32>
      %300 = arith.addf %299, %298 : vector<8x128xf32>
      %301 = arith.divf %299, %300 : vector<8x128xf32>
      %302 = arith.mulf %293, %271 : vector<8x128xf32>
      %303 = arith.mulf %287, %295 : vector<8x128xf32>
      %304 = arith.addf %302, %303 : vector<8x128xf32>
      %305 = math.tanh %304 : vector<8x128xf32>
      %306 = arith.mulf %301, %305 : vector<8x128xf32>
      %c5_107 = arith.constant 5 : index
      %c0_108 = arith.constant 0 : index
      %c0_109 = arith.constant 0 : index
      %307 = vector.load %arg3[%c5_107, %c0_108, %c0_109] : memref<8x8x1xf32, #tpu.memory_space<vmem>>, vector<1x8x1xf32>
      %308 = vector.shape_cast %307 : vector<1x8x1xf32> to vector<8x1xf32>
      %309 = vector.broadcast %308 : vector<8x1xf32> to vector<8x128xf32>
      %310 = arith.mulf %309, %306 : vector<8x128xf32>
      %cst_110 = arith.constant 1.000000e+00 : f32
      %311 = vector.broadcast %cst_110 : f32 to vector<8x1xf32>
      %312 = arith.subf %311, %308 : vector<8x1xf32>
      %313 = vector.broadcast %312 : vector<8x1xf32> to vector<8x128xf32>
      %314 = arith.mulf %313, %264 : vector<8x128xf32>
      %315 = arith.addf %310, %314 : vector<8x128xf32>
      %316 = vector.broadcast %308 : vector<8x1xf32> to vector<8x128xf32>
      %317 = arith.mulf %316, %304 : vector<8x128xf32>
      %cst_111 = arith.constant 1.000000e+00 : f32
      %318 = vector.broadcast %cst_111 : f32 to vector<8x1xf32>
      %319 = arith.subf %318, %308 : vector<8x1xf32>
      %320 = vector.broadcast %319 : vector<8x1xf32> to vector<8x128xf32>
      %321 = arith.mulf %320, %271 : vector<8x128xf32>
      %322 = arith.addf %317, %321 : vector<8x128xf32>
      %323 = vector.broadcast %308 : vector<8x1xf32> to vector<8x128xf32>
      %324 = arith.mulf %323, %306 : vector<8x128xf32>
      %c5_112 = arith.constant 5 : index
      %c0_113 = arith.constant 0 : index
      %c0_114 = arith.constant 0 : index
      %325 = vector.load %arg7[%c5_112, %c0_113, %c0_114] : memref<8x8x128xf32, #tpu.memory_space<vmem>>, vector<1x8x128xf32>
      %326 = vector.shape_cast %325 : vector<1x8x128xf32> to vector<8x128xf32>
      %327 = vector.shape_cast %324 : vector<8x128xf32> to vector<1x8x128xf32>
      tpu.vector_store %arg7[%c5_112, %c0_113, %c0_114], %327 {strides = array<i32>} : memref<8x8x128xf32, #tpu.memory_space<vmem>>, vector<1x8x128xf32>,
      %c6 = arith.constant 6 : index
      %c0_115 = arith.constant 0 : index
      %c0_116 = arith.constant 0 : index
      %328 = vector.load %arg10[%c6, %c0_115, %c0_116] : memref<8x8x512xf32, #tpu.memory_space<vmem>>, vector<1x8x512xf32>
      %329 = vector.shape_cast %328 : vector<1x8x512xf32> to vector<8x512xf32>
      %c0_117 = arith.constant 0 : index
      %c0_118 = arith.constant 0 : index
      %330 = vector.load %arg5[%c0_117, %c0_118] : memref<128x512xf32, #tpu.memory_space<vmem>>, vector<128x512xf32>
      %cst_119 = arith.constant dense<0.000000e+00> : vector<8x512xf32>
      %331 = tpu.matmul %315, %330, %cst_119 {dimension_numbers = #tpu.dot_dimension_numbers<[1], [0], [0], [1], [0, 0, 1, 1], [], []>} : vector<8x128xf32>, vector<128x512xf32>, vector<8x512xf32> -> vector<8x512xf32>
      %332 = arith.addf %329, %331 : vector<8x512xf32>
      %333 = vector.extract_strided_slice %332 {offsets = [0, 0], sizes = [8, 128], strides = [1, 1]} : vector<8x512xf32> to vector<8x128xf32>
      %334 = arith.negf %333 : vector<8x128xf32>
      %335 = math.exp %334 : vector<8x128xf32>
      %cst_120 = arith.constant 1.000000e+00 : f32
      %336 = vector.broadcast %cst_120 : f32 to vector<8x128xf32>
      %337 = arith.addf %336, %335 : vector<8x128xf32>
      %338 = arith.divf %336, %337 : vector<8x128xf32>
      %339 = vector.extract_strided_slice %332 {offsets = [0, 128], sizes = [8, 128], strides = [1, 1]} : vector<8x512xf32> to vector<8x128xf32>
      %340 = arith.negf %339 : vector<8x128xf32>
      %341 = math.exp %340 : vector<8x128xf32>
      %cst_121 = arith.constant 1.000000e+00 : f32
      %342 = vector.broadcast %cst_121 : f32 to vector<8x128xf32>
      %343 = arith.addf %342, %341 : vector<8x128xf32>
      %344 = arith.divf %342, %343 : vector<8x128xf32>
      %345 = vector.extract_strided_slice %332 {offsets = [0, 256], sizes = [8, 128], strides = [1, 1]} : vector<8x512xf32> to vector<8x128xf32>
      %346 = math.tanh %345 : vector<8x128xf32>
      %347 = vector.extract_strided_slice %332 {offsets = [0, 384], sizes = [8, 128], strides = [1, 1]} : vector<8x512xf32> to vector<8x128xf32>
      %348 = arith.negf %347 : vector<8x128xf32>
      %349 = math.exp %348 : vector<8x128xf32>
      %cst_122 = arith.constant 1.000000e+00 : f32
      %350 = vector.broadcast %cst_122 : f32 to vector<8x128xf32>
      %351 = arith.addf %350, %349 : vector<8x128xf32>
      %352 = arith.divf %350, %351 : vector<8x128xf32>
      %353 = arith.mulf %344, %322 : vector<8x128xf32>
      %354 = arith.mulf %338, %346 : vector<8x128xf32>
      %355 = arith.addf %353, %354 : vector<8x128xf32>
      %356 = math.tanh %355 : vector<8x128xf32>
      %357 = arith.mulf %352, %356 : vector<8x128xf32>
      %c6_123 = arith.constant 6 : index
      %c0_124 = arith.constant 0 : index
      %c0_125 = arith.constant 0 : index
      %358 = vector.load %arg3[%c6_123, %c0_124, %c0_125] : memref<8x8x1xf32, #tpu.memory_space<vmem>>, vector<1x8x1xf32>
      %359 = vector.shape_cast %358 : vector<1x8x1xf32> to vector<8x1xf32>
      %360 = vector.broadcast %359 : vector<8x1xf32> to vector<8x128xf32>
      %361 = arith.mulf %360, %357 : vector<8x128xf32>
      %cst_126 = arith.constant 1.000000e+00 : f32
      %362 = vector.broadcast %cst_126 : f32 to vector<8x1xf32>
      %363 = arith.subf %362, %359 : vector<8x1xf32>
      %364 = vector.broadcast %363 : vector<8x1xf32> to vector<8x128xf32>
      %365 = arith.mulf %364, %315 : vector<8x128xf32>
      %366 = arith.addf %361, %365 : vector<8x128xf32>
      %367 = vector.broadcast %359 : vector<8x1xf32> to vector<8x128xf32>
      %368 = arith.mulf %367, %355 : vector<8x128xf32>
      %cst_127 = arith.constant 1.000000e+00 : f32
      %369 = vector.broadcast %cst_127 : f32 to vector<8x1xf32>
      %370 = arith.subf %369, %359 : vector<8x1xf32>
      %371 = vector.broadcast %370 : vector<8x1xf32> to vector<8x128xf32>
      %372 = arith.mulf %371, %322 : vector<8x128xf32>
      %373 = arith.addf %368, %372 : vector<8x128xf32>
      %374 = vector.broadcast %359 : vector<8x1xf32> to vector<8x128xf32>
      %375 = arith.mulf %374, %357 : vector<8x128xf32>
      %c6_128 = arith.constant 6 : index
      %c0_129 = arith.constant 0 : index
      %c0_130 = arith.constant 0 : index
      %376 = vector.load %arg7[%c6_128, %c0_129, %c0_130] : memref<8x8x128xf32, #tpu.memory_space<vmem>>, vector<1x8x128xf32>
      %377 = vector.shape_cast %376 : vector<1x8x128xf32> to vector<8x128xf32>
      %378 = vector.shape_cast %375 : vector<8x128xf32> to vector<1x8x128xf32>
      tpu.vector_store %arg7[%c6_128, %c0_129, %c0_130], %378 {strides = array<i32>} : memref<8x8x128xf32, #tpu.memory_space<vmem>>, vector<1x8x128xf32>,
      %c7 = arith.constant 7 : index
      %c0_131 = arith.constant 0 : index
      %c0_132 = arith.constant 0 : index
      %379 = vector.load %arg10[%c7, %c0_131, %c0_132] : memref<8x8x512xf32, #tpu.memory_space<vmem>>, vector<1x8x512xf32>
      %380 = vector.shape_cast %379 : vector<1x8x512xf32> to vector<8x512xf32>
      %c0_133 = arith.constant 0 : index
      %c0_134 = arith.constant 0 : index
      %381 = vector.load %arg5[%c0_133, %c0_134] : memref<128x512xf32, #tpu.memory_space<vmem>>, vector<128x512xf32>
      %cst_135 = arith.constant dense<0.000000e+00> : vector<8x512xf32>
      %382 = tpu.matmul %366, %381, %cst_135 {dimension_numbers = #tpu.dot_dimension_numbers<[1], [0], [0], [1], [0, 0, 1, 1], [], []>} : vector<8x128xf32>, vector<128x512xf32>, vector<8x512xf32> -> vector<8x512xf32>
      %383 = arith.addf %380, %382 : vector<8x512xf32>
      %384 = vector.extract_strided_slice %383 {offsets = [0, 0], sizes = [8, 128], strides = [1, 1]} : vector<8x512xf32> to vector<8x128xf32>
      %385 = arith.negf %384 : vector<8x128xf32>
      %386 = math.exp %385 : vector<8x128xf32>
      %cst_136 = arith.constant 1.000000e+00 : f32
      %387 = vector.broadcast %cst_136 : f32 to vector<8x128xf32>
      %388 = arith.addf %387, %386 : vector<8x128xf32>
      %389 = arith.divf %387, %388 : vector<8x128xf32>
      %390 = vector.extract_strided_slice %383 {offsets = [0, 128], sizes = [8, 128], strides = [1, 1]} : vector<8x512xf32> to vector<8x128xf32>
      %391 = arith.negf %390 : vector<8x128xf32>
      %392 = math.exp %391 : vector<8x128xf32>
      %cst_137 = arith.constant 1.000000e+00 : f32
      %393 = vector.broadcast %cst_137 : f32 to vector<8x128xf32>
      %394 = arith.addf %393, %392 : vector<8x128xf32>
      %395 = arith.divf %393, %394 : vector<8x128xf32>
      %396 = vector.extract_strided_slice %383 {offsets = [0, 256], sizes = [8, 128], strides = [1, 1]} : vector<8x512xf32> to vector<8x128xf32>
      %397 = math.tanh %396 : vector<8x128xf32>
      %398 = vector.extract_strided_slice %383 {offsets = [0, 384], sizes = [8, 128], strides = [1, 1]} : vector<8x512xf32> to vector<8x128xf32>
      %399 = arith.negf %398 : vector<8x128xf32>
      %400 = math.exp %399 : vector<8x128xf32>
      %cst_138 = arith.constant 1.000000e+00 : f32
      %401 = vector.broadcast %cst_138 : f32 to vector<8x128xf32>
      %402 = arith.addf %401, %400 : vector<8x128xf32>
      %403 = arith.divf %401, %402 : vector<8x128xf32>
      %404 = arith.mulf %395, %373 : vector<8x128xf32>
      %405 = arith.mulf %389, %397 : vector<8x128xf32>
      %406 = arith.addf %404, %405 : vector<8x128xf32>
      %407 = math.tanh %406 : vector<8x128xf32>
      %408 = arith.mulf %403, %407 : vector<8x128xf32>
      %c7_139 = arith.constant 7 : index
      %c0_140 = arith.constant 0 : index
      %c0_141 = arith.constant 0 : index
      %409 = vector.load %arg3[%c7_139, %c0_140, %c0_141] : memref<8x8x1xf32, #tpu.memory_space<vmem>>, vector<1x8x1xf32>
      %410 = vector.shape_cast %409 : vector<1x8x1xf32> to vector<8x1xf32>
      %411 = vector.broadcast %410 : vector<8x1xf32> to vector<8x128xf32>
      %412 = arith.mulf %411, %408 : vector<8x128xf32>
      %cst_142 = arith.constant 1.000000e+00 : f32
      %413 = vector.broadcast %cst_142 : f32 to vector<8x1xf32>
      %414 = arith.subf %413, %410 : vector<8x1xf32>
      %415 = vector.broadcast %414 : vector<8x1xf32> to vector<8x128xf32>
      %416 = arith.mulf %415, %366 : vector<8x128xf32>
      %417 = arith.addf %412, %416 : vector<8x128xf32>
      %418 = vector.broadcast %410 : vector<8x1xf32> to vector<8x128xf32>
      %419 = arith.mulf %418, %406 : vector<8x128xf32>
      %cst_143 = arith.constant 1.000000e+00 : f32
      %420 = vector.broadcast %cst_143 : f32 to vector<8x1xf32>
      %421 = arith.subf %420, %410 : vector<8x1xf32>
      %422 = vector.broadcast %421 : vector<8x1xf32> to vector<8x128xf32>
      %423 = arith.mulf %422, %373 : vector<8x128xf32>
      %424 = arith.addf %419, %423 : vector<8x128xf32>
      %425 = vector.broadcast %410 : vector<8x1xf32> to vector<8x128xf32>
      %426 = arith.mulf %425, %408 : vector<8x128xf32>
      %c7_144 = arith.constant 7 : index
      %c0_145 = arith.constant 0 : index
      %c0_146 = arith.constant 0 : index
      %427 = vector.load %arg7[%c7_144, %c0_145, %c0_146] : memref<8x8x128xf32, #tpu.memory_space<vmem>>, vector<1x8x128xf32>
      %428 = vector.shape_cast %427 : vector<1x8x128xf32> to vector<8x128xf32>
      %429 = vector.shape_cast %426 : vector<8x128xf32> to vector<1x8x128xf32>
      tpu.vector_store %arg7[%c7_144, %c0_145, %c0_146], %429 {strides = array<i32>} : memref<8x8x128xf32, #tpu.memory_space<vmem>>, vector<1x8x128xf32>,
      %c0_147 = arith.constant 0 : index
      %c0_148 = arith.constant 0 : index
      %430 = vector.load %arg8[%c0_147, %c0_148] : memref<8x128xf32, #tpu.memory_space<vmem>>, vector<8x128xf32>
      tpu.vector_store %arg8[%c0_147, %c0_148], %417 {strides = array<i32>} : memref<8x128xf32, #tpu.memory_space<vmem>>, vector<8x128xf32>,
      %c0_149 = arith.constant 0 : index
      %c0_150 = arith.constant 0 : index
      %431 = vector.load %arg9[%c0_149, %c0_150] : memref<8x128xf32, #tpu.memory_space<vmem>>, vector<8x128xf32>
      tpu.vector_store %arg9[%c0_149, %c0_150], %424 {strides = array<i32>} : memref<8x128xf32, #tpu.memory_space<vmem>>, vector<8x128xf32>,
    } else {
    }
    return
  }
  func.func @transform_0(%arg0: i32, %arg1: memref<1xi32, #tpu.memory_space<smem>>) -> (i32, i32, i32) {
    %c0_i32 = arith.constant 0 : i32
    %c0_i32_0 = arith.constant 0 : i32
    %c0_i32_1 = arith.constant 0 : i32
    return %arg0, %c0_i32, %c0_i32_0 : i32, i32, i32
  }
  func.func @transform_1(%arg0: i32, %arg1: memref<1xi32, #tpu.memory_space<smem>>) -> (i32, i32, i32) {
    %c0_i32 = arith.constant 0 : i32
    %c0_i32_0 = arith.constant 0 : i32
    %c0_i32_1 = arith.constant 0 : i32
    return %arg0, %c0_i32, %c0_i32_0 : i32, i32, i32
  }
  func.func @transform_2(%arg0: i32, %arg1: memref<1xi32, #tpu.memory_space<smem>>) -> (i32, i32) {
    %c0_i32 = arith.constant 0 : i32
    %c0_i32_0 = arith.constant 0 : i32
    %c0_i32_1 = arith.constant 0 : i32
    return %c0_i32, %c0_i32_0 : i32, i32
  }
  func.func @transform_3(%arg0: i32, %arg1: memref<1xi32, #tpu.memory_space<smem>>) -> (i32, i32) {
    %c0_i32 = arith.constant 0 : i32
    %c0_i32_0 = arith.constant 0 : i32
    %c0_i32_1 = arith.constant 0 : i32
    return %c0_i32, %c0_i32_0 : i32, i32
  }
  func.func @transform_4(%arg0: i32, %arg1: memref<1xi32, #tpu.memory_space<smem>>) -> (i32, i32) {
    %c0_i32 = arith.constant 0 : i32
    %c0_i32_0 = arith.constant 0 : i32
    %c0_i32_1 = arith.constant 0 : i32
    return %c0_i32, %c0_i32_0 : i32, i32
  }
  func.func @transform_5(%arg0: i32, %arg1: memref<1xi32, #tpu.memory_space<smem>>) -> (i32, i32, i32) {
    %c0_i32 = arith.constant 0 : i32
    %c0_i32_0 = arith.constant 0 : i32
    %c0_i32_1 = arith.constant 0 : i32
    return %arg0, %c0_i32, %c0_i32_0 : i32, i32, i32
  }
  func.func @transform_6(%arg0: i32, %arg1: memref<1xi32, #tpu.memory_space<smem>>) -> (i32, i32) {
    %c0_i32 = arith.constant 0 : i32
    %c0_i32_0 = arith.constant 0 : i32
    %c0_i32_1 = arith.constant 0 : i32
    return %c0_i32, %c0_i32_0 : i32, i32
  }
  func.func @transform_7(%arg0: i32, %arg1: memref<1xi32, #tpu.memory_space<smem>>) -> (i32, i32) {
    %c0_i32 = arith.constant 0 : i32
    %c0_i32_0 = arith.constant 0 : i32
    %c0_i32_1 = arith.constant 0 : i32
    return %c0_i32, %c0_i32_0 : i32, i32
  }
}

</mosaic_0001>

<bundles_post_ra>
// kernel: encoder_forward.3
= control target key start
LH: loop header
LB: loop body
LE: loop exit
PB: predicated region body
PF: predicated region fallthrough
CT: control target
= control target key end

     0   :  { %v3310_v0 = vmov 0.0   ;;  %s4781_s0 = inlined_call_operand.<no memory space> [shape: s32[1], index: 0, kind: input, shape index: {}]   ;;  %s4782_s1 = inlined_call_operand.vmem [shape: f32[8,8,128], index: 1, kind: input, shape index: {}]   ;;  %s4783_s2 = inlined_call_operand.vmem [shape: f32[8,8,1], index: 2, kind: input, shape index: {}]   ;;  %s4784_s3 = inlined_call_operand.vmem [shape: f32[128,512], index: 3, kind: input, shape index: {}]   ;;  %s4785_s4 = inlined_call_operand.vmem [shape: f32[128,512], index: 4, kind: input, shape index: {}]   ;;  %s4786_s5 = inlined_call_operand.vmem [shape: f32[1,512], index: 5, kind: input, shape index: {}]   ;;  %s4787_s6 = inlined_call_operand.vmem [shape: f32[8,8,128], index: 6, kind: output, shape index: {0}]   ;;  %s4788_s7 = inlined_call_operand.vmem [shape: f32[8,128], index: 7, kind: output, shape index: {1}]   ;;  %s4789_s8 = inlined_call_operand.vmem [shape: f32[8,128], index: 8, kind: output, shape index: {2}]  }
   0x1   :  { %14 = sst [smem:[#allocation4]] %s4781_s0  ;;  %29 = vst [vmem:[%s4788_s7] sm:$0xff] %v3310_v0  ;;  %30 = vst [vmem:[%s4789_s8] sm:$0xff] %v3310_v0  ;;  %p2495_p0 = scmp.gt.s32.totalorder %s4781_s0, 0 }
   0x2   :  { %v3311_v1 = vmov (!%p2495_p0), 0.0  }
   0x3   :  { %35 = sbr.rel (%p2495_p0) target bundleno = 10 (0xa), region = 29  ;;  %36 = vst [vmem:[%s4787_s6] sm:$0xff] (!%p2495_p0), %v3311_v1  ;;  %37 = vst [vmem:[%s4787_s6 + $0x8] sm:$0xff] (!%p2495_p0), %v3311_v1 }
   0x4   :  { %38 = vst [vmem:[%s4787_s6 + $0x10] sm:$0xff] (!%p2495_p0), %v3311_v1  ;;  %39 = vst [vmem:[%s4787_s6 + $0x18] sm:$0xff] (!%p2495_p0), %v3311_v1 }
   0x5   :  { %40 = vst [vmem:[%s4787_s6 + $0x20] sm:$0xff] (!%p2495_p0), %v3311_v1  ;;  %41 = vst [vmem:[%s4787_s6 + $0x28] sm:$0xff] (!%p2495_p0), %v3311_v1 }
   0x6   :  { %42 = vst [vmem:[%s4787_s6 + $0x30] sm:$0xff] (!%p2495_p0), %v3311_v1  ;;  %43 = vst [vmem:[%s4787_s6 + $0x38] sm:$0xff] (!%p2495_p0), %v3311_v1 }
   0xa PF:  { %s44_s28 = sld [smem:[#allocation4]] }
  0x10   :  { %p2497_p1 = scmp.le.s32.totalorder %s44_s28, 0 }
  0x11   :  { %v58_v2 = vld [vmem:[%s4784_s3 + $0x8] sm:$0xff] (!%p2497_p1)  ;;  %v60_v4 = vld [vmem:[%s4784_s3 + $0x18] sm:$0xff] (!%p2497_p1)  ;;  %v57_v7 = vld [vmem:[%s4784_s3] sm:$0xff] (!%p2497_p1)  ;;  %v3312_v9 = vmov (!%p2497_p1), 0.0   ;;  %v3313_v15 = vmov (!%p2497_p1), 0  }
  0x12   :  { %48 = sbr.rel (%p2497_p1) target bundleno = 2182 (0x886), region = 33  ;;  %v62_v3 = vld [vmem:[%s4784_s3 + $0x28] sm:$0xff] (!%p2497_p1)  ;;  %v64_v6 = vld [vmem:[%s4784_s3 + $0x38] sm:$0xff] (!%p2497_p1)  ;;  %v61_v8 = vld [vmem:[%s4784_s3 + $0x20] sm:$0xff] (!%p2497_p1)  ;;  %207 = vmatprep.mubr.f32.mxu0 (!%p2497_p1), %v3312_v9  ;;  %320 = vmatprep.mubr.f32.mxu1 (!%p2497_p1), %v3312_v9 }
  0x13   :  { %v2536_v5 = vpack.c.bf16 (!%p2497_p1), %v62_v3, %v58_v2  ;;  %v2568_v10 = vpack.c.bf16 (!%p2497_p1), %v64_v6, %v60_v4  ;;  %v2538_v11 = vpack.c.bf16 (!%p2497_p1), %v61_v8, %v57_v7  ;;  %v59_v12 = vld [vmem:[%s4784_s3 + $0x10] sm:$0xff] (!%p2497_p1)  ;;  %v66_v14 = vld [vmem:[%s4784_s3 + $0x48] sm:$0xff] (!%p2497_p1)  ;;  %3180 = vset.pattern.permute.xlu0 (!%p2497_p1), %v3313_v15  ;;  %3181 = vset.pattern.permute.xlu1 (!%p2497_p1), %v3313_v15  ;;  %v68_v18 = vld [vmem:[%s4784_s3 + $0x58] sm:$0xff] (!%p2497_p1) }
  0x14   :  { %v63_v13 = vld [vmem:[%s4784_s3 + $0x30] sm:$0xff] (!%p2497_p1)  ;;  %v70_v17 = vld [vmem:[%s4784_s3 + $0x68] sm:$0xff] (!%p2497_p1)  ;;  %v72_v19 = vld [vmem:[%s4784_s3 + $0x78] sm:$0xff] (!%p2497_p1) }
  0x15   :  { %2537 = vmatprep.subr.bf16.mxu0 (!%p2497_p1), %v2536_v5  ;;  %v2570_v16 = vpack.c.bf16 (!%p2497_p1), %v63_v13, %v59_v12  ;;  %2569 = vmatprep.subr.bf16.mxu1 (!%p2497_p1), %v2568_v10  ;;  %v2540_v20 = vpack.c.bf16 (!%p2497_p1), %v70_v17, %v66_v14  ;;  %v2572_v21 = vpack.c.bf16 (!%p2497_p1), %v72_v19, %v68_v18  ;;  %v65_v22 = vld [vmem:[%s4784_s3 + $0x40] sm:$0xff] (!%p2497_p1)  ;;  %v67_v24 = vld [vmem:[%s4784_s3 + $0x50] sm:$0xff] (!%p2497_p1)  ;;  %v74_v27 = vld [vmem:[%s4784_s3 + $0x88] sm:$0xff] (!%p2497_p1) }
  0x16   :  { %2539 = vmatpush1.bf16.msra.mxu0 (!%p2497_p1), %v2538_v11  ;;  %v69_v23 = vld [vmem:[%s4784_s3 + $0x60] sm:$0xff] (!%p2497_p1)  ;;  %v71_v26 = vld [vmem:[%s4784_s3 + $0x70] sm:$0xff] (!%p2497_p1)  ;;  %v78_v28 = vld [vmem:[%s4784_s3 + $0xa8] sm:$0xff] (!%p2497_p1) }
  0x17   :  { %2571 = vmatpush1.bf16.msra.mxu1 (!%p2497_p1), %v2570_v16  ;;  %v2542_v25 = vpack.c.bf16 (!%p2497_p1), %v69_v23, %v65_v22  ;;  %2541 = vmatprep.subr.bf16.mxu0 (!%p2497_p1), %v2540_v20  ;;  %v2574_v29 = vpack.c.bf16 (!%p2497_p1), %v71_v26, %v67_v24  ;;  %v2544_v30 = vpack.c.bf16 (!%p2497_p1), %v78_v28, %v74_v27  ;;  %v76_v31 = vld [vmem:[%s4784_s3 + $0x98] sm:$0xff] (!%p2497_p1)  ;;  %v73_v33 = vld [vmem:[%s4784_s3 + $0x80] sm:$0xff] (!%p2497_p1)  ;;  %v75_v36 = vld [vmem:[%s4784_s3 + $0x90] sm:$0xff] (!%p2497_p1) }
  0x18   :  { %2573 = vmatprep.subr.bf16.mxu1 (!%p2497_p1), %v2572_v21  ;;  %v80_v32 = vld [vmem:[%s4784_s3 + $0xb8] sm:$0xff] (!%p2497_p1)  ;;  %v77_v35 = vld [vmem:[%s4784_s3 + $0xa0] sm:$0xff] (!%p2497_p1)  ;;  %v79_v37 = vld [vmem:[%s4784_s3 + $0xb0] sm:$0xff] (!%p2497_p1) }
  0x19   :  { %v2576_v34 = vpack.c.bf16 %v80_v32, %v76_v31  ;;  %v2546_v38 = vpack.c.bf16 %v77_v35, %v73_v33  ;;  %v82_v39 = vld [vmem:[%s4784_s3 + $0xc8] sm:$0xff]  ;;  %v84_v41 = vld [vmem:[%s4784_s3 + $0xd8] sm:$0xff]  ;;  %v2578_v42 = vpack.c.bf16 %v79_v37, %v75_v36  ;;  %v81_v45 = vld [vmem:[%s4784_s3 + $0xc0] sm:$0xff] }
  0x1a   :  { %2543 = vmatpush1.bf16.msra.mxu0 %v2542_v25  ;;  %v86_v40 = vld [vmem:[%s4784_s3 + $0xe8] sm:$0xff]  ;;  %v88_v44 = vld [vmem:[%s4784_s3 + $0xf8] sm:$0xff]  ;;  %v85_v46 = vld [vmem:[%s4784_s3 + $0xe0] sm:$0xff] }
  0x1b   :  { %2575 = vmatpush1.bf16.msra.mxu1 %v2574_v29  ;;  %2545 = vmatprep.subr.bf16.mxu0 %v2544_v30  ;;  %v2548_v43 = vpack.c.bf16 %v86_v40, %v82_v39  ;;  %v2580_v47 = vpack.c.bf16 %v88_v44, %v84_v41  ;;  %v83_v48 = vld [vmem:[%s4784_s3 + $0xd0] sm:$0xff]  ;;  %v90_v50 = vld [vmem:[%s4784_s3 + $0x108] sm:$0xff]  ;;  %v92_v52 = vld [vmem:[%s4784_s3 + $0x118] sm:$0xff]  ;;  %v2550_v54 = vpack.c.bf16 %v85_v46, %v81_v45 }
  0x1c   :  { %2577 = vmatprep.subr.bf16.mxu1 %v2576_v34  ;;  %v87_v49 = vld [vmem:[%s4784_s3 + $0xf0] sm:$0xff]  ;;  %v94_v51 = vld [vmem:[%s4784_s3 + $0x128] sm:$0xff]  ;;  %v96_v53 = vld [vmem:[%s4784_s3 + $0x138] sm:$0xff] }
  0x1d   :  { %v2582_v55 = vpack.c.bf16 %v87_v49, %v83_v48  ;;  %v2552_v56 = vpack.c.bf16 %v94_v51, %v90_v50  ;;  %v89_v57 = vld [vmem:[%s4784_s3 + $0x100] sm:$0xff]  ;;  %v91_v59 = vld [vmem:[%s4784_s3 + $0x110] sm:$0xff]  ;;  %v2584_v60 = vpack.c.bf16 %v96_v53, %v92_v52  ;;  %v98_v62 = vld [vmem:[%s4784_s3 + $0x148] sm:$0xff] }
  0x1e   :  { %2547 = vmatpush1.bf16.msra.mxu0 %v2546_v38  ;;  %v93_v58 = vld [vmem:[%s4784_s3 + $0x120] sm:$0xff]  ;;  %v95_v61 = vld [vmem:[%s4784_s3 + $0x130] sm:$0xff]  ;;  %v102_v63 = vld [vmem:[%s4784_s3 + $0x168] sm:$0xff] }
  0x1f   :  { %2579 = vmatpush1.bf16.msra.mxu1 %v2578_v42  ;;  %2549 = vmatprep.subr.bf16.mxu0 %v2548_v43  ;;  %v100_v0 = vld [vmem:[%s4784_s3 + $0x158] sm:$0xff]  ;;  %v2554_v2 = vpack.c.bf16 %v93_v58, %v89_v57  ;;  %v2586_v3 = vpack.c.bf16 %v95_v61, %v91_v59  ;;  %v2556_v4 = vpack.c.bf16 %v102_v63, %v98_v62  ;;  %v97_v5 = vld [vmem:[%s4784_s3 + $0x140] sm:$0xff]  ;;  %v99_v7 = vld [vmem:[%s4784_s3 + $0x150] sm:$0xff] }
  0x20   :  { %2581 = vmatprep.subr.bf16.mxu1 %v2580_v47  ;;  %v104_v1 = vld [vmem:[%s4784_s3 + $0x178] sm:$0xff]  ;;  %v101_v6 = vld [vmem:[%s4784_s3 + $0x160] sm:$0xff]  ;;  %v103_v10 = vld [vmem:[%s4784_s3 + $0x170] sm:$0xff] }
  0x21   :  { %v2588_v8 = vpack.c.bf16 %v104_v1, %v100_v0  ;;  %v106_v11 = vld [vmem:[%s4784_s3 + $0x188] sm:$0xff]  ;;  %v108_v13 = vld [vmem:[%s4784_s3 + $0x198] sm:$0xff]  ;;  %v2558_v15 = vpack.c.bf16 %v101_v6, %v97_v5  ;;  %v2590_v16 = vpack.c.bf16 %v103_v10, %v99_v7  ;;  %v105_v18 = vld [vmem:[%s4784_s3 + $0x180] sm:$0xff] }
  0x22   :  { %2551 = vmatpush1.bf16.msra.mxu0 %v2550_v54  ;;  %v110_v12 = vld [vmem:[%s4784_s3 + $0x1a8] sm:$0xff]  ;;  %v112_v14 = vld [vmem:[%s4784_s3 + $0x1b8] sm:$0xff]  ;;  %v109_v19 = vld [vmem:[%s4784_s3 + $0x1a0] sm:$0xff] }
  0x23   :  { %2583 = vmatpush1.bf16.msra.mxu1 %v2582_v55  ;;  %2553 = vmatprep.subr.bf16.mxu0 %v2552_v56  ;;  %v2560_v17 = vpack.c.bf16 %v110_v12, %v106_v11  ;;  %v107_v20 = vld [vmem:[%s4784_s3 + $0x190] sm:$0xff]  ;;  %v2592_v21 = vpack.c.bf16 %v112_v14, %v108_v13  ;;  %v114_v23 = vld [vmem:[%s4784_s3 + $0x1c8] sm:$0xff]  ;;  %v116_v25 = vld [vmem:[%s4784_s3 + $0x1d8] sm:$0xff]  ;;  %v2562_v27 = vpack.c.bf16 %v109_v19, %v105_v18 }
  0x24   :  { %2585 = vmatprep.subr.bf16.mxu1 %v2584_v60  ;;  %v111_v22 = vld [vmem:[%s4784_s3 + $0x1b0] sm:$0xff]  ;;  %v118_v24 = vld [vmem:[%s4784_s3 + $0x1e8] sm:$0xff]  ;;  %v120_v26 = vld [vmem:[%s4784_s3 + $0x1f8] sm:$0xff] }
  0x25   :  { %v2594_v28 = vpack.c.bf16 %v111_v22, %v107_v20  ;;  %v2564_v29 = vpack.c.bf16 %v118_v24, %v114_v23  ;;  %v113_v30 = vld [vmem:[%s4784_s3 + $0x1c0] sm:$0xff]  ;;  %v115_v32 = vld [vmem:[%s4784_s3 + $0x1d0] sm:$0xff]  ;;  %v2596_v33 = vpack.c.bf16 %v120_v26, %v116_v25  ;;  %v408_v35 = vld [vmem:[%s4785_s4 + $0x8] sm:$0xff] }
  0x26   :  { %2555 = vmatpush1.bf16.msra.mxu0 %v2554_v2  ;;  %v117_v31 = vld [vmem:[%s4784_s3 + $0x1e0] sm:$0xff]  ;;  %v119_v34 = vld [vmem:[%s4784_s3 + $0x1f0] sm:$0xff]  ;;  %v412_v36 = vld [vmem:[%s4785_s4 + $0x28] sm:$0xff] }
  0x27   :  { %2587 = vmatpush1.bf16.msra.mxu1 %v2586_v3  ;;  %2557 = vmatprep.subr.bf16.mxu0 %v2556_v4  ;;  %v410_v37 = vld [vmem:[%s4785_s4 + $0x18] sm:$0xff]  ;;  %v2566_v39 = vpack.c.bf16 %v117_v31, %v113_v30  ;;  %v2598_v40 = vpack.c.bf16 %v119_v34, %v115_v32  ;;  %v3601_v41 = vpack.c.bf16 %v412_v36, %v408_v35  ;;  %v407_v42 = vld [vmem:[%s4785_s4] sm:$0xff]  ;;  %v409_v45 = vld [vmem:[%s4785_s4 + $0x10] sm:$0xff] }
  0x28   :  { %2589 = vmatprep.subr.bf16.mxu1 %v2588_v8  ;;  %v414_v38 = vld [vmem:[%s4785_s4 + $0x38] sm:$0xff]  ;;  %v411_v43 = vld [vmem:[%s4785_s4 + $0x20] sm:$0xff]  ;;  %v413_v46 = vld [vmem:[%s4785_s4 + $0x30] sm:$0xff] }
  0x29   :  { %v3609_v44 = vpack.c.bf16 %v414_v38, %v410_v37  ;;  %v416_v47 = vld [vmem:[%s4785_s4 + $0x48] sm:$0xff]  ;;  %v49_v49 = vld [vmem:[%s4782_s1] sm:$0xff]  ;;  %v3626_v50 = vpack.c.bf16 %v411_v43, %v407_v42  ;;  %v418_v51 = vld [vmem:[%s4785_s4 + $0x58] sm:$0xff]  ;;  %v3635_v53 = vpack.c.bf16 %v413_v46, %v409_v45 }
  0x2a   :  { %2559 = vmatpush1.bf16.msra.mxu0 %v2558_v15  ;;  %v420_v48 = vld [vmem:[%s4785_s4 + $0x68] sm:$0xff]  ;;  %v422_v52 = vld [vmem:[%s4785_s4 + $0x78] sm:$0xff]  ;;  %v415_v54 = vld [vmem:[%s4785_s4 + $0x40] sm:$0xff] }
  0x2b   :  { %2591 = vmatpush1.bf16.msra.mxu1 %v2590_v16  ;;  %2561 = vmatprep.subr.bf16.mxu0 %v2560_v17  ;;  %v419_v55 = vld [vmem:[%s4785_s4 + $0x60] sm:$0xff]  ;;  %v3644_v56 = vpack.c.bf16 %v420_v48, %v416_v47  ;;  %v417_v57 = vld [vmem:[%s4785_s4 + $0x50] sm:$0xff]  ;;  %v3652_v59 = vpack.c.bf16 %v422_v52, %v418_v51  ;;  %v424_v60 = vld [vmem:[%s4785_s4 + $0x88] sm:$0xff] }
  0x2c   :  { %2593 = vmatprep.subr.bf16.mxu1 %v2592_v21  ;;  %v421_v58 = vld [vmem:[%s4785_s4 + $0x70] sm:$0xff]  ;;  %v428_v61 = vld [vmem:[%s4785_s4 + $0xa8] sm:$0xff]  ;;  %v3664_v63 = vpack.c.bf16 %v419_v55, %v415_v54  ;;  %v426_v0 = vld [vmem:[%s4785_s4 + $0x98] sm:$0xff] }
  0x2d   :  { %v50_v62 = vld [vmem:[%s4782_s1 + $0x8] sm:$0xff]  ;;  %v430_v1 = vld [vmem:[%s4785_s4 + $0xb8] sm:$0xff]  ;;  %v3674_v2 = vpack.c.bf16 %v421_v58, %v417_v57  ;;  %v423_v3 = vld [vmem:[%s4785_s4 + $0x80] sm:$0xff]  ;;  %v3684_v5 = vpack.c.bf16 %v428_v61, %v424_v60 }
  0x2e   :  { %2563 = vmatpush1.bf16.msra.mxu0 %v2562_v27  ;;  %v427_v4 = vld [vmem:[%s4785_s4 + $0xa0] sm:$0xff]  ;;  %v425_v6 = vld [vmem:[%s4785_s4 + $0x90] sm:$0xff]  ;;  %v3693_v8 = vpack.c.bf16 %v430_v1, %v426_v0  ;;  %v432_v10 = vld [vmem:[%s4785_s4 + $0xc8] sm:$0xff] }
  0x2f   :  { %2595 = vmatpush1.bf16.msra.mxu1 %v2594_v28  ;;  %2565 = vmatprep.subr.bf16.mxu0 %v2564_v29  ;;  %v429_v7 = vld [vmem:[%s4785_s4 + $0xb0] sm:$0xff]  ;;  %v436_v11 = vld [vmem:[%s4785_s4 + $0xe8] sm:$0xff]  ;;  %v3705_v13 = vpack.c.bf16 %v427_v4, %v423_v3  ;;  %v434_v14 = vld [vmem:[%s4785_s4 + $0xd8] sm:$0xff] }
  0x30   :  { %2597 = vmatprep.subr.bf16.mxu1 %v2596_v33  ;;  %v51_v12 = vld [vmem:[%s4782_s1 + $0x10] sm:$0xff]  ;;  %v438_v15 = vld [vmem:[%s4785_s4 + $0xf8] sm:$0xff]  ;;  %v3715_v16 = vpack.c.bf16 %v429_v7, %v425_v6  ;;  %v431_v17 = vld [vmem:[%s4785_s4 + $0xc0] sm:$0xff]  ;;  %v3725_v19 = vpack.c.bf16 %v436_v11, %v432_v10 }
  0x31   :  { %v435_v18 = vld [vmem:[%s4785_s4 + $0xe0] sm:$0xff]  ;;  %v433_v20 = vld [vmem:[%s4785_s4 + $0xd0] sm:$0xff]  ;;  %v3734_v22 = vpack.c.bf16 %v438_v15, %v434_v14  ;;  %v440_v23 = vld [vmem:[%s4785_s4 + $0x108] sm:$0xff] }
  0x32   :  { %2567 = vmatpush1.bf16.msra.mxu0 %v2566_v39  ;;  %v437_v21 = vld [vmem:[%s4785_s4 + $0xf0] sm:$0xff]  ;;  %v444_v24 = vld [vmem:[%s4785_s4 + $0x128] sm:$0xff]  ;;  %v52_v25 = vld [vmem:[%s4782_s1 + $0x18] sm:$0xff]  ;;  %v3746_v26 = vpack.c.bf16 %v435_v18, %v431_v17 }
  0x33   :  { %2599 = vmatpush1.bf16.msra.mxu1 %v2598_v40  ;;  %2601 = vmatprep.subr.bf16.mxu0 %v3601_v41  ;;  %v442_v27 = vld [vmem:[%s4785_s4 + $0x118] sm:$0xff]  ;;  %v3756_v29 = vpack.c.bf16 %v437_v21, %v433_v20  ;;  %v439_v30 = vld [vmem:[%s4785_s4 + $0x100] sm:$0xff]  ;;  %v3766_v32 = vpack.c.bf16 %v444_v24, %v440_v23  ;;  %v441_v33 = vld [vmem:[%s4785_s4 + $0x110] sm:$0xff] }
  0x34   :  { %2633 = vmatprep.subr.bf16.mxu1 %v3609_v44  ;;  %v446_v28 = vld [vmem:[%s4785_s4 + $0x138] sm:$0xff]  ;;  %v443_v31 = vld [vmem:[%s4785_s4 + $0x120] sm:$0xff]  ;;  %v445_v34 = vld [vmem:[%s4785_s4 + $0x130] sm:$0xff] }
  0x35   :  { %208 = vmatmul.mubr.f32.vlgmr.msra.gmra.mrb[0].mxu0 %v49_v49  ;;  %v3775_v35 = vpack.c.bf16 %v446_v28, %v442_v27  ;;  %v448_v36 = vld [vmem:[%s4785_s4 + $0x148] sm:$0xff]  ;;  %v53_v38 = vld [vmem:[%s4782_s1 + $0x20] sm:$0xff]  ;;  %v3787_v39 = vpack.c.bf16 %v443_v31, %v439_v30  ;;  %v450_v40 = vld [vmem:[%s4785_s4 + $0x158] sm:$0xff]  ;;  %v3797_v43 = vpack.c.bf16 %v445_v34, %v441_v33 }
  0x36   :  { %321 = vmatmul.mubr.f32.vlgmr.msra.gmra.mrb[0].mxu1 %v49_v49  ;;  %2603 = vmatpush1.bf16.msra.mxu0 %v3626_v50  ;;  %v452_v37 = vld [vmem:[%s4785_s4 + $0x168] sm:$0xff]  ;;  %v454_v42 = vld [vmem:[%s4785_s4 + $0x178] sm:$0xff]  ;;  %v447_v45 = vld [vmem:[%s4785_s4 + $0x140] sm:$0xff] }
  0x37   :  { %2635 = vmatpush1.bf16.msra.mxu1 %v3635_v53  ;;  %213 = vmatprep.mubr.f32.mxu0 %v3312_v9  ;;  %v451_v46 = vld [vmem:[%s4785_s4 + $0x160] sm:$0xff]  ;;  %v3807_v47 = vpack.c.bf16 %v452_v37, %v448_v36  ;;  %v449_v48 = vld [vmem:[%s4785_s4 + $0x150] sm:$0xff]  ;;  %v3816_v51 = vpack.c.bf16 %v454_v42, %v450_v40  ;;  %v456_v52 = vld [vmem:[%s4785_s4 + $0x188] sm:$0xff] }
  0x38   :  { %326 = vmatprep.mubr.f32.mxu1 %v3312_v9  ;;  %2605 = vmatprep.subr.bf16.mxu0 %v3644_v56  ;;  %v453_v49 = vld [vmem:[%s4785_s4 + $0x170] sm:$0xff]  ;;  %v460_v54 = vld [vmem:[%s4785_s4 + $0x1a8] sm:$0xff]  ;;  %v3828_v57 = vpack.c.bf16 %v451_v46, %v447_v45  ;;  %v458_v58 = vld [vmem:[%s4785_s4 + $0x198] sm:$0xff] }
  0x39   :  { %214 = vmatmul.mubr.f32.gmra.mrb[2].mxu0 %v50_v62  ;;  %2637 = vmatprep.subr.bf16.mxu1 %v3652_v59  ;;  %v54_v55 = vld [vmem:[%s4782_s1 + $0x28] sm:$0xff]  ;;  %v462_v60 = vld [vmem:[%s4785_s4 + $0x1b8] sm:$0xff]  ;;  %v3838_v61 = vpack.c.bf16 %v453_v49, %v449_v48  ;;  %v459_v0 = vld [vmem:[%s4785_s4 + $0x1a0] sm:$0xff]  ;;  %v3848_v1 = vpack.c.bf16 %v460_v54, %v456_v52 }
  0x3a   :  { %327 = vmatmul.mubr.f32.gmra.mrb[2].mxu1 %v50_v62  ;;  %2607 = vmatpush1.bf16.msra.mxu0 %v3664_v63  ;;  %v455_v62 = vld [vmem:[%s4785_s4 + $0x180] sm:$0xff]  ;;  %v457_v3 = vld [vmem:[%s4785_s4 + $0x190] sm:$0xff]  ;;  %v3857_v6 = vpack.c.bf16 %v462_v60, %v458_v58  ;;  %v464_v7 = vld [vmem:[%s4785_s4 + $0x1c8] sm:$0xff] }
  0x3b   :  { %2639 = vmatpush1.bf16.msra.mxu1 %v3674_v2  ;;  %219 = vmatprep.mubr.f32.mxu0 %v3312_v9  ;;  %v461_v4 = vld [vmem:[%s4785_s4 + $0x1b0] sm:$0xff]  ;;  %v468_v10 = vld [vmem:[%s4785_s4 + $0x1e8] sm:$0xff]  ;;  %v466_v14 = vld [vmem:[%s4785_s4 + $0x1d8] sm:$0xff] }
  0x3c   :  { %332 = vmatprep.mubr.f32.mxu1 %v3312_v9  ;;  %2609 = vmatprep.subr.bf16.mxu0 %v3684_v5  ;;  %v55_v11 = vld [vmem:[%s4782_s1 + $0x30] sm:$0xff]  ;;  %v470_v15 = vld [vmem:[%s4785_s4 + $0x1f8] sm:$0xff]  ;;  %v3879_v17 = vpack.c.bf16 %v461_v4, %v457_v3  ;;  %v463_v18 = vld [vmem:[%s4785_s4 + $0x1c0] sm:$0xff]  ;;  %v3889_v21 = vpack.c.bf16 %v468_v10, %v464_v7 }
  0x3d   :  { %220 = vmatmul.mubr.f32.gmra.mrb[4].mxu0 %v51_v12  ;;  %2641 = vmatprep.subr.bf16.mxu1 %v3693_v8  ;;  %v467_v20 = vld [vmem:[%s4785_s4 + $0x1e0] sm:$0xff]  ;;  %v465_v23 = vld [vmem:[%s4785_s4 + $0x1d0] sm:$0xff]  ;;  %v56_v27 = vld [vmem:[%s4782_s1 + $0x38] sm:$0xff] }
  0x3e   :  { %333 = vmatmul.mubr.f32.gmra.mrb[4].mxu1 %v51_v12  ;;  %2611 = vmatpush1.bf16.msra.mxu0 %v3705_v13  ;;  %v3869_v12 = vpack.c.bf16 %v459_v0, %v455_v62  ;;  %v469_v24 = vld [vmem:[%s4785_s4 + $0x1f0] sm:$0xff]  ;;  %v3904_v28 = vpack.c.bf16 %v467_v20, %v463_v18  ;;  %v641_v31 = vld [vmem:[%s4783_s2] sm:$0xff]  ;;  %v2504_v34 = vld [vmem:[%s4783_s2 + $0x8] sm:$0xff]  ;;  %v123_v62 = vlaneseq }
  0x3f   :  { %2643 = vmatpush1.bf16.msra.mxu1 %v3715_v16  ;;  %225 = vmatprep.mubr.f32.mxu0 %v3312_v9  ;;  %v3908_v30 = vpack.c.bf16 %v469_v24, %v465_v23  ;;  %v3920_v33 = vld [vmem:[%s4788_s7] sm:$0xff]  ;;  %v648_v36 = vsub.f32 1.0, %v641_v31  ;;  %v907_v37 = vsub.f32 1.0, %v2504_v34  ;;  %v2514_v42 = vld [vmem:[%s4783_s2 + $0x18] sm:$0xff]  ;;  %v2524_v49 = vld [vmem:[%s4783_s2 + $0x28] sm:$0xff] }
  0x40   :  { %338 = vmatprep.mubr.f32.mxu1 %v3312_v9  ;;  %2613 = vmatprep.subr.bf16.mxu0 %v3725_v19  ;;  %v1427_v45 = vsub.f32 1.0, %v2514_v42  ;;  %v2519_v46 = vld [vmem:[%s4783_s2 + $0x20] sm:$0xff]  ;;  %v1947_v52 = vsub.f32 1.0, %v2524_v49  ;;  %v2529_v54 = vld [vmem:[%s4783_s2 + $0x30] sm:$0xff]  ;;  %v2534_v58 = vld [vmem:[%s4783_s2 + $0x38] sm:$0xff]  ;;  %v124_v0 = vshrl.u32 %v123_v62, 7 }
  0x41   :  { %226 = vmatmul.mubr.f32.gmra.mrb[6].mxu0 %v52_v25  ;;  %2645 = vmatprep.subr.bf16.mxu1 %v3734_v22  ;;  %v1687_v48 = vsub.f32 1.0, %v2519_v46  ;;  %v2467_v60 = vsub.f32 1.0, %v2534_v58  ;;  %v121_v4 = vld [vmem:[%s4786_s5] sm:$0xf] }
  0x42   :  { %339 = vmatmul.mubr.f32.gmra.mrb[6].mxu1 %v52_v25  ;;  %2615 = vmatpush1.bf16.msra.mxu0 %v3746_v26  ;;  %v3898_v25 = vpack.c.bf16 %v470_v15, %v466_v14  ;;  %v125_v3 = vsub.s32 0, %v124_v0  ;;  %v129_v7 = vsub.s32 1, %v124_v0  ;;  %v137_v15 = vsub.s32 3, %v124_v0 }
  0x43   :  { %2647 = vmatpush1.bf16.msra.mxu1 %v3756_v29  ;;  %231 = vmatprep.mubr.f32.mxu0 %v3312_v9 }
  0x44   :  { %344 = vmatprep.mubr.f32.mxu1 %v3312_v9  ;;  %2617 = vmatprep.subr.bf16.mxu0 %v3766_v32  ;;  %v3987_v10 = vrot.slane %v121_v4, %v125_v3 }
  0x45   :  { %232 = vmatmul.mubr.f32.gmra.mrb[8].mxu0 %v53_v38  ;;  %2649 = vmatprep.subr.bf16.mxu1 %v3775_v35 }
  0x46   :  { %345 = vmatmul.mubr.f32.gmra.mrb[8].mxu1 %v53_v38  ;;  %2619 = vmatpush1.bf16.msra.mxu0 %v3787_v39  ;;  %v2509_v38 = vld [vmem:[%s4783_s2 + $0x10] sm:$0xff] }
  0x47   :  { %2651 = vmatpush1.bf16.msra.mxu1 %v3797_v43  ;;  %237 = vmatprep.mubr.f32.mxu0 %v3312_v9  ;;  %v1167_v40 = vsub.f32 1.0, %v2509_v38 }
  0x48   :  { %350 = vmatprep.mubr.f32.mxu1 %v3312_v9  ;;  %2621 = vmatprep.subr.bf16.mxu0 %v3807_v47 }
  0x49   :  { %238 = vmatmul.mubr.f32.gmra.mrb[10].mxu0 %v54_v55  ;;  %2653 = vmatprep.subr.bf16.mxu1 %v3816_v51 }
  0x4a   :  { %351 = vmatmul.mubr.f32.gmra.mrb[10].mxu1 %v54_v55  ;;  %2623 = vmatpush1.bf16.msra.mxu0 %v3828_v57  ;;  %v2207_v55 = vsub.f32 1.0, %v2529_v54 }
  0x4b   :  { %2655 = vmatpush1.bf16.msra.mxu1 %v3838_v61  ;;  %243 = vmatprep.mubr.f32.mxu0 %v3312_v9 }
  0x4c   :  { %356 = vmatprep.mubr.f32.mxu1 %v3312_v9  ;;  %2625 = vmatprep.subr.bf16.mxu0 %v3848_v1 }
  0x4d   :  { %244 = vmatmul.mubr.f32.gmra.mrb[12].mxu0 %v55_v11  ;;  %2657 = vmatprep.subr.bf16.mxu1 %v3857_v6 }
  0x4e   :  { %357 = vmatmul.mubr.f32.gmra.mrb[12].mxu1 %v55_v11  ;;  %2627 = vmatpush1.bf16.msra.mxu0 %v3869_v12  ;;  %v3989_v11 = vrot.slane %v121_v4, %v129_v7 }
  0x4f   :  { %2659 = vmatpush1.bf16.msra.mxu1 %v3879_v17  ;;  %249 = vmatprep.mubr.f32.mxu0 %v3312_v9 }
  0x50   :  { %362 = vmatprep.mubr.f32.mxu1 %v3312_v9  ;;  %2629 = vmatprep.subr.bf16.mxu0 %v3889_v21 }
  0x51   :  { %250 = vmatmul.mubr.f32.gmra.mrb[14].mxu0 %v56_v27  ;;  %2661 = vmatprep.subr.bf16.mxu1 %v3898_v25 }
  0x52   :  { %363 = vmatmul.mubr.f32.gmra.mrb[14].mxu1 %v56_v27  ;;  %2631 = vmatpush1.bf16.msra.mxu0 %v3904_v28 }
  0x53   :  { %2663 = vmatpush1.bf16.msra.mxu1 %v3908_v30  ;;  %535 = vmatprep.mubr.f32.mxu0 %v3312_v9 }
  0x54   :  { %606 = vmatprep.mubr.f32.mxu1 %v3312_v9  ;;  %644 = vperm.xlu0 %3180, %v641_v31   ;;  %v3993_v31 = vrot.slane %v121_v4, %v137_v15 }
  0x55   :  { %536 = vmatmul.mubr.f32.vlgmr.msra.gmra.mrb[0].mxu0 %v3920_v33  ;;  %903 = vperm.xlu1 %3181, %v2504_v34   ;;  %v133_v34 = vsub.s32 2, %v124_v0 }
  0x56   :  { %607 = vmatmul.mubr.f32.vlgmr.msra.gmra.mrb[0].mxu1 %v3920_v33  ;;  %2665 = vmatprep.subr.bf16.mxu0 %v3601_v41 }
  0x57   :  { %2697 = vmatprep.subr.bf16.mxu1 %v3609_v44  ;;  %2667 = vmatpush1.bf16.msra.mxu0 %v3626_v50 }
  0x58   :  { %651 = vperm.xlu0 %3180, %v648_v36   ;;  %2699 = vmatpush1.bf16.msra.mxu1 %v3635_v53 }
  0x59   :  { %910 = vperm.xlu1 %3181, %v907_v37   ;;  %2669 = vmatprep.subr.bf16.mxu0 %v3644_v56  ;;  %v3996_v37 = vrot.slane %v121_v4, %v133_v34  ;;  %v1186_v34 = vld [vmem:[%s4785_s4 + $0x8] sm:$0xff] }
  0x5a   :  { %2701 = vmatprep.subr.bf16.mxu1 %v3652_v59  ;;  %793 = vmatprep.mubr.f32.mxu0 %v3312_v9 }
  0x5b   :  { %2671 = vmatpush1.bf16.msra.mxu0 %v3664_v63  ;;  %864 = vmatprep.mubr.f32.mxu1 %v3312_v9 }
  0x5c   :  { %1163 = vperm.xlu0 %3180, %v2509_v38   ;;  %2703 = vmatpush1.bf16.msra.mxu1 %v3674_v2 }
  0x5d   :  { %2673 = vmatprep.subr.bf16.mxu0 %v3684_v5  ;;  %2705 = vmatprep.subr.bf16.mxu1 %v3693_v8 }
  0x5e   :  { %1170 = vperm.xlu1 %3181, %v1167_v40  }
  0x5f   :  { %2675 = vmatpush1.bf16.msra.mxu0 %v3705_v13 }
  0x60   :  { %1423 = vperm.xlu0 %3180, %v2514_v42   ;;  %2707 = vmatpush1.bf16.msra.mxu1 %v3715_v16 }
  0x61   :  { %2677 = vmatprep.subr.bf16.mxu0 %v3725_v19  ;;  %2709 = vmatprep.subr.bf16.mxu1 %v3734_v22 }
  0x62   :  { %1430 = vperm.xlu1 %3181, %v1427_v45  }
  0x63   :  { %2679 = vmatpush1.bf16.msra.mxu0 %v3746_v26 }
  0x64   :  { %1683 = vperm.xlu0 %3180, %v2519_v46   ;;  %2711 = vmatpush1.bf16.msra.mxu1 %v3756_v29 }
  0x65   :  { %2681 = vmatprep.subr.bf16.mxu0 %v3766_v32  ;;  %2713 = vmatprep.subr.bf16.mxu1 %v3775_v35 }
  0x66   :  { %1690 = vperm.xlu1 %3181, %v1687_v48  }
  0x67   :  { %2683 = vmatpush1.bf16.msra.mxu0 %v3787_v39 }
  0x68   :  { %1943 = vperm.xlu0 %3180, %v2524_v49   ;;  %2715 = vmatpush1.bf16.msra.mxu1 %v3797_v43 }
  0x69   :  { %2685 = vmatprep.subr.bf16.mxu0 %v3807_v47  ;;  %2717 = vmatprep.subr.bf16.mxu1 %v3816_v51 }
  0x6a   :  { %1950 = vperm.xlu1 %3181, %v1947_v52  }
  0x6b   :  { %2687 = vmatpush1.bf16.msra.mxu0 %v3828_v57 }
  0x6c   :  { %2203 = vperm.xlu0 %3180, %v2529_v54   ;;  %2719 = vmatpush1.bf16.msra.mxu1 %v3838_v61 }
  0x6d   :  { %2689 = vmatprep.subr.bf16.mxu0 %v3848_v1  ;;  %2721 = vmatprep.subr.bf16.mxu1 %v3857_v6 }
  0x6e   :  { %2210 = vperm.xlu1 %3181, %v2207_v55   ;;  %v402_v55 = vld [vmem:[%s4789_s8] sm:$0xff] }
  0x6f   :  { %2691 = vmatpush1.bf16.msra.mxu0 %v3869_v12 }
  0x70   :  { %2463 = vperm.xlu0 %3180, %v2534_v58   ;;  %2723 = vmatpush1.bf16.msra.mxu1 %v3879_v17 }
  0x71   :  { %2693 = vmatprep.subr.bf16.mxu0 %v3889_v21  ;;  %2725 = vmatprep.subr.bf16.mxu1 %v3898_v25 }
  0x72   :  { %2470 = vperm.xlu1 %3181, %v2467_v60  }
  0x73   :  { %2695 = vmatpush1.bf16.msra.mxu0 %v3904_v28 }
  0x74   :  { %2727 = vmatpush1.bf16.msra.mxu1 %v3908_v30  ;;  %2729 = vmatprep.subr.bf16.mxu0 %v3601_v41 }
  0x75   :  { %2761 = vmatprep.subr.bf16.mxu1 %v3609_v44 }
  0xd3   :  { %v645_v49 = vpop.permute.xlu0 %644 }
  0xd7   :  { %v652_v4 = vpop.permute.xlu0 %651 }
 0x128   :  { %v537_v14 = vpop.f32.mrb[0].mxu0 }
 0x129   :  { %v3112_v18 = vadd.f32 %v537_v14, %v3987_v10  ;;  %v608_v20 = vpop.f32.mrb[0].mxu1  ;;  %v539_v41 = vpop.f32.mrb[1].mxu0  ;;  %v657_v14 = vmul.f32 %v652_v4, %v402_v55 }
 0x12a   :  { %v3113_v44 = vadd.f32 %v539_v41, %v3989_v11  ;;  %v610_v23 = vpop.f32.mrb[1].mxu1  ;;  %v3128_v40 = vadd.f32 %v608_v20, %v3996_v37 }
 0x12b   :  { %v2498_v24 = vmul.f32 -1.442695, %v3112_v18  ;;  %v3129_v36 = vadd.f32 %v610_v23, %v3993_v31 }
 0x12c   :  { %v2499_v27 = vmul.f32 -1.442695, %v3113_v44 }
 0x12d   :  { %3182 = vpow2.f32 %v2498_v24  ;;  %v2500_v38 = vmul.f32 -1.442695, %v3129_v36  ;;  %v654_v24 = vmul.f32 %v652_v4, %v3920_v33  ;;  %v1190_v36 = vld [vmem:[%s4785_s4 + $0x28] sm:$0xff]  ;;  %v1193_v4 = vld [vmem:[%s4785_s4 + $0x40] sm:$0xff] }
 0x12e   :  { %3184 = vpow2.f32 %v2499_v27 }
 0x12f   :  { %3186 = vpow2.f32 %v2500_v38  ;;  %v1188_v38 = vld [vmem:[%s4785_s4 + $0x18] sm:$0xff] }
 0x130   :  { %3188 = vtanh.f32 %v3128_v40  ;;  %v4077_v40 = vpack.c.bf16 %v1190_v36, %v1186_v34  ;;  %v1221_v34 = vld [vmem:[%s4785_s4 + $0x120] sm:$0xff] }
 0x137   :  { %v3183_v42 = vpop.eup %3182 }
 0x138   :  { %v3185_v45 = vpop.eup %3184  ;;  %v620_v46 = vadd.f32 1.0, %v3183_v42  ;;  %v1192_v42 = vld [vmem:[%s4785_s4 + $0x38] sm:$0xff] }
 0x139   :  { %v626_v48 = vadd.f32 1.0, %v3185_v45  ;;  %v3187_v52 = vpop.eup %3186  ;;  %v1185_v45 = vld [vmem:[%s4785_s4] sm:$0xff] }
 0x13a   :  { %3190 = vrcp.f32 %v620_v46  ;;  %v3189_v54 = vpop.eup %3188  ;;  %v633_v62 = vadd.f32 1.0, %v3187_v52  ;;  %v1189_v46 = vld [vmem:[%s4785_s4 + $0x20] sm:$0xff]  ;;  %v1187_v52 = vld [vmem:[%s4785_s4 + $0x10] sm:$0xff] }
 0x13b   :  { %3192 = vrcp.f32 %v626_v48  ;;  %v4088_v48 = vpack.c.bf16 %v1192_v42, %v1188_v38  ;;  %v1219_v42 = vld [vmem:[%s4785_s4 + $0x110] sm:$0xff] }
 0x13c   :  { %3194 = vrcp.f32 %v633_v62  ;;  %v1196_v62 = vld [vmem:[%s4785_s4 + $0x58] sm:$0xff] }
 0x144   :  { %v3191_v58 = vpop.eup %3190 }
 0x145   :  { %v3193_v60 = vpop.eup %3192  ;;  %v637_v0 = vmul.f32 %v3191_v58, %v3189_v54  ;;  %v1191_v54 = vld [vmem:[%s4785_s4 + $0x30] sm:$0xff]  ;;  %v1194_v58 = vld [vmem:[%s4785_s4 + $0x48] sm:$0xff] }
 0x146   :  { %v636_v3 = vmul.f32 %v3193_v60, %v402_v55  ;;  %v3195_v20 = vpop.eup %3194  ;;  %v4099_v55 = vpack.c.bf16 %v1191_v54, %v1187_v52  ;;  %v1198_v60 = vld [vmem:[%s4785_s4 + $0x68] sm:$0xff] }
 0x147   :  { %v1230_v54 = vld [vmem:[%s4785_s4 + $0x168] sm:$0xff] }
 0x148   :  { %v638_v7 = vadd.f32 %v637_v0, %v636_v3  ;;  %v4113_v0 = vpack.c.bf16 %v1198_v60, %v1194_v58  ;;  %v1200_v3 = vld [vmem:[%s4785_s4 + $0x78] sm:$0xff] }
 0x149   :  { %v1228_v58 = vld [vmem:[%s4785_s4 + $0x158] sm:$0xff] }
 0x14a   :  { %3196 = vtanh.f32 %v638_v7  ;;  %v656_v15 = vmul.f32 %v645_v49, %v638_v7  ;;  %v1197_v7 = vld [vmem:[%s4785_s4 + $0x60] sm:$0xff]  ;;  %v1232_v60 = vld [vmem:[%s4785_s4 + $0x178] sm:$0xff] }
 0x14c   :  { %v4002_v18 = vadd.f32 %v657_v14, %v656_v15  ;;  %v4124_v14 = vpack.c.bf16 %v1200_v3, %v1196_v62  ;;  %v4126_v15 = vpack.c.bf16 %v1197_v7, %v1193_v4  ;;  %v4261_v3 = vpack.c.bf16 %v1232_v60, %v1228_v58  ;;  %v1225_v4 = vld [vmem:[%s4785_s4 + $0x140] sm:$0xff] }
 0x14d   :  { %v1229_v7 = vld [vmem:[%s4785_s4 + $0x160] sm:$0xff] }
 0x154   :  { %v3197_v41 = vpop.eup %3196 }
 0x155   :  { %v640_v44 = vmul.f32 %v3197_v41, %v3195_v20  ;;  %v1195_v20 = vld [vmem:[%s4785_s4 + $0x50] sm:$0xff] }
 0x156   :  { %v1199_v41 = vld [vmem:[%s4785_s4 + $0x70] sm:$0xff] }
 0x157   :  { %v647_v23 = vmul.f32 %v645_v49, %v640_v44  ;;  %v4090_v49 = vpack.c.bf16 %v1189_v46, %v1185_v45  ;;  %v4135_v44 = vpack.c.bf16 %v1199_v41, %v1195_v20  ;;  %v1223_v45 = vld [vmem:[%s4785_s4 + $0x130] sm:$0xff]  ;;  %v1226_v46 = vld [vmem:[%s4785_s4 + $0x148] sm:$0xff]  ;;  %v4273_v41 = vpack.c.bf16 %v1229_v7, %v1225_v4 }
 0x158   :  { %v4246_v52 = vpack.c.bf16 %v1223_v45, %v1219_v42  ;;  %v4259_v62 = vpack.c.bf16 %v1230_v54, %v1226_v46  ;;  %v1227_v20 = vld [vmem:[%s4785_s4 + $0x150] sm:$0xff] }
 0x159   :  { %659 = vst [vmem:[%s4787_s6] sm:$0xff] %v647_v23  ;;  %v4008_v27 = vadd.f32 %v654_v24, %v647_v23  ;;  %v1202_v23 = vld [vmem:[%s4785_s4 + $0x88] sm:$0xff]  ;;  %v1243_v42 = vld [vmem:[%s4785_s4 + $0x1d0] sm:$0xff] }
 0x15a   :  { %v1206_v24 = vld [vmem:[%s4785_s4 + $0xa8] sm:$0xff]  ;;  %v1247_v45 = vld [vmem:[%s4785_s4 + $0x1f0] sm:$0xff] }
 0x15b   :  { %794 = vmatmul.mubr.f32.vlgmr.msra.gmra.mrb[2].mxu0 %v4008_v27  ;;  %865 = vmatmul.mubr.f32.vlgmr.msra.gmra.mrb[2].mxu1 %v4008_v27  ;;  %v4351_v54 = vpack.c.bf16 %v1247_v45, %v1243_v42 }
 0x15c   :  { %2731 = vmatpush1.bf16.msra.mxu0 %v3626_v50  ;;  %2763 = vmatpush1.bf16.msra.mxu1 %v3635_v53 }
 0x15d   :  { %2733 = vmatprep.subr.bf16.mxu0 %v3644_v56  ;;  %2765 = vmatprep.subr.bf16.mxu1 %v3652_v59 }
 0x15e   :  { %1053 = vmatprep.mubr.f32.mxu0 %v3312_v9  ;;  %1124 = vmatprep.mubr.f32.mxu1 %v3312_v9 }
 0x160   :  { %2735 = vmatpush1.bf16.msra.mxu0 %v3664_v63  ;;  %2767 = vmatpush1.bf16.msra.mxu1 %v3674_v2 }
 0x161   :  { %2737 = vmatprep.subr.bf16.mxu0 %v3684_v5  ;;  %2769 = vmatprep.subr.bf16.mxu1 %v3693_v8 }
 0x164   :  { %2739 = vmatpush1.bf16.msra.mxu0 %v3705_v13  ;;  %2771 = vmatpush1.bf16.msra.mxu1 %v3715_v16 }
 0x165   :  { %2741 = vmatprep.subr.bf16.mxu0 %v3725_v19  ;;  %2773 = vmatprep.subr.bf16.mxu1 %v3734_v22 }
 0x168   :  { %2743 = vmatpush1.bf16.msra.mxu0 %v3746_v26  ;;  %2775 = vmatpush1.bf16.msra.mxu1 %v3756_v29 }
 0x169   :  { %2745 = vmatprep.subr.bf16.mxu0 %v3766_v32  ;;  %2777 = vmatprep.subr.bf16.mxu1 %v3775_v35 }
 0x16c   :  { %2747 = vmatpush1.bf16.msra.mxu0 %v3787_v39  ;;  %2779 = vmatpush1.bf16.msra.mxu1 %v3797_v43 }
 0x16d   :  { %2749 = vmatprep.subr.bf16.mxu0 %v3807_v47  ;;  %2781 = vmatprep.subr.bf16.mxu1 %v3816_v51 }
 0x170   :  { %2751 = vmatpush1.bf16.msra.mxu0 %v3828_v57  ;;  %2783 = vmatpush1.bf16.msra.mxu1 %v3838_v61 }
 0x171   :  { %2753 = vmatprep.subr.bf16.mxu0 %v3848_v1  ;;  %2785 = vmatprep.subr.bf16.mxu1 %v3857_v6  ;;  %v4052_v6 = vpop.permute.xlu1 %903 }
 0x174   :  { %2755 = vmatpush1.bf16.msra.mxu0 %v3869_v12  ;;  %2787 = vmatpush1.bf16.msra.mxu1 %v3879_v17 }
 0x175   :  { %2757 = vmatprep.subr.bf16.mxu0 %v3889_v21  ;;  %2789 = vmatprep.subr.bf16.mxu1 %v3898_v25  ;;  %v4054_v25 = vpop.permute.xlu1 %910 }
 0x178   :  { %2759 = vmatpush1.bf16.msra.mxu0 %v3904_v28  ;;  %2791 = vmatpush1.bf16.msra.mxu1 %v3908_v30  ;;  %v913_v28 = vmul.f32 %v4054_v25, %v4008_v27  ;;  %v1204_v27 = vld [vmem:[%s4785_s4 + $0x98] sm:$0xff] }
 0x179   :  { %2793 = vmatprep.subr.bf16.mxu0 %v4077_v40  ;;  %2825 = vmatprep.subr.bf16.mxu1 %v4088_v48 }
 0x22e   :  { %v795_v50 = vpop.f32.mrb[2].mxu0  ;;  %v866_v53 = vpop.f32.mrb[2].mxu1 }
 0x22f   :  { %v3114_v56 = vadd.f32 %v795_v50, %v3987_v10  ;;  %v797_v59 = vpop.f32.mrb[3].mxu0  ;;  %v868_v63 = vpop.f32.mrb[3].mxu1  ;;  %v3130_v19 = vadd.f32 %v866_v53, %v3996_v37  ;;  %v4149_v50 = vpack.c.bf16 %v1206_v24, %v1202_v23  ;;  %v1208_v53 = vld [vmem:[%s4785_s4 + $0xb8] sm:$0xff]  ;;  %v1231_v23 = vld [vmem:[%s4785_s4 + $0x170] sm:$0xff]  ;;  %v1234_v24 = vld [vmem:[%s4785_s4 + $0x188] sm:$0xff] }
 0x230   :  { %v3115_v2 = vadd.f32 %v797_v59, %v3989_v11  ;;  %v3131_v13 = vadd.f32 %v868_v63, %v3993_v31  ;;  %v1205_v59 = vld [vmem:[%s4785_s4 + $0xa0] sm:$0xff]  ;;  %v4160_v63 = vpack.c.bf16 %v1208_v53, %v1204_v27  ;;  %v1238_v27 = vld [vmem:[%s4785_s4 + $0x1a8] sm:$0xff]  ;;  %v4286_v53 = vpack.c.bf16 %v1231_v23, %v1227_v20 }
 0x231   :  { %v2501_v5 = vmul.f32 -1.442695, %v3114_v56  ;;  %v1201_v56 = vld [vmem:[%s4785_s4 + $0x80] sm:$0xff] }
 0x232   :  { %v2502_v8 = vmul.f32 -1.442695, %v3115_v2  ;;  %v2503_v16 = vmul.f32 -1.442695, %v3131_v13  ;;  %v4162_v2 = vpack.c.bf16 %v1205_v59, %v1201_v56  ;;  %v4288_v56 = vpack.c.bf16 %v1238_v27, %v1234_v24  ;;  %v1236_v59 = vld [vmem:[%s4785_s4 + $0x198] sm:$0xff] }
 0x233   :  { %3198 = vpow2.f32 %v2501_v5  ;;  %v1203_v5 = vld [vmem:[%s4785_s4 + $0x90] sm:$0xff] }
 0x234   :  { %3200 = vpow2.f32 %v2502_v8  ;;  %v1207_v8 = vld [vmem:[%s4785_s4 + $0xb0] sm:$0xff] }
 0x235   :  { %3202 = vpow2.f32 %v2503_v16  ;;  %v4171_v13 = vpack.c.bf16 %v1207_v8, %v1203_v5  ;;  %v1210_v16 = vld [vmem:[%s4785_s4 + $0xc8] sm:$0xff]  ;;  %v1240_v5 = vld [vmem:[%s4785_s4 + $0x1b8] sm:$0xff]  ;;  %v1233_v8 = vld [vmem:[%s4785_s4 + $0x180] sm:$0xff] }
 0x236   :  { %3204 = vtanh.f32 %v3130_v19  ;;  %v1214_v19 = vld [vmem:[%s4785_s4 + $0xe8] sm:$0xff] }
 0x23d   :  { %v3199_v22 = vpop.eup %3198 }
 0x23e   :  { %v3201_v26 = vpop.eup %3200  ;;  %v878_v29 = vadd.f32 1.0, %v3199_v22  ;;  %v1212_v22 = vld [vmem:[%s4785_s4 + $0xd8] sm:$0xff] }
 0x23f   :  { %v884_v32 = vadd.f32 1.0, %v3201_v26  ;;  %v3203_v35 = vpop.eup %3202  ;;  %v4185_v26 = vpack.c.bf16 %v1214_v19, %v1210_v16  ;;  %v4299_v16 = vpack.c.bf16 %v1240_v5, %v1236_v59  ;;  %v1237_v19 = vld [vmem:[%s4785_s4 + $0x1a0] sm:$0xff] }
 0x240   :  { %3206 = vrcp.f32 %v878_v29  ;;  %v3205_v39 = vpop.eup %3204  ;;  %v891_v51 = vadd.f32 1.0, %v3203_v35  ;;  %v1216_v29 = vld [vmem:[%s4785_s4 + $0xf8] sm:$0xff]  ;;  %v1213_v35 = vld [vmem:[%s4785_s4 + $0xe0] sm:$0xff] }
 0x241   :  { %3208 = vrcp.f32 %v884_v32  ;;  %v1209_v32 = vld [vmem:[%s4785_s4 + $0xc0] sm:$0xff] }
 0x242   :  { %3210 = vrcp.f32 %v891_v51  ;;  %v1215_v51 = vld [vmem:[%s4785_s4 + $0xf0] sm:$0xff] }
 0x24a   :  { %v3207_v43 = vpop.eup %3206 }
 0x24b   :  { %v3209_v47 = vpop.eup %3208  ;;  %v895_v57 = vmul.f32 %v3207_v43, %v3205_v39  ;;  %v4196_v39 = vpack.c.bf16 %v1216_v29, %v1212_v22  ;;  %v4198_v43 = vpack.c.bf16 %v1213_v35, %v1209_v32  ;;  %v1235_v22 = vld [vmem:[%s4785_s4 + $0x190] sm:$0xff]  ;;  %v4311_v32 = vpack.c.bf16 %v1237_v19, %v1233_v8  ;;  %v1242_v35 = vld [vmem:[%s4785_s4 + $0x1c8] sm:$0xff] }
 0x24c   :  { %v894_v61 = vmul.f32 %v3209_v47, %v4002_v18  ;;  %v3211_v12 = vpop.eup %3210  ;;  %v1211_v47 = vld [vmem:[%s4785_s4 + $0xd0] sm:$0xff] }
 0x24d   :  { %v1239_v29 = vld [vmem:[%s4785_s4 + $0x1b0] sm:$0xff] }
 0x24e   :  { %v4049_v1 = vadd.f32 %v895_v57, %v894_v61  ;;  %v4207_v57 = vpack.c.bf16 %v1215_v51, %v1211_v47  ;;  %v1218_v61 = vld [vmem:[%s4785_s4 + $0x108] sm:$0xff]  ;;  %v1244_v51 = vld [vmem:[%s4785_s4 + $0x1d8] sm:$0xff] }
 0x24f   :  { %v1246_v47 = vld [vmem:[%s4785_s4 + $0x1e8] sm:$0xff] }
 0x250   :  { %3212 = vtanh.f32 %v4049_v1 }
 0x25a   :  { %v3213_v17 = vpop.eup %3212 }
 0x25b   :  { %v898_v21 = vmul.f32 %v3213_v17, %v3211_v12  ;;  %v1222_v12 = vld [vmem:[%s4785_s4 + $0x128] sm:$0xff]  ;;  %v1220_v17 = vld [vmem:[%s4785_s4 + $0x118] sm:$0xff] }
 0x25d   :  { %v906_v30 = vmul.f32 %v4052_v6, %v898_v21  ;;  %v4221_v21 = vpack.c.bf16 %v1222_v12, %v1218_v61  ;;  %v4324_v61 = vpack.c.bf16 %v1239_v29, %v1235_v22  ;;  %v4326_v12 = vpack.c.bf16 %v1246_v47, %v1242_v35 }
 0x25e   :  { %v915_v47 = vmul.f32 %v4052_v6, %v4049_v1 }
 0x25f   :  { %v4059_v33 = vadd.f32 %v913_v28, %v906_v30  ;;  %2505 = vst [vmem:[%s4787_s6 + $0x8] sm:$0xff] %v906_v30  ;;  %v1224_v28 = vld [vmem:[%s4785_s4 + $0x138] sm:$0xff]  ;;  %v1217_v30 = vld [vmem:[%s4785_s4 + $0x100] sm:$0xff] }
 0x260   :  { %v4232_v36 = vpack.c.bf16 %v1224_v28, %v1220_v17  ;;  %v4234_v38 = vpack.c.bf16 %v1221_v34, %v1217_v30  ;;  %v1248_v17 = vld [vmem:[%s4785_s4 + $0x1f8] sm:$0xff]  ;;  %v1241_v28 = vld [vmem:[%s4785_s4 + $0x1c0] sm:$0xff] }
 0x261   :  { %1054 = vmatmul.mubr.f32.vlgmr.msra.gmra.mrb[4].mxu0 %v4059_v33  ;;  %1125 = vmatmul.mubr.f32.vlgmr.msra.gmra.mrb[4].mxu1 %v4059_v33  ;;  %v1245_v30 = vld [vmem:[%s4785_s4 + $0x1e0] sm:$0xff]  ;;  %v4338_v34 = vpack.c.bf16 %v1248_v17, %v1244_v51  ;;  %v916_v17 = vmul.f32 %v4054_v25, %v4002_v18  ;;  %v4374_v18 = vpop.permute.xlu1 %1170 }
 0x262   :  { %1313 = vmatprep.mubr.f32.mxu0 %v3312_v9  ;;  %1384 = vmatprep.mubr.f32.mxu1 %v3312_v9  ;;  %v4347_v46 = vpack.c.bf16 %v1245_v30, %v1241_v28  ;;  %v1173_v25 = vmul.f32 %v4374_v18, %v4059_v33 }
 0x263   :  { %2795 = vmatpush1.bf16.msra.mxu0 %v4090_v49  ;;  %2827 = vmatpush1.bf16.msra.mxu1 %v4099_v55  ;;  %v4366_v42 = vadd.f32 %v916_v17, %v915_v47 }
 0x264   :  { %2797 = vmatprep.subr.bf16.mxu0 %v4113_v0  ;;  %2829 = vmatprep.subr.bf16.mxu1 %v4124_v14 }
 0x267   :  { %2799 = vmatpush1.bf16.msra.mxu0 %v4126_v15  ;;  %2831 = vmatpush1.bf16.msra.mxu1 %v4135_v44 }
 0x268   :  { %2801 = vmatprep.subr.bf16.mxu0 %v4149_v50  ;;  %2833 = vmatprep.subr.bf16.mxu1 %v4160_v63 }
 0x26b   :  { %2803 = vmatpush1.bf16.msra.mxu0 %v4162_v2  ;;  %2835 = vmatpush1.bf16.msra.mxu1 %v4171_v13 }
 0x26c   :  { %2805 = vmatprep.subr.bf16.mxu0 %v4185_v26  ;;  %2837 = vmatprep.subr.bf16.mxu1 %v4196_v39 }
 0x26f   :  { %2807 = vmatpush1.bf16.msra.mxu0 %v4198_v43  ;;  %2839 = vmatpush1.bf16.msra.mxu1 %v4207_v57 }
 0x270   :  { %2809 = vmatprep.subr.bf16.mxu0 %v4221_v21  ;;  %2841 = vmatprep.subr.bf16.mxu1 %v4232_v36 }
 0x273   :  { %2811 = vmatpush1.bf16.msra.mxu0 %v4234_v38  ;;  %2843 = vmatpush1.bf16.msra.mxu1 %v4246_v52 }
 0x274   :  { %2813 = vmatprep.subr.bf16.mxu0 %v4259_v62  ;;  %2845 = vmatprep.subr.bf16.mxu1 %v4261_v3 }
 0x277   :  { %2815 = vmatpush1.bf16.msra.mxu0 %v4273_v41  ;;  %2847 = vmatpush1.bf16.msra.mxu1 %v4286_v53 }
 0x278   :  { %2817 = vmatprep.subr.bf16.mxu0 %v4288_v56  ;;  %2849 = vmatprep.subr.bf16.mxu1 %v4299_v16 }
 0x27b   :  { %2819 = vmatpush1.bf16.msra.mxu0 %v4311_v32  ;;  %2851 = vmatpush1.bf16.msra.mxu1 %v4324_v61 }
 0x27c   :  { %2821 = vmatprep.subr.bf16.mxu0 %v4326_v12  ;;  %2853 = vmatprep.subr.bf16.mxu1 %v4338_v34 }
 0x27f   :  { %2823 = vmatpush1.bf16.msra.mxu0 %v4347_v46  ;;  %2855 = vmatpush1.bf16.msra.mxu1 %v4351_v54 }
 0x280   :  { %2857 = vmatprep.subr.bf16.mxu0 %v4077_v40  ;;  %2889 = vmatprep.subr.bf16.mxu1 %v4088_v48 }
 0x334   :  { %v1055_v58 = vpop.f32.mrb[4].mxu0  ;;  %v1126_v60 = vpop.f32.mrb[4].mxu1 }
 0x335   :  { %v3116_v4 = vadd.f32 %v1055_v58, %v3987_v10  ;;  %v1057_v7 = vpop.f32.mrb[5].mxu0  ;;  %v1128_v20 = vpop.f32.mrb[5].mxu1  ;;  %v3132_v8 = vadd.f32 %v1126_v60, %v3996_v37 }
 0x336   :  { %v3117_v23 = vadd.f32 %v1057_v7, %v3989_v11  ;;  %v3133_v59 = vadd.f32 %v1128_v20, %v3993_v31 }
 0x337   :  { %v2506_v24 = vmul.f32 -1.442695, %v3116_v4 }
 0x338   :  { %v2507_v27 = vmul.f32 -1.442695, %v3117_v23  ;;  %v2508_v5 = vmul.f32 -1.442695, %v3133_v59  ;;  %v4372_v23 = vpop.permute.xlu0 %1163 }
 0x339   :  { %3214 = vpow2.f32 %v2506_v24 }
 0x33a   :  { %3216 = vpow2.f32 %v2507_v27 }
 0x33b   :  { %3218 = vpow2.f32 %v2508_v5 }
 0x33c   :  { %3220 = vtanh.f32 %v3132_v8 }
 0x343   :  { %v3215_v19 = vpop.eup %3214 }
 0x344   :  { %v3217_v22 = vpop.eup %3216  ;;  %v1138_v29 = vadd.f32 1.0, %v3215_v19 }
 0x345   :  { %v1144_v35 = vadd.f32 1.0, %v3217_v22  ;;  %v3219_v51 = vpop.eup %3218 }
 0x346   :  { %3222 = vrcp.f32 %v1138_v29  ;;  %v3221_v28 = vpop.eup %3220  ;;  %v1151_v60 = vadd.f32 1.0, %v3219_v51 }
 0x347   :  { %3224 = vrcp.f32 %v1144_v35 }
 0x348   :  { %3226 = vrcp.f32 %v1151_v60 }
 0x350   :  { %v3223_v30 = vpop.eup %3222 }
 0x351   :  { %v3225_v45 = vpop.eup %3224  ;;  %v1155_v58 = vmul.f32 %v3223_v30, %v3221_v28 }
 0x352   :  { %v1154_v4 = vmul.f32 %v3225_v45, %v4366_v42  ;;  %v3227_v20 = vpop.eup %3226 }
 0x354   :  { %v4369_v7 = vadd.f32 %v1155_v58, %v1154_v4 }
 0x356   :  { %3228 = vtanh.f32 %v4369_v7  ;;  %v1175_v60 = vmul.f32 %v4372_v23, %v4369_v7 }
 0x360   :  { %v3229_v1 = vpop.eup %3228 }
 0x361   :  { %v1158_v6 = vmul.f32 %v3229_v1, %v3227_v20  ;;  %v1176_v20 = vmul.f32 %v4374_v18, %v4366_v42  ;;  %v4436_v42 = vpop.permute.xlu1 %1430 }
 0x363   :  { %v1166_v24 = vmul.f32 %v4372_v23, %v1158_v6 }
 0x365   :  { %v4379_v27 = vadd.f32 %v1173_v25, %v1166_v24  ;;  %2510 = vst [vmem:[%s4787_s6 + $0x10] sm:$0xff] %v1166_v24  ;;  %v4428_v25 = vadd.f32 %v1176_v20, %v1175_v60 }
 0x367   :  { %1314 = vmatmul.mubr.f32.vlgmr.msra.gmra.mrb[6].mxu0 %v4379_v27  ;;  %1385 = vmatmul.mubr.f32.vlgmr.msra.gmra.mrb[6].mxu1 %v4379_v27 }
 0x368   :  { %2859 = vmatpush1.bf16.msra.mxu0 %v4090_v49  ;;  %2891 = vmatpush1.bf16.msra.mxu1 %v4099_v55 }
 0x369   :  { %2861 = vmatprep.subr.bf16.mxu0 %v4113_v0  ;;  %2893 = vmatprep.subr.bf16.mxu1 %v4124_v14 }
 0x36a   :  { %1573 = vmatprep.mubr.f32.mxu0 %v3312_v9  ;;  %1644 = vmatprep.mubr.f32.mxu1 %v3312_v9 }
 0x36c   :  { %2863 = vmatpush1.bf16.msra.mxu0 %v4126_v15  ;;  %2895 = vmatpush1.bf16.msra.mxu1 %v4135_v44 }
 0x36d   :  { %2865 = vmatprep.subr.bf16.mxu0 %v4149_v50  ;;  %2897 = vmatprep.subr.bf16.mxu1 %v4160_v63 }
 0x370   :  { %2867 = vmatpush1.bf16.msra.mxu0 %v4162_v2  ;;  %2899 = vmatpush1.bf16.msra.mxu1 %v4171_v13 }
 0x371   :  { %2869 = vmatprep.subr.bf16.mxu0 %v4185_v26  ;;  %2901 = vmatprep.subr.bf16.mxu1 %v4196_v39 }
 0x374   :  { %2871 = vmatpush1.bf16.msra.mxu0 %v4198_v43  ;;  %2903 = vmatpush1.bf16.msra.mxu1 %v4207_v57 }
 0x375   :  { %2873 = vmatprep.subr.bf16.mxu0 %v4221_v21  ;;  %2905 = vmatprep.subr.bf16.mxu1 %v4232_v36 }
 0x378   :  { %2875 = vmatpush1.bf16.msra.mxu0 %v4234_v38  ;;  %2907 = vmatpush1.bf16.msra.mxu1 %v4246_v52 }
 0x379   :  { %2877 = vmatprep.subr.bf16.mxu0 %v4259_v62  ;;  %2909 = vmatprep.subr.bf16.mxu1 %v4261_v3 }
 0x37c   :  { %2879 = vmatpush1.bf16.msra.mxu0 %v4273_v41  ;;  %2911 = vmatpush1.bf16.msra.mxu1 %v4286_v53 }
 0x37d   :  { %2881 = vmatprep.subr.bf16.mxu0 %v4288_v56  ;;  %2913 = vmatprep.subr.bf16.mxu1 %v4299_v16 }
 0x380   :  { %2883 = vmatpush1.bf16.msra.mxu0 %v4311_v32  ;;  %2915 = vmatpush1.bf16.msra.mxu1 %v4324_v61 }
 0x381   :  { %2885 = vmatprep.subr.bf16.mxu0 %v4326_v12  ;;  %2917 = vmatprep.subr.bf16.mxu1 %v4338_v34 }
 0x384   :  { %2887 = vmatpush1.bf16.msra.mxu0 %v4347_v46  ;;  %2919 = vmatpush1.bf16.msra.mxu1 %v4351_v54 }
 0x385   :  { %2921 = vmatprep.subr.bf16.mxu0 %v4077_v40  ;;  %2953 = vmatprep.subr.bf16.mxu1 %v4088_v48 }
 0x43a   :  { %v1315_v33 = vpop.f32.mrb[6].mxu0  ;;  %v1386_v59 = vpop.f32.mrb[6].mxu1 }
 0x43b   :  { %v3118_v5 = vadd.f32 %v1315_v33, %v3987_v10  ;;  %v1317_v8 = vpop.f32.mrb[7].mxu0  ;;  %v1388_v19 = vpop.f32.mrb[7].mxu1  ;;  %v3134_v17 = vadd.f32 %v1386_v59, %v3996_v37 }
 0x43c   :  { %v3119_v22 = vadd.f32 %v1317_v8, %v3989_v11  ;;  %v3135_v47 = vadd.f32 %v1388_v19, %v3993_v31 }
 0x43d   :  { %v2511_v29 = vmul.f32 -1.442695, %v3118_v5 }
 0x43e   :  { %v2512_v35 = vmul.f32 -1.442695, %v3119_v22  ;;  %v2513_v51 = vmul.f32 -1.442695, %v3135_v47  ;;  %v4434_v22 = vpop.permute.xlu0 %1423 }
 0x43f   :  { %3230 = vpow2.f32 %v2511_v29  ;;  %v1433_v29 = vmul.f32 %v4436_v42, %v4379_v27 }
 0x440   :  { %3232 = vpow2.f32 %v2512_v35 }
 0x441   :  { %3234 = vpow2.f32 %v2513_v51 }
 0x442   :  { %3236 = vtanh.f32 %v3134_v17 }
 0x449   :  { %v3231_v28 = vpop.eup %3230 }
 0x44a   :  { %v3233_v30 = vpop.eup %3232  ;;  %v1398_v45 = vadd.f32 1.0, %v3231_v28 }
 0x44b   :  { %v1404_v58 = vadd.f32 1.0, %v3233_v30  ;;  %v3235_v4 = vpop.eup %3234 }
 0x44c   :  { %3238 = vrcp.f32 %v1398_v45  ;;  %v3237_v1 = vpop.eup %3236  ;;  %v1411_v59 = vadd.f32 1.0, %v3235_v4 }
 0x44d   :  { %3240 = vrcp.f32 %v1404_v58 }
 0x44e   :  { %3242 = vrcp.f32 %v1411_v59  ;;  %v1436_v59 = vmul.f32 %v4436_v42, %v4428_v25 }
 0x456   :  { %v3239_v6 = vpop.eup %3238 }
 0x457   :  { %v3241_v24 = vpop.eup %3240  ;;  %v1415_v33 = vmul.f32 %v3239_v6, %v3237_v1 }
 0x458   :  { %v1414_v5 = vmul.f32 %v3241_v24, %v4428_v25  ;;  %v3243_v19 = vpop.eup %3242 }
 0x45a   :  { %v4431_v8 = vadd.f32 %v1415_v33, %v1414_v5 }
 0x45c   :  { %3244 = vtanh.f32 %v4431_v8  ;;  %v1435_v24 = vmul.f32 %v4434_v22, %v4431_v8 }
 0x466   :  { %v3245_v7 = vpop.eup %3244 }
 0x467   :  { %v1418_v23 = vmul.f32 %v3245_v7, %v3243_v19  ;;  %v4490_v7 = vadd.f32 %v1436_v59, %v1435_v24  ;;  %v2227_v59 = vld [vmem:[%s4785_s4 + $0x10] sm:$0xff] }
 0x469   :  { %v1426_v18 = vmul.f32 %v4434_v22, %v1418_v23 }
 0x46b   :  { %v4441_v35 = vadd.f32 %v1433_v29, %v1426_v18  ;;  %2515 = vst [vmem:[%s4787_s6 + $0x18] sm:$0xff] %v1426_v18 }
 0x46d   :  { %1574 = vmatmul.mubr.f32.vlgmr.msra.gmra.mrb[8].mxu0 %v4441_v35  ;;  %1645 = vmatmul.mubr.f32.vlgmr.msra.gmra.mrb[8].mxu1 %v4441_v35 }
 0x46e   :  { %2923 = vmatpush1.bf16.msra.mxu0 %v4090_v49  ;;  %2955 = vmatpush1.bf16.msra.mxu1 %v4099_v55 }
 0x46f   :  { %2925 = vmatprep.subr.bf16.mxu0 %v4113_v0  ;;  %2957 = vmatprep.subr.bf16.mxu1 %v4124_v14 }
 0x470   :  { %1833 = vmatprep.mubr.f32.mxu0 %v3312_v9  ;;  %1904 = vmatprep.mubr.f32.mxu1 %v3312_v9 }
 0x472   :  { %2927 = vmatpush1.bf16.msra.mxu0 %v4126_v15  ;;  %2959 = vmatpush1.bf16.msra.mxu1 %v4135_v44 }
 0x473   :  { %2929 = vmatprep.subr.bf16.mxu0 %v4149_v50  ;;  %2961 = vmatprep.subr.bf16.mxu1 %v4160_v63 }
 0x476   :  { %2931 = vmatpush1.bf16.msra.mxu0 %v4162_v2  ;;  %2963 = vmatpush1.bf16.msra.mxu1 %v4171_v13 }
 0x477   :  { %2933 = vmatprep.subr.bf16.mxu0 %v4185_v26  ;;  %2965 = vmatprep.subr.bf16.mxu1 %v4196_v39 }
 0x47a   :  { %2935 = vmatpush1.bf16.msra.mxu0 %v4198_v43  ;;  %2967 = vmatpush1.bf16.msra.mxu1 %v4207_v57 }
 0x47b   :  { %2937 = vmatprep.subr.bf16.mxu0 %v4221_v21  ;;  %2969 = vmatprep.subr.bf16.mxu1 %v4232_v36 }
 0x47e   :  { %2939 = vmatpush1.bf16.msra.mxu0 %v4234_v38  ;;  %2971 = vmatpush1.bf16.msra.mxu1 %v4246_v52 }
 0x47f   :  { %2941 = vmatprep.subr.bf16.mxu0 %v4259_v62  ;;  %2973 = vmatprep.subr.bf16.mxu1 %v4261_v3 }
 0x482   :  { %2943 = vmatpush1.bf16.msra.mxu0 %v4273_v41  ;;  %2975 = vmatpush1.bf16.msra.mxu1 %v4286_v53 }
 0x483   :  { %2945 = vmatprep.subr.bf16.mxu0 %v4288_v56  ;;  %2977 = vmatprep.subr.bf16.mxu1 %v4299_v16 }
 0x486   :  { %2947 = vmatpush1.bf16.msra.mxu0 %v4311_v32  ;;  %2979 = vmatpush1.bf16.msra.mxu1 %v4324_v61 }
 0x487   :  { %2949 = vmatprep.subr.bf16.mxu0 %v4326_v12  ;;  %2981 = vmatprep.subr.bf16.mxu1 %v4338_v34 }
 0x48a   :  { %2951 = vmatpush1.bf16.msra.mxu0 %v4347_v46  ;;  %2983 = vmatpush1.bf16.msra.mxu1 %v4351_v54 }
 0x48b   :  { %2985 = vmatprep.subr.bf16.mxu0 %v4077_v40  ;;  %3017 = vmatprep.subr.bf16.mxu1 %v4088_v48 }
 0x540   :  { %v1575_v27 = vpop.f32.mrb[8].mxu0  ;;  %v1646_v47 = vpop.f32.mrb[8].mxu1 }
 0x541   :  { %v3120_v51 = vadd.f32 %v1575_v27, %v3987_v10  ;;  %v1577_v17 = vpop.f32.mrb[9].mxu0  ;;  %v1648_v28 = vpop.f32.mrb[9].mxu1  ;;  %v3136_v20 = vadd.f32 %v1646_v47, %v3996_v37 }
 0x542   :  { %v3121_v30 = vadd.f32 %v1577_v17, %v3989_v11  ;;  %v3137_v60 = vadd.f32 %v1648_v28, %v3993_v31  ;;  %v1684_v17 = vpop.permute.xlu0 %1683  ;;  %v1691_v28 = vpop.permute.xlu1 %1690 }
 0x543   :  { %v2516_v45 = vmul.f32 -1.442695, %v3120_v51  ;;  %v1693_v42 = vmul.f32 %v1691_v28, %v4441_v35 }
 0x544   :  { %v2517_v58 = vmul.f32 -1.442695, %v3121_v30  ;;  %v2518_v4 = vmul.f32 -1.442695, %v3137_v60 }
 0x545   :  { %3246 = vpow2.f32 %v2516_v45 }
 0x546   :  { %3248 = vpow2.f32 %v2517_v58  ;;  %v4550_v35 = vpop.permute.xlu1 %1950 }
 0x547   :  { %3250 = vpow2.f32 %v2518_v4  ;;  %v2226_v4 = vld [vmem:[%s4785_s4 + $0x8] sm:$0xff] }
 0x548   :  { %3252 = vtanh.f32 %v3136_v20  ;;  %v2230_v20 = vld [vmem:[%s4785_s4 + $0x28] sm:$0xff] }
 0x54f   :  { %v3247_v40 = vpop.eup %3246 }
 0x550   :  { %v3249_v1 = vpop.eup %3248  ;;  %v1658_v48 = vadd.f32 1.0, %v3247_v40  ;;  %v2228_v40 = vld [vmem:[%s4785_s4 + $0x18] sm:$0xff] }
 0x551   :  { %v1664_v6 = vadd.f32 1.0, %v3249_v1  ;;  %v3251_v33 = vpop.eup %3250  ;;  %v3048_v1 = vpack.c.bf16 %v2230_v20, %v2226_v4 }
 0x552   :  { %3254 = vrcp.f32 %v1658_v48  ;;  %v3253_v5 = vpop.eup %3252  ;;  %v1671_v29 = vadd.f32 1.0, %v3251_v33  ;;  %v2232_v48 = vld [vmem:[%s4785_s4 + $0x38] sm:$0xff] }
 0x553   :  { %3256 = vrcp.f32 %v1664_v6  ;;  %v2229_v6 = vld [vmem:[%s4785_s4 + $0x20] sm:$0xff]  ;;  %v3080_v24 = vpack.c.bf16 %v2232_v48, %v2228_v40  ;;  %v2259_v40 = vld [vmem:[%s4785_s4 + $0x110] sm:$0xff]  ;;  %v2266_v48 = vld [vmem:[%s4785_s4 + $0x148] sm:$0xff] }
 0x554   :  { %3258 = vrcp.f32 %v1671_v29 }
 0x55c   :  { %v3255_v19 = vpop.eup %3254 }
 0x55d   :  { %v3257_v23 = vpop.eup %3256  ;;  %v1675_v18 = vmul.f32 %v3255_v19, %v3253_v5  ;;  %v2231_v5 = vld [vmem:[%s4785_s4 + $0x30] sm:$0xff] }
 0x55e   :  { %v1674_v27 = vmul.f32 %v3257_v23, %v4490_v7  ;;  %v3259_v51 = vpop.eup %3258  ;;  %v3082_v19 = vpack.c.bf16 %v2231_v5, %v2227_v59  ;;  %v2238_v23 = vld [vmem:[%s4785_s4 + $0x68] sm:$0xff] }
 0x560   :  { %v4493_v47 = vadd.f32 %v1675_v18, %v1674_v27  ;;  %v2236_v18 = vld [vmem:[%s4785_s4 + $0x58] sm:$0xff] }
 0x561   :  { %v2240_v27 = vld [vmem:[%s4785_s4 + $0x78] sm:$0xff] }
 0x562   :  { %3260 = vtanh.f32 %v4493_v47 }
 0x56c   :  { %v3261_v8 = vpop.eup %3260 }
 0x56d   :  { %v1678_v22 = vmul.f32 %v3261_v8, %v3259_v51  ;;  %v2237_v51 = vld [vmem:[%s4785_s4 + $0x60] sm:$0xff]  ;;  %v3084_v8 = vpack.c.bf16 %v2240_v27, %v2236_v18  ;;  %v2274_v27 = vld [vmem:[%s4785_s4 + $0x188] sm:$0xff] }
 0x56f   :  { %v1686_v25 = vmul.f32 %v1684_v17, %v1678_v22 }
 0x571   :  { %v4497_v30 = vadd.f32 %v1693_v42, %v1686_v25  ;;  %2520 = vst [vmem:[%s4787_s6 + $0x20] sm:$0xff] %v1686_v25  ;;  %v2242_v42 = vld [vmem:[%s4785_s4 + $0x88] sm:$0xff] }
 0x573   :  { %1834 = vmatmul.mubr.f32.vlgmr.msra.gmra.mrb[10].mxu0 %v4497_v30  ;;  %1905 = vmatmul.mubr.f32.vlgmr.msra.gmra.mrb[10].mxu1 %v4497_v30  ;;  %v1953_v58 = vmul.f32 %v4550_v35, %v4497_v30  ;;  %v2246_v30 = vld [vmem:[%s4785_s4 + $0xa8] sm:$0xff] }
 0x574   :  { %2987 = vmatpush1.bf16.msra.mxu0 %v4090_v49  ;;  %3019 = vmatpush1.bf16.msra.mxu1 %v4099_v55 }
 0x575   :  { %2989 = vmatprep.subr.bf16.mxu0 %v4113_v0  ;;  %3021 = vmatprep.subr.bf16.mxu1 %v4124_v14 }
 0x576   :  { %2093 = vmatprep.mubr.f32.mxu0 %v3312_v9  ;;  %2164 = vmatprep.mubr.f32.mxu1 %v3312_v9 }
 0x578   :  { %2991 = vmatpush1.bf16.msra.mxu0 %v4126_v15  ;;  %3023 = vmatpush1.bf16.msra.mxu1 %v4135_v44 }
 0x579   :  { %2993 = vmatprep.subr.bf16.mxu0 %v4149_v50  ;;  %3025 = vmatprep.subr.bf16.mxu1 %v4160_v63 }
 0x57c   :  { %2995 = vmatpush1.bf16.msra.mxu0 %v4162_v2  ;;  %3027 = vmatpush1.bf16.msra.mxu1 %v4171_v13 }
 0x57d   :  { %2997 = vmatprep.subr.bf16.mxu0 %v4185_v26  ;;  %3029 = vmatprep.subr.bf16.mxu1 %v4196_v39 }
 0x580   :  { %2999 = vmatpush1.bf16.msra.mxu0 %v4198_v43  ;;  %3031 = vmatpush1.bf16.msra.mxu1 %v4207_v57 }
 0x581   :  { %3001 = vmatprep.subr.bf16.mxu0 %v4221_v21  ;;  %3033 = vmatprep.subr.bf16.mxu1 %v4232_v36  ;;  %v1695_v36 = vmul.f32 %v1684_v17, %v4493_v47  ;;  %v2233_v47 = vld [vmem:[%s4785_s4 + $0x40] sm:$0xff]  ;;  %v2235_v17 = vld [vmem:[%s4785_s4 + $0x50] sm:$0xff] }
 0x582   :  { %v3054_v22 = vpack.c.bf16 %v2237_v51, %v2233_v47  ;;  %v2278_v47 = vld [vmem:[%s4785_s4 + $0x1a8] sm:$0xff] }
 0x584   :  { %3003 = vmatpush1.bf16.msra.mxu0 %v4234_v38  ;;  %3035 = vmatpush1.bf16.msra.mxu1 %v4246_v52  ;;  %v1696_v52 = vmul.f32 %v1691_v28, %v4490_v7  ;;  %v2234_v7 = vld [vmem:[%s4785_s4 + $0x48] sm:$0xff]  ;;  %v2239_v28 = vld [vmem:[%s4785_s4 + $0x70] sm:$0xff] }
 0x585   :  { %3005 = vmatprep.subr.bf16.mxu0 %v4259_v62  ;;  %3037 = vmatprep.subr.bf16.mxu1 %v4261_v3  ;;  %v3052_v29 = vpack.c.bf16 %v2238_v23, %v2234_v7  ;;  %v3086_v25 = vpack.c.bf16 %v2239_v28, %v2235_v17  ;;  %v2269_v7 = vld [vmem:[%s4785_s4 + $0x160] sm:$0xff]  ;;  %v2267_v23 = vld [vmem:[%s4785_s4 + $0x150] sm:$0xff]  ;;  %v2280_v17 = vld [vmem:[%s4785_s4 + $0x1b8] sm:$0xff] }
 0x586   :  { %v2273_v28 = vld [vmem:[%s4785_s4 + $0x180] sm:$0xff] }
 0x588   :  { %3007 = vmatpush1.bf16.msra.mxu0 %v4273_v41  ;;  %3039 = vmatpush1.bf16.msra.mxu1 %v4286_v53  ;;  %v4542_v41 = vadd.f32 %v1696_v52, %v1695_v36  ;;  %v2249_v36 = vld [vmem:[%s4785_s4 + $0xc0] sm:$0xff] }
 0x589   :  { %3009 = vmatprep.subr.bf16.mxu0 %v4288_v56  ;;  %3041 = vmatprep.subr.bf16.mxu1 %v4299_v16 }
 0x58c   :  { %3011 = vmatpush1.bf16.msra.mxu0 %v4311_v32  ;;  %3043 = vmatpush1.bf16.msra.mxu1 %v4324_v61 }
 0x58d   :  { %3013 = vmatprep.subr.bf16.mxu0 %v4326_v12  ;;  %3045 = vmatprep.subr.bf16.mxu1 %v4338_v34 }
 0x590   :  { %3015 = vmatpush1.bf16.msra.mxu0 %v4347_v46  ;;  %3047 = vmatpush1.bf16.msra.mxu1 %v4351_v54  ;;  %v4548_v54 = vpop.permute.xlu0 %1943 }
 0x591   :  { %3049 = vmatprep.subr.bf16.mxu0 %v3048_v1  ;;  %3081 = vmatprep.subr.bf16.mxu1 %v3080_v24  ;;  %v2263_v1 = vld [vmem:[%s4785_s4 + $0x130] sm:$0xff]  ;;  %v2268_v24 = vld [vmem:[%s4785_s4 + $0x158] sm:$0xff] }
 0x646   :  { %v1835_v49 = vpop.f32.mrb[10].mxu0  ;;  %v1906_v55 = vpop.f32.mrb[10].mxu1 }
 0x647   :  { %v3122_v0 = vadd.f32 %v1835_v49, %v3987_v10  ;;  %v1837_v14 = vpop.f32.mrb[11].mxu0  ;;  %v1908_v15 = vpop.f32.mrb[11].mxu1  ;;  %v3138_v26 = vadd.f32 %v1906_v55, %v3996_v37  ;;  %v2244_v49 = vld [vmem:[%s4785_s4 + $0x98] sm:$0xff]  ;;  %v3056_v55 = vpack.c.bf16 %v2246_v30, %v2242_v42  ;;  %v2277_v42 = vld [vmem:[%s4785_s4 + $0x1a0] sm:$0xff]  ;;  %v2275_v30 = vld [vmem:[%s4785_s4 + $0x190] sm:$0xff] }
 0x648   :  { %v3123_v44 = vadd.f32 %v1837_v14, %v3989_v11  ;;  %v3139_v2 = vadd.f32 %v1908_v15, %v3993_v31  ;;  %v2241_v14 = vld [vmem:[%s4785_s4 + $0x80] sm:$0xff] }
 0x649   :  { %v2521_v50 = vmul.f32 -1.442695, %v3122_v0  ;;  %v2248_v0 = vld [vmem:[%s4785_s4 + $0xb8] sm:$0xff]  ;;  %v2245_v15 = vld [vmem:[%s4785_s4 + $0xa0] sm:$0xff] }
 0x64a   :  { %v2522_v63 = vmul.f32 -1.442695, %v3123_v44  ;;  %v2523_v13 = vmul.f32 -1.442695, %v3139_v2  ;;  %v3088_v44 = vpack.c.bf16 %v2248_v0, %v2244_v49  ;;  %v2247_v2 = vld [vmem:[%s4785_s4 + $0xb0] sm:$0xff]  ;;  %v2282_v0 = vld [vmem:[%s4785_s4 + $0x1c8] sm:$0xff] }
 0x64b   :  { %3262 = vpow2.f32 %v2521_v50  ;;  %v3058_v50 = vpack.c.bf16 %v2245_v15, %v2241_v14  ;;  %v2279_v49 = vld [vmem:[%s4785_s4 + $0x1b0] sm:$0xff]  ;;  %v2286_v14 = vld [vmem:[%s4785_s4 + $0x1e8] sm:$0xff]  ;;  %v2284_v15 = vld [vmem:[%s4785_s4 + $0x1d8] sm:$0xff] }
 0x64c   :  { %3264 = vpow2.f32 %v2522_v63  ;;  %v2243_v63 = vld [vmem:[%s4785_s4 + $0x90] sm:$0xff] }
 0x64d   :  { %3266 = vpow2.f32 %v2523_v13  ;;  %v3090_v13 = vpack.c.bf16 %v2247_v2, %v2243_v63  ;;  %v2288_v63 = vld [vmem:[%s4785_s4 + $0x1f8] sm:$0xff]  ;;  %v2281_v2 = vld [vmem:[%s4785_s4 + $0x1c0] sm:$0xff] }
 0x64e   :  { %3268 = vtanh.f32 %v3138_v26  ;;  %v2250_v26 = vld [vmem:[%s4785_s4 + $0xc8] sm:$0xff] }
 0x655   :  { %v3263_v39 = vpop.eup %3262 }
 0x656   :  { %v3265_v43 = vpop.eup %3264  ;;  %v1918_v57 = vadd.f32 1.0, %v3263_v39  ;;  %v2254_v39 = vld [vmem:[%s4785_s4 + $0xe8] sm:$0xff] }
 0x657   :  { %v1924_v21 = vadd.f32 1.0, %v3265_v43  ;;  %v3267_v38 = vpop.eup %3266  ;;  %v2252_v43 = vld [vmem:[%s4785_s4 + $0xd8] sm:$0xff] }
 0x658   :  { %3270 = vrcp.f32 %v1918_v57  ;;  %v3269_v62 = vpop.eup %3268  ;;  %v1931_v16 = vadd.f32 1.0, %v3267_v38  ;;  %v3060_v57 = vpack.c.bf16 %v2254_v39, %v2250_v26  ;;  %v2253_v38 = vld [vmem:[%s4785_s4 + $0xe0] sm:$0xff]  ;;  %v3108_v26 = vpack.c.bf16 %v2288_v63, %v2284_v15  ;;  %v2283_v39 = vld [vmem:[%s4785_s4 + $0x1d0] sm:$0xff] }
 0x659   :  { %3272 = vrcp.f32 %v1924_v21  ;;  %v2256_v21 = vld [vmem:[%s4785_s4 + $0xf8] sm:$0xff] }
 0x65a   :  { %3274 = vrcp.f32 %v1931_v16  ;;  %v3092_v52 = vpack.c.bf16 %v2256_v21, %v2252_v43  ;;  %v2258_v16 = vld [vmem:[%s4785_s4 + $0x108] sm:$0xff]  ;;  %v2287_v43 = vld [vmem:[%s4785_s4 + $0x1f0] sm:$0xff] }
 0x65b   :  { %v3110_v21 = vpack.c.bf16 %v2287_v43, %v2283_v39 }
 0x662   :  { %v3271_v3 = vpop.eup %3270 }
 0x663   :  { %v3273_v53 = vpop.eup %3272  ;;  %v1935_v56 = vmul.f32 %v3271_v3, %v3269_v62  ;;  %v3062_v62 = vpack.c.bf16 %v2253_v38, %v2249_v36  ;;  %v2251_v3 = vld [vmem:[%s4785_s4 + $0xd0] sm:$0xff] }
 0x664   :  { %v1934_v32 = vmul.f32 %v3273_v53, %v4542_v41  ;;  %v3275_v12 = vpop.eup %3274  ;;  %v2255_v53 = vld [vmem:[%s4785_s4 + $0xf0] sm:$0xff] }
 0x666   :  { %v4545_v61 = vadd.f32 %v1935_v56, %v1934_v32  ;;  %v3094_v56 = vpack.c.bf16 %v2255_v53, %v2251_v3  ;;  %v2262_v32 = vld [vmem:[%s4785_s4 + $0x128] sm:$0xff] }
 0x668   :  { %3276 = vtanh.f32 %v4545_v61 }
 0x672   :  { %v3277_v34 = vpop.eup %3276 }
 0x673   :  { %v1938_v46 = vmul.f32 %v3277_v34, %v3275_v12  ;;  %v2260_v12 = vld [vmem:[%s4785_s4 + $0x118] sm:$0xff]  ;;  %v3064_v34 = vpack.c.bf16 %v2262_v32, %v2258_v16 }
 0x675   :  { %v1946_v45 = vmul.f32 %v4548_v54, %v1938_v46  ;;  %v2264_v46 = vld [vmem:[%s4785_s4 + $0x138] sm:$0xff] }
 0x676   :  { %v3096_v4 = vpack.c.bf16 %v2264_v46, %v2260_v12 }
 0x677   :  { %v4555_v60 = vadd.f32 %v1953_v58, %v1946_v45  ;;  %2525 = vst [vmem:[%s4787_s6 + $0x28] sm:$0xff] %v1946_v45  ;;  %v2257_v45 = vld [vmem:[%s4785_s4 + $0x100] sm:$0xff] }
 0x678   :  { %v2261_v58 = vld [vmem:[%s4785_s4 + $0x120] sm:$0xff] }
 0x679   :  { %2094 = vmatmul.mubr.f32.vlgmr.msra.gmra.mrb[12].mxu0 %v4555_v60  ;;  %2165 = vmatmul.mubr.f32.vlgmr.msra.gmra.mrb[12].mxu1 %v4555_v60  ;;  %v3066_v20 = vpack.c.bf16 %v2261_v58, %v2257_v45 }
 0x67a   :  { %2353 = vmatprep.mubr.f32.mxu0 %v3312_v9  ;;  %2424 = vmatprep.mubr.f32.mxu1 %v3312_v9  ;;  %v2225_v9 = vld [vmem:[%s4785_s4] sm:$0xff] }
 0x67b   :  { %v3050_v33 = vpack.c.bf16 %v2229_v6, %v2225_v9  ;;  %3083 = vmatpush1.bf16.msra.mxu1 %v3082_v19  ;;  %v3098_v9 = vpack.c.bf16 %v2263_v1, %v2259_v40  ;;  %v2270_v6 = vld [vmem:[%s4785_s4 + $0x168] sm:$0xff]  ;;  %v2265_v19 = vld [vmem:[%s4785_s4 + $0x140] sm:$0xff]  ;;  %v1956_v1 = vmul.f32 %v4550_v35, %v4542_v41 }
 0x67c   :  { %3085 = vmatprep.subr.bf16.mxu1 %v3084_v8  ;;  %v3068_v59 = vpack.c.bf16 %v2270_v6, %v2266_v48  ;;  %v3070_v18 = vpack.c.bf16 %v2269_v7, %v2265_v19  ;;  %v3072_v8 = vpack.c.bf16 %v2278_v47, %v2274_v27  ;;  %v2211_v27 = vpop.permute.xlu1 %2210 }
 0x67d   :  { %3051 = vmatpush1.bf16.msra.mxu0 %v3050_v33  ;;  %v2272_v33 = vld [vmem:[%s4785_s4 + $0x178] sm:$0xff] }
 0x67e   :  { %3053 = vmatprep.subr.bf16.mxu0 %v3052_v29  ;;  %v3100_v5 = vpack.c.bf16 %v2272_v33, %v2268_v24  ;;  %v2271_v29 = vld [vmem:[%s4785_s4 + $0x170] sm:$0xff] }
 0x67f   :  { %3087 = vmatpush1.bf16.msra.mxu1 %v3086_v25  ;;  %v3102_v51 = vpack.c.bf16 %v2271_v29, %v2267_v23  ;;  %v2204_v29 = vpop.permute.xlu0 %2203 }
 0x680   :  { %3089 = vmatprep.subr.bf16.mxu1 %v3088_v44  ;;  %v3106_v44 = vpack.c.bf16 %v2279_v49, %v2275_v30  ;;  %v2471_v43 = vpop.permute.xlu1 %2470 }
 0x681   :  { %3055 = vmatpush1.bf16.msra.mxu0 %v3054_v22  ;;  %v2276_v22 = vld [vmem:[%s4785_s4 + $0x198] sm:$0xff] }
 0x682   :  { %3057 = vmatprep.subr.bf16.mxu0 %v3056_v55  ;;  %v3104_v25 = vpack.c.bf16 %v2280_v17, %v2276_v22  ;;  %v3074_v55 = vpack.c.bf16 %v2277_v42, %v2273_v28 }
 0x683   :  { %3091 = vmatpush1.bf16.msra.mxu1 %v3090_v13  ;;  %v2285_v13 = vld [vmem:[%s4785_s4 + $0x1e0] sm:$0xff] }
 0x684   :  { %3093 = vmatprep.subr.bf16.mxu1 %v3092_v52 }
 0x685   :  { %3059 = vmatpush1.bf16.msra.mxu0 %v3058_v50  ;;  %v3076_v50 = vpack.c.bf16 %v2286_v14, %v2282_v0 }
 0x686   :  { %3061 = vmatprep.subr.bf16.mxu0 %v3060_v57  ;;  %v3078_v57 = vpack.c.bf16 %v2285_v13, %v2281_v2 }
 0x687   :  { %3095 = vmatpush1.bf16.msra.mxu1 %v3094_v56 }
 0x688   :  { %3097 = vmatprep.subr.bf16.mxu1 %v3096_v4 }
 0x689   :  { %3063 = vmatpush1.bf16.msra.mxu0 %v3062_v62 }
 0x68a   :  { %3065 = vmatprep.subr.bf16.mxu0 %v3064_v34 }
 0x68b   :  { %3099 = vmatpush1.bf16.msra.mxu1 %v3098_v9 }
 0x68c   :  { %3101 = vmatprep.subr.bf16.mxu1 %v3100_v5 }
 0x68d   :  { %3067 = vmatpush1.bf16.msra.mxu0 %v3066_v20  ;;  %v1955_v20 = vmul.f32 %v4548_v54, %v4545_v61  ;;  %v2213_v54 = vmul.f32 %v2211_v27, %v4555_v60 }
 0x68e   :  { %3069 = vmatprep.subr.bf16.mxu0 %v3068_v59 }
 0x68f   :  { %3103 = vmatpush1.bf16.msra.mxu1 %v3102_v51  ;;  %v1957_v6 = vadd.f32 %v1956_v1, %v1955_v20 }
 0x690   :  { %3105 = vmatprep.subr.bf16.mxu1 %v3104_v25 }
 0x691   :  { %3071 = vmatpush1.bf16.msra.mxu0 %v3070_v18 }
 0x692   :  { %3073 = vmatprep.subr.bf16.mxu0 %v3072_v8 }
 0x693   :  { %3107 = vmatpush1.bf16.msra.mxu1 %v3106_v44 }
 0x694   :  { %3109 = vmatprep.subr.bf16.mxu1 %v3108_v26 }
 0x695   :  { %3075 = vmatpush1.bf16.msra.mxu0 %v3074_v55 }
 0x696   :  { %3077 = vmatprep.subr.bf16.mxu0 %v3076_v50 }
 0x697   :  { %3111 = vmatpush1.bf16.msra.mxu1 %v3110_v21 }
 0x699   :  { %3079 = vmatpush1.bf16.msra.mxu0 %v3078_v57 }
 0x74c   :  { %v2095_v36 = vpop.f32.mrb[12].mxu0  ;;  %v2166_v38 = vpop.f32.mrb[12].mxu1 }
 0x74d   :  { %v3124_v52 = vadd.f32 %v2095_v36, %v3987_v10  ;;  %v2097_v62 = vpop.f32.mrb[13].mxu0  ;;  %v2168_v3 = vpop.f32.mrb[13].mxu1  ;;  %v3140_v34 = vadd.f32 %v2166_v38, %v3996_v37 }
 0x74e   :  { %v3125_v53 = vadd.f32 %v2097_v62, %v3989_v11  ;;  %v3141_v32 = vadd.f32 %v2168_v3, %v3993_v31 }
 0x74f   :  { %v2526_v56 = vmul.f32 -1.442695, %v3124_v52 }
 0x750   :  { %v2527_v16 = vmul.f32 -1.442695, %v3125_v53  ;;  %v2528_v12 = vmul.f32 -1.442695, %v3141_v32 }
 0x751   :  { %3278 = vpow2.f32 %v2526_v56 }
 0x752   :  { %3280 = vpow2.f32 %v2527_v16 }
 0x753   :  { %3282 = vpow2.f32 %v2528_v12 }
 0x754   :  { %3284 = vtanh.f32 %v3140_v34 }
 0x75b   :  { %v3279_v46 = vpop.eup %3278 }
 0x75c   :  { %v3281_v45 = vpop.eup %3280  ;;  %v2178_v58 = vadd.f32 1.0, %v3279_v46 }
 0x75d   :  { %v2184_v4 = vadd.f32 1.0, %v3281_v45  ;;  %v3283_v40 = vpop.eup %3282 }
 0x75e   :  { %3286 = vrcp.f32 %v2178_v58  ;;  %v3285_v48 = vpop.eup %3284  ;;  %v2191_v59 = vadd.f32 1.0, %v3283_v40 }
 0x75f   :  { %3288 = vrcp.f32 %v2184_v4 }
 0x760   :  { %3290 = vrcp.f32 %v2191_v59 }
 0x768   :  { %v3287_v9 = vpop.eup %3286 }
 0x769   :  { %v3289_v24 = vpop.eup %3288  ;;  %v2195_v33 = vmul.f32 %v3287_v9, %v3285_v48 }
 0x76a   :  { %v2194_v5 = vmul.f32 %v3289_v24, %v1957_v6  ;;  %v3291_v7 = vpop.eup %3290 }
 0x76c   :  { %v2196_v19 = vadd.f32 %v2195_v33, %v2194_v5 }
 0x76e   :  { %3292 = vtanh.f32 %v2196_v19 }
 0x778   :  { %v3293_v23 = vpop.eup %3292 }
 0x779   :  { %v2198_v18 = vmul.f32 %v3293_v23, %v3291_v7 }
 0x77b   :  { %v2206_v61 = vmul.f32 %v2204_v29, %v2198_v18 }
 0x77d   :  { %v2214_v47 = vadd.f32 %v2213_v54, %v2206_v61  ;;  %2530 = vst [vmem:[%s4787_s6 + $0x30] sm:$0xff] %v2206_v61 }
 0x77f   :  { %2354 = vmatmul.mubr.f32.vlgmr.msra.gmra.mrb[14].mxu0 %v2214_v47  ;;  %2425 = vmatmul.mubr.f32.vlgmr.msra.gmra.mrb[14].mxu1 %v2214_v47  ;;  %v2473_v3 = vmul.f32 %v2471_v43, %v2214_v47 }
 0x852   :  { %v2355_v41 = vpop.f32.mrb[14].mxu0  ;;  %v2426_v35 = vpop.f32.mrb[14].mxu1 }
 0x853   :  { %v3126_v51 = vadd.f32 %v2355_v41, %v3987_v10  ;;  %v2357_v8 = vpop.f32.mrb[15].mxu0  ;;  %v2428_v22 = vpop.f32.mrb[15].mxu1  ;;  %v3142_v30 = vadd.f32 %v2426_v35, %v3996_v37  ;;  %v2215_v10 = vmul.f32 %v2204_v29, %v2196_v19 }
 0x854   :  { %v3127_v17 = vadd.f32 %v2357_v8, %v3989_v11  ;;  %v3143_v60 = vadd.f32 %v2428_v22, %v3993_v31  ;;  %v2216_v11 = vmul.f32 %v2211_v27, %v1957_v6  ;;  %v2464_v37 = vpop.permute.xlu0 %2463 }
 0x855   :  { %v2531_v28 = vmul.f32 -1.442695, %v3126_v51 }
 0x856   :  { %v2532_v25 = vmul.f32 -1.442695, %v3127_v17  ;;  %v2533_v42 = vmul.f32 -1.442695, %v3143_v60  ;;  %v2217_v63 = vadd.f32 %v2216_v11, %v2215_v10 }
 0x857   :  { %3294 = vpow2.f32 %v2531_v28 }
 0x858   :  { %3296 = vpow2.f32 %v2532_v25  ;;  %v2476_v21 = vmul.f32 %v2471_v43, %v2217_v63 }
 0x859   :  { %3298 = vpow2.f32 %v2533_v42 }
 0x85a   :  { %3300 = vtanh.f32 %v3142_v30 }
 0x861   :  { %v3295_v49 = vpop.eup %3294 }
 0x862   :  { %v3297_v55 = vpop.eup %3296  ;;  %v2438_v0 = vadd.f32 1.0, %v3295_v49 }
 0x863   :  { %v2444_v14 = vadd.f32 1.0, %v3297_v55  ;;  %v3299_v15 = vpop.eup %3298 }
 0x864   :  { %3302 = vrcp.f32 %v2438_v0  ;;  %v3301_v44 = vpop.eup %3300  ;;  %v2451_v31 = vadd.f32 1.0, %v3299_v15 }
 0x865   :  { %3304 = vrcp.f32 %v2444_v14 }
 0x866   :  { %3306 = vrcp.f32 %v2451_v31 }
 0x86e   :  { %v3303_v50 = vpop.eup %3302 }
 0x86f   :  { %v3305_v2 = vpop.eup %3304  ;;  %v2455_v13 = vmul.f32 %v3303_v50, %v3301_v44 }
 0x870   :  { %v2454_v26 = vmul.f32 %v3305_v2, %v2217_v63  ;;  %v3307_v38 = vpop.eup %3306 }
 0x872   :  { %v2456_v39 = vadd.f32 %v2455_v13, %v2454_v26 }
 0x874   :  { %3308 = vtanh.f32 %v2456_v39  ;;  %v2475_v57 = vmul.f32 %v2464_v37, %v2456_v39 }
 0x876   :  { %v2477_v36 = vadd.f32 %v2476_v21, %v2475_v57 }
 0x878   :  { %2481 = vst [vmem:[%s4789_s8] sm:$0xff] %v2477_v36 }
 0x87e   :  { %v3309_v52 = vpop.eup %3308 }
 0x87f   :  { %v2458_v62 = vmul.f32 %v3309_v52, %v3307_v38 }
 0x881   :  { %v2466_v53 = vmul.f32 %v2464_v37, %v2458_v62 }
 0x883   :  { %v2474_v56 = vadd.f32 %v2473_v3, %v2466_v53  ;;  %2535 = vst [vmem:[%s4787_s6 + $0x38] sm:$0xff] %v2466_v53 }
 0x885   :  { %2480 = vst [vmem:[%s4788_s7] sm:$0xff] %v2474_v56 }
 0x886 PF:  {}

// kernel: encoder_forward.2
= control target key start
LH: loop header
LB: loop body
LE: loop exit
PB: predicated region body
PF: predicated region fallthrough
CT: control target
= control target key end

     0   :  { %s4259_s0 = inlined_call_operand.<no memory space> [shape: s32[1], index: 0, kind: input, shape index: {}]   ;;  %s4260_s1 = inlined_call_operand.vmem [shape: f32[8,8,128], index: 1, kind: input, shape index: {}]   ;;  %s4261_s2 = inlined_call_operand.vmem [shape: f32[8,8,1], index: 2, kind: input, shape index: {}]   ;;  %s4262_s3 = inlined_call_operand.vmem [shape: f32[128,512], index: 3, kind: input, shape index: {}]   ;;  %s4263_s4 = inlined_call_operand.hbm [shape: f32[128,512], index: 4, kind: input, shape index: {}]   ;;  %s4264_s5 = inlined_call_operand.vmem [shape: f32[1,512], index: 5, kind: input, shape index: {}]   ;;  %s4265_s6 = inlined_call_operand.vmem [shape: f32[8,8,128], index: 6, kind: output, shape index: {0}]   ;;  %s4266_s7 = inlined_call_operand.vmem [shape: f32[8,128], index: 7, kind: output, shape index: {1}]   ;;  %s4267_s8 = inlined_call_operand.vmem [shape: f32[8,128], index: 8, kind: output, shape index: {2}]  }
   0x1   :  { %14 = sst [smem:[#allocation4]] %s4259_s0 }
   0x2   :  { %15 = vsyncpa [#allocation6], 0  ;;  %s3352_s29 = smov [#allocation5]   ;;  %s3328_s11 = scalar_lea.hbm %s4263_s4, 8192 }
   0x3   :  { %s27_s30 = sshll.u32 %s3352_s29, 4  ;;  %p3329_p0 = scmp.ne.s32.totalorder %s4263_s4, %s3328_s11  ;;  %s28_s30 = int_to_ptr.vmem [resolvable:$true] %s27_s30 }
   0x4   :  { %p3332_p1 = scmp.lt.u32.totalorder %s3328_s11, %s4263_s4 }
   0x6   :  { %p3334_p2 = pnand %p3332_p1, %p3329_p0 }
   0x8   :  { %3337 = shalt.err (!%p3334_p2)
}
   0x9   :  { %s3338_s16 = scalar_lea.vmem %s28_s30, 8192  ;;  %p3343_p4 = scmp.lt.s32.totalorder %s28_s30, %s28_s30 }
   0xa   :  { %p3339_p3 = scmp.ne.s32.totalorder %s28_s30, %s3338_s16  ;;  %p3344_p5 = scmp.lt.s32.totalorder %s3338_s16, %s3338_s16 }
   0xc   :  { %p3345_p6 = por %p3344_p5, %p3343_p4 }
   0xe   :  { %p3346_p7 = pnand %p3345_p6, %p3339_p3 }
  0x10   :  { %3349 = shalt.err (!%p3346_p7)
}
  0x11   :  { %s3353_s0 = smov 512   ;;  %s3354_s17 = smov 32  }
  0x12   :  { %33 = dma.hbm_to_vmem [thread:$0]  %s4263_s4, 8192, %s28_s30, [#allocation6], %s3353_s0, %s3353_s0, %s3354_s17  }
  0x13   :  { %3350 = dma.done.wait [#allocation6], 8192  }
  0x14   :  { %3351 = vsyncadd [#allocation6], 4294959104  ;;  %s45_s20 = sld [smem:[#allocation4]]  ;;  %v3355_v0 = vmov 0.0  }
  0x15   :  { %43 = vst [vmem:[%s4266_s7] sm:$0xff] %v3355_v0  ;;  %44 = vst [vmem:[%s4267_s8] sm:$0xff] %v3355_v0 }
  0x1a   :  { %p2510_p8 = scmp.gt.s32.totalorder %s45_s20, 0 }
  0x1b   :  { %v3356_v1 = vmov (!%p2510_p8), 0.0  }
  0x1c   :  { %49 = sbr.rel (%p2510_p8) target bundleno = 35 (0x23), region = 33  ;;  %50 = vst [vmem:[%s4265_s6] sm:$0xff] (!%p2510_p8), %v3356_v1  ;;  %51 = vst [vmem:[%s4265_s6 + $0x8] sm:$0xff] (!%p2510_p8), %v3356_v1 }
  0x1d   :  { %52 = vst [vmem:[%s4265_s6 + $0x10] sm:$0xff] (!%p2510_p8), %v3356_v1  ;;  %53 = vst [vmem:[%s4265_s6 + $0x18] sm:$0xff] (!%p2510_p8), %v3356_v1 }
  0x1e   :  { %54 = vst [vmem:[%s4265_s6 + $0x20] sm:$0xff] (!%p2510_p8), %v3356_v1  ;;  %55 = vst [vmem:[%s4265_s6 + $0x28] sm:$0xff] (!%p2510_p8), %v3356_v1 }
  0x1f   :  { %56 = vst [vmem:[%s4265_s6 + $0x30] sm:$0xff] (!%p2510_p8), %v3356_v1  ;;  %57 = vst [vmem:[%s4265_s6 + $0x38] sm:$0xff] (!%p2510_p8), %v3356_v1 }
  0x23 PF:  { %s58_s17 = sld [smem:[#allocation4]] }
  0x29   :  { %p2512_p9 = scmp.le.s32.totalorder %s58_s17, 0 }
  0x2a   :  { %v72_v2 = vld [vmem:[%s4262_s3 + $0x8] sm:$0xff] (!%p2512_p9)  ;;  %v74_v4 = vld [vmem:[%s4262_s3 + $0x18] sm:$0xff] (!%p2512_p9)  ;;  %v71_v7 = vld [vmem:[%s4262_s3] sm:$0xff] (!%p2512_p9)  ;;  %v3357_v9 = vmov (!%p2512_p9), 0.0   ;;  %v3358_v15 = vmov (!%p2512_p9), 0  }
  0x2b   :  { %62 = sbr.rel (%p2512_p9) target bundleno = 2207 (0x89f), region = 37  ;;  %v76_v3 = vld [vmem:[%s4262_s3 + $0x28] sm:$0xff] (!%p2512_p9)  ;;  %v78_v6 = vld [vmem:[%s4262_s3 + $0x38] sm:$0xff] (!%p2512_p9)  ;;  %v75_v8 = vld [vmem:[%s4262_s3 + $0x20] sm:$0xff] (!%p2512_p9)  ;;  %221 = vmatprep.mubr.f32.mxu0 (!%p2512_p9), %v3357_v9  ;;  %334 = vmatprep.mubr.f32.mxu1 (!%p2512_p9), %v3357_v9 }
  0x2c   :  { %v2551_v5 = vpack.c.bf16 (!%p2512_p9), %v76_v3, %v72_v2  ;;  %v2583_v10 = vpack.c.bf16 (!%p2512_p9), %v78_v6, %v74_v4  ;;  %v2553_v11 = vpack.c.bf16 (!%p2512_p9), %v75_v8, %v71_v7  ;;  %v73_v12 = vld [vmem:[%s4262_s3 + $0x10] sm:$0xff] (!%p2512_p9)  ;;  %v80_v14 = vld [vmem:[%s4262_s3 + $0x48] sm:$0xff] (!%p2512_p9)  ;;  %3198 = vset.pattern.permute.xlu0 (!%p2512_p9), %v3358_v15  ;;  %3199 = vset.pattern.permute.xlu1 (!%p2512_p9), %v3358_v15  ;;  %v82_v18 = vld [vmem:[%s4262_s3 + $0x58] sm:$0xff] (!%p2512_p9) }
  0x2d   :  { %v77_v13 = vld [vmem:[%s4262_s3 + $0x30] sm:$0xff] (!%p2512_p9)  ;;  %v84_v17 = vld [vmem:[%s4262_s3 + $0x68] sm:$0xff] (!%p2512_p9)  ;;  %v86_v19 = vld [vmem:[%s4262_s3 + $0x78] sm:$0xff] (!%p2512_p9) }
  0x2e   :  { %2552 = vmatprep.subr.bf16.mxu0 (!%p2512_p9), %v2551_v5  ;;  %v2585_v16 = vpack.c.bf16 (!%p2512_p9), %v77_v13, %v73_v12  ;;  %2584 = vmatprep.subr.bf16.mxu1 (!%p2512_p9), %v2583_v10  ;;  %v2555_v20 = vpack.c.bf16 (!%p2512_p9), %v84_v17, %v80_v14  ;;  %v2587_v21 = vpack.c.bf16 (!%p2512_p9), %v86_v19, %v82_v18  ;;  %v79_v22 = vld [vmem:[%s4262_s3 + $0x40] sm:$0xff] (!%p2512_p9)  ;;  %v81_v24 = vld [vmem:[%s4262_s3 + $0x50] sm:$0xff] (!%p2512_p9)  ;;  %v88_v27 = vld [vmem:[%s4262_s3 + $0x88] sm:$0xff] (!%p2512_p9) }
  0x2f   :  { %2554 = vmatpush1.bf16.msra.mxu0 (!%p2512_p9), %v2553_v11  ;;  %v83_v23 = vld [vmem:[%s4262_s3 + $0x60] sm:$0xff] (!%p2512_p9)  ;;  %v85_v26 = vld [vmem:[%s4262_s3 + $0x70] sm:$0xff] (!%p2512_p9)  ;;  %v92_v28 = vld [vmem:[%s4262_s3 + $0xa8] sm:$0xff] (!%p2512_p9) }
  0x30   :  { %2586 = vmatpush1.bf16.msra.mxu1 (!%p2512_p9), %v2585_v16  ;;  %v2557_v25 = vpack.c.bf16 (!%p2512_p9), %v83_v23, %v79_v22  ;;  %2556 = vmatprep.subr.bf16.mxu0 (!%p2512_p9), %v2555_v20  ;;  %v2589_v29 = vpack.c.bf16 (!%p2512_p9), %v85_v26, %v81_v24  ;;  %v2559_v30 = vpack.c.bf16 (!%p2512_p9), %v92_v28, %v88_v27  ;;  %v90_v31 = vld [vmem:[%s4262_s3 + $0x98] sm:$0xff] (!%p2512_p9)  ;;  %v87_v33 = vld [vmem:[%s4262_s3 + $0x80] sm:$0xff] (!%p2512_p9)  ;;  %v89_v36 = vld [vmem:[%s4262_s3 + $0x90] sm:$0xff] (!%p2512_p9) }
  0x31   :  { %2588 = vmatprep.subr.bf16.mxu1 (!%p2512_p9), %v2587_v21  ;;  %v94_v32 = vld [vmem:[%s4262_s3 + $0xb8] sm:$0xff] (!%p2512_p9)  ;;  %v91_v35 = vld [vmem:[%s4262_s3 + $0xa0] sm:$0xff] (!%p2512_p9)  ;;  %v93_v37 = vld [vmem:[%s4262_s3 + $0xb0] sm:$0xff] (!%p2512_p9) }
  0x32   :  { %v2591_v34 = vpack.c.bf16 %v94_v32, %v90_v31  ;;  %v2561_v38 = vpack.c.bf16 %v91_v35, %v87_v33  ;;  %v96_v39 = vld [vmem:[%s4262_s3 + $0xc8] sm:$0xff]  ;;  %v98_v41 = vld [vmem:[%s4262_s3 + $0xd8] sm:$0xff]  ;;  %v2593_v42 = vpack.c.bf16 %v93_v37, %v89_v36  ;;  %v95_v45 = vld [vmem:[%s4262_s3 + $0xc0] sm:$0xff] }
  0x33   :  { %2558 = vmatpush1.bf16.msra.mxu0 %v2557_v25  ;;  %v100_v40 = vld [vmem:[%s4262_s3 + $0xe8] sm:$0xff]  ;;  %v102_v44 = vld [vmem:[%s4262_s3 + $0xf8] sm:$0xff]  ;;  %v99_v46 = vld [vmem:[%s4262_s3 + $0xe0] sm:$0xff] }
  0x34   :  { %2590 = vmatpush1.bf16.msra.mxu1 %v2589_v29  ;;  %2560 = vmatprep.subr.bf16.mxu0 %v2559_v30  ;;  %v2563_v43 = vpack.c.bf16 %v100_v40, %v96_v39  ;;  %v2595_v47 = vpack.c.bf16 %v102_v44, %v98_v41  ;;  %v97_v48 = vld [vmem:[%s4262_s3 + $0xd0] sm:$0xff]  ;;  %v104_v50 = vld [vmem:[%s4262_s3 + $0x108] sm:$0xff]  ;;  %v106_v52 = vld [vmem:[%s4262_s3 + $0x118] sm:$0xff]  ;;  %v2565_v54 = vpack.c.bf16 %v99_v46, %v95_v45 }
  0x35   :  { %2592 = vmatprep.subr.bf16.mxu1 %v2591_v34  ;;  %v101_v49 = vld [vmem:[%s4262_s3 + $0xf0] sm:$0xff]  ;;  %v108_v51 = vld [vmem:[%s4262_s3 + $0x128] sm:$0xff]  ;;  %v110_v53 = vld [vmem:[%s4262_s3 + $0x138] sm:$0xff] }
  0x36   :  { %v2597_v55 = vpack.c.bf16 %v101_v49, %v97_v48  ;;  %v2567_v56 = vpack.c.bf16 %v108_v51, %v104_v50  ;;  %v103_v57 = vld [vmem:[%s4262_s3 + $0x100] sm:$0xff]  ;;  %v105_v59 = vld [vmem:[%s4262_s3 + $0x110] sm:$0xff]  ;;  %v2599_v60 = vpack.c.bf16 %v110_v53, %v106_v52  ;;  %v112_v62 = vld [vmem:[%s4262_s3 + $0x148] sm:$0xff] }
  0x37   :  { %2562 = vmatpush1.bf16.msra.mxu0 %v2561_v38  ;;  %v107_v58 = vld [vmem:[%s4262_s3 + $0x120] sm:$0xff]  ;;  %v109_v61 = vld [vmem:[%s4262_s3 + $0x130] sm:$0xff]  ;;  %v116_v63 = vld [vmem:[%s4262_s3 + $0x168] sm:$0xff] }
  0x38   :  { %2594 = vmatpush1.bf16.msra.mxu1 %v2593_v42  ;;  %2564 = vmatprep.subr.bf16.mxu0 %v2563_v43  ;;  %v114_v0 = vld [vmem:[%s4262_s3 + $0x158] sm:$0xff]  ;;  %v2569_v2 = vpack.c.bf16 %v107_v58, %v103_v57  ;;  %v2601_v3 = vpack.c.bf16 %v109_v61, %v105_v59  ;;  %v2571_v4 = vpack.c.bf16 %v116_v63, %v112_v62  ;;  %v111_v5 = vld [vmem:[%s4262_s3 + $0x140] sm:$0xff]  ;;  %v113_v7 = vld [vmem:[%s4262_s3 + $0x150] sm:$0xff] }
  0x39   :  { %2596 = vmatprep.subr.bf16.mxu1 %v2595_v47  ;;  %v118_v1 = vld [vmem:[%s4262_s3 + $0x178] sm:$0xff]  ;;  %v115_v6 = vld [vmem:[%s4262_s3 + $0x160] sm:$0xff]  ;;  %v117_v10 = vld [vmem:[%s4262_s3 + $0x170] sm:$0xff] }
  0x3a   :  { %v2603_v8 = vpack.c.bf16 %v118_v1, %v114_v0  ;;  %v120_v11 = vld [vmem:[%s4262_s3 + $0x188] sm:$0xff]  ;;  %v122_v13 = vld [vmem:[%s4262_s3 + $0x198] sm:$0xff]  ;;  %v2573_v15 = vpack.c.bf16 %v115_v6, %v111_v5  ;;  %v2605_v16 = vpack.c.bf16 %v117_v10, %v113_v7  ;;  %v119_v18 = vld [vmem:[%s4262_s3 + $0x180] sm:$0xff] }
  0x3b   :  { %2566 = vmatpush1.bf16.msra.mxu0 %v2565_v54  ;;  %v124_v12 = vld [vmem:[%s4262_s3 + $0x1a8] sm:$0xff]  ;;  %v126_v14 = vld [vmem:[%s4262_s3 + $0x1b8] sm:$0xff]  ;;  %v123_v19 = vld [vmem:[%s4262_s3 + $0x1a0] sm:$0xff] }
  0x3c   :  { %2598 = vmatpush1.bf16.msra.mxu1 %v2597_v55  ;;  %2568 = vmatprep.subr.bf16.mxu0 %v2567_v56  ;;  %v2575_v17 = vpack.c.bf16 %v124_v12, %v120_v11  ;;  %v121_v20 = vld [vmem:[%s4262_s3 + $0x190] sm:$0xff]  ;;  %v2607_v21 = vpack.c.bf16 %v126_v14, %v122_v13  ;;  %v128_v23 = vld [vmem:[%s4262_s3 + $0x1c8] sm:$0xff]  ;;  %v130_v25 = vld [vmem:[%s4262_s3 + $0x1d8] sm:$0xff]  ;;  %v2577_v27 = vpack.c.bf16 %v123_v19, %v119_v18 }
  0x3d   :  { %2600 = vmatprep.subr.bf16.mxu1 %v2599_v60  ;;  %v125_v22 = vld [vmem:[%s4262_s3 + $0x1b0] sm:$0xff]  ;;  %v132_v24 = vld [vmem:[%s4262_s3 + $0x1e8] sm:$0xff]  ;;  %v134_v26 = vld [vmem:[%s4262_s3 + $0x1f8] sm:$0xff] }
  0x3e   :  { %v2609_v28 = vpack.c.bf16 %v125_v22, %v121_v20  ;;  %v2579_v29 = vpack.c.bf16 %v132_v24, %v128_v23  ;;  %v127_v30 = vld [vmem:[%s4262_s3 + $0x1c0] sm:$0xff]  ;;  %v129_v32 = vld [vmem:[%s4262_s3 + $0x1d0] sm:$0xff]  ;;  %v2611_v33 = vpack.c.bf16 %v134_v26, %v130_v25  ;;  %v422_v35 = vld [vmem:[#allocation5 + $0x8] sm:$0xff] }
  0x3f   :  { %2570 = vmatpush1.bf16.msra.mxu0 %v2569_v2  ;;  %v131_v31 = vld [vmem:[%s4262_s3 + $0x1e0] sm:$0xff]  ;;  %v133_v34 = vld [vmem:[%s4262_s3 + $0x1f0] sm:$0xff]  ;;  %v426_v36 = vld [vmem:[#allocation5 + $0x28] sm:$0xff] }
  0x40   :  { %2602 = vmatpush1.bf16.msra.mxu1 %v2601_v3  ;;  %2572 = vmatprep.subr.bf16.mxu0 %v2571_v4  ;;  %v424_v37 = vld [vmem:[#allocation5 + $0x18] sm:$0xff]  ;;  %v2581_v39 = vpack.c.bf16 %v131_v31, %v127_v30  ;;  %v2613_v40 = vpack.c.bf16 %v133_v34, %v129_v32  ;;  %v3643_v41 = vpack.c.bf16 %v426_v36, %v422_v35  ;;  %v421_v42 = vld [vmem:[#allocation5] sm:$0xff]  ;;  %v423_v45 = vld [vmem:[#allocation5 + $0x10] sm:$0xff] }
  0x41   :  { %2604 = vmatprep.subr.bf16.mxu1 %v2603_v8  ;;  %v428_v38 = vld [vmem:[#allocation5 + $0x38] sm:$0xff]  ;;  %v425_v43 = vld [vmem:[#allocation5 + $0x20] sm:$0xff]  ;;  %v427_v46 = vld [vmem:[#allocation5 + $0x30] sm:$0xff] }
  0x42   :  { %v3645_v44 = vpack.c.bf16 %v428_v38, %v424_v37  ;;  %v430_v47 = vld [vmem:[#allocation5 + $0x48] sm:$0xff]  ;;  %v63_v49 = vld [vmem:[%s4260_s1] sm:$0xff]  ;;  %v3650_v50 = vpack.c.bf16 %v425_v43, %v421_v42  ;;  %v432_v51 = vld [vmem:[#allocation5 + $0x58] sm:$0xff]  ;;  %v3653_v53 = vpack.c.bf16 %v427_v46, %v423_v45 }
  0x43   :  { %2574 = vmatpush1.bf16.msra.mxu0 %v2573_v15  ;;  %v434_v48 = vld [vmem:[#allocation5 + $0x68] sm:$0xff]  ;;  %v436_v52 = vld [vmem:[#allocation5 + $0x78] sm:$0xff]  ;;  %v429_v54 = vld [vmem:[#allocation5 + $0x40] sm:$0xff] }
  0x44   :  { %2606 = vmatpush1.bf16.msra.mxu1 %v2605_v16  ;;  %2576 = vmatprep.subr.bf16.mxu0 %v2575_v17  ;;  %v433_v55 = vld [vmem:[#allocation5 + $0x60] sm:$0xff]  ;;  %v3656_v56 = vpack.c.bf16 %v434_v48, %v430_v47  ;;  %v431_v57 = vld [vmem:[#allocation5 + $0x50] sm:$0xff]  ;;  %v3658_v59 = vpack.c.bf16 %v436_v52, %v432_v51  ;;  %v438_v60 = vld [vmem:[#allocation5 + $0x88] sm:$0xff] }
  0x45   :  { %2608 = vmatprep.subr.bf16.mxu1 %v2607_v21  ;;  %v435_v58 = vld [vmem:[#allocation5 + $0x70] sm:$0xff]  ;;  %v442_v61 = vld [vmem:[#allocation5 + $0xa8] sm:$0xff]  ;;  %v3664_v63 = vpack.c.bf16 %v433_v55, %v429_v54  ;;  %v440_v0 = vld [vmem:[#allocation5 + $0x98] sm:$0xff] }
  0x46   :  { %v64_v62 = vld [vmem:[%s4260_s1 + $0x8] sm:$0xff]  ;;  %v444_v1 = vld [vmem:[#allocation5 + $0xb8] sm:$0xff]  ;;  %v3668_v2 = vpack.c.bf16 %v435_v58, %v431_v57  ;;  %v437_v3 = vld [vmem:[#allocation5 + $0x80] sm:$0xff]  ;;  %v3672_v5 = vpack.c.bf16 %v442_v61, %v438_v60 }
  0x47   :  { %2578 = vmatpush1.bf16.msra.mxu0 %v2577_v27  ;;  %v441_v4 = vld [vmem:[#allocation5 + $0xa0] sm:$0xff]  ;;  %v439_v6 = vld [vmem:[#allocation5 + $0x90] sm:$0xff]  ;;  %v3675_v8 = vpack.c.bf16 %v444_v1, %v440_v0  ;;  %v446_v10 = vld [vmem:[#allocation5 + $0xc8] sm:$0xff] }
  0x48   :  { %2610 = vmatpush1.bf16.msra.mxu1 %v2609_v28  ;;  %2580 = vmatprep.subr.bf16.mxu0 %v2579_v29  ;;  %v443_v7 = vld [vmem:[#allocation5 + $0xb0] sm:$0xff]  ;;  %v450_v11 = vld [vmem:[#allocation5 + $0xe8] sm:$0xff]  ;;  %v3681_v13 = vpack.c.bf16 %v441_v4, %v437_v3  ;;  %v448_v14 = vld [vmem:[#allocation5 + $0xd8] sm:$0xff] }
  0x49   :  { %2612 = vmatprep.subr.bf16.mxu1 %v2611_v33  ;;  %v65_v12 = vld [vmem:[%s4260_s1 + $0x10] sm:$0xff]  ;;  %v452_v15 = vld [vmem:[#allocation5 + $0xf8] sm:$0xff]  ;;  %v3685_v16 = vpack.c.bf16 %v443_v7, %v439_v6  ;;  %v445_v17 = vld [vmem:[#allocation5 + $0xc0] sm:$0xff]  ;;  %v3689_v19 = vpack.c.bf16 %v450_v11, %v446_v10 }
  0x4a   :  { %v449_v18 = vld [vmem:[#allocation5 + $0xe0] sm:$0xff]  ;;  %v447_v20 = vld [vmem:[#allocation5 + $0xd0] sm:$0xff]  ;;  %v3692_v22 = vpack.c.bf16 %v452_v15, %v448_v14  ;;  %v454_v23 = vld [vmem:[#allocation5 + $0x108] sm:$0xff] }
  0x4b   :  { %2582 = vmatpush1.bf16.msra.mxu0 %v2581_v39  ;;  %v451_v21 = vld [vmem:[#allocation5 + $0xf0] sm:$0xff]  ;;  %v458_v24 = vld [vmem:[#allocation5 + $0x128] sm:$0xff]  ;;  %v66_v25 = vld [vmem:[%s4260_s1 + $0x18] sm:$0xff]  ;;  %v3698_v26 = vpack.c.bf16 %v449_v18, %v445_v17 }
  0x4c   :  { %2614 = vmatpush1.bf16.msra.mxu1 %v2613_v40  ;;  %2616 = vmatprep.subr.bf16.mxu0 %v3643_v41  ;;  %v456_v27 = vld [vmem:[#allocation5 + $0x118] sm:$0xff]  ;;  %v3702_v29 = vpack.c.bf16 %v451_v21, %v447_v20  ;;  %v453_v30 = vld [vmem:[#allocation5 + $0x100] sm:$0xff]  ;;  %v3706_v32 = vpack.c.bf16 %v458_v24, %v454_v23  ;;  %v455_v33 = vld [vmem:[#allocation5 + $0x110] sm:$0xff] }
  0x4d   :  { %2648 = vmatprep.subr.bf16.mxu1 %v3645_v44  ;;  %v460_v28 = vld [vmem:[#allocation5 + $0x138] sm:$0xff]  ;;  %v457_v31 = vld [vmem:[#allocation5 + $0x120] sm:$0xff]  ;;  %v459_v34 = vld [vmem:[#allocation5 + $0x130] sm:$0xff] }
  0x4e   :  { %222 = vmatmul.mubr.f32.vlgmr.msra.gmra.mrb[0].mxu0 %v63_v49  ;;  %v3709_v35 = vpack.c.bf16 %v460_v28, %v456_v27  ;;  %v462_v36 = vld [vmem:[#allocation5 + $0x148] sm:$0xff]  ;;  %v67_v38 = vld [vmem:[%s4260_s1 + $0x20] sm:$0xff]  ;;  %v3715_v39 = vpack.c.bf16 %v457_v31, %v453_v30  ;;  %v464_v40 = vld [vmem:[#allocation5 + $0x158] sm:$0xff]  ;;  %v3719_v43 = vpack.c.bf16 %v459_v34, %v455_v33 }
  0x4f   :  { %335 = vmatmul.mubr.f32.vlgmr.msra.gmra.mrb[0].mxu1 %v63_v49  ;;  %2618 = vmatpush1.bf16.msra.mxu0 %v3650_v50  ;;  %v466_v37 = vld [vmem:[#allocation5 + $0x168] sm:$0xff]  ;;  %v468_v42 = vld [vmem:[#allocation5 + $0x178] sm:$0xff]  ;;  %v461_v45 = vld [vmem:[#allocation5 + $0x140] sm:$0xff] }
  0x50   :  { %2650 = vmatpush1.bf16.msra.mxu1 %v3653_v53  ;;  %227 = vmatprep.mubr.f32.mxu0 %v3357_v9  ;;  %v465_v46 = vld [vmem:[#allocation5 + $0x160] sm:$0xff]  ;;  %v3723_v47 = vpack.c.bf16 %v466_v37, %v462_v36  ;;  %v463_v48 = vld [vmem:[#allocation5 + $0x150] sm:$0xff]  ;;  %v3726_v51 = vpack.c.bf16 %v468_v42, %v464_v40  ;;  %v470_v52 = vld [vmem:[#allocation5 + $0x188] sm:$0xff] }
  0x51   :  { %340 = vmatprep.mubr.f32.mxu1 %v3357_v9  ;;  %2620 = vmatprep.subr.bf16.mxu0 %v3656_v56  ;;  %v467_v49 = vld [vmem:[#allocation5 + $0x170] sm:$0xff]  ;;  %v474_v54 = vld [vmem:[#allocation5 + $0x1a8] sm:$0xff]  ;;  %v3732_v57 = vpack.c.bf16 %v465_v46, %v461_v45  ;;  %v472_v58 = vld [vmem:[#allocation5 + $0x198] sm:$0xff] }
  0x52   :  { %228 = vmatmul.mubr.f32.gmra.mrb[2].mxu0 %v64_v62  ;;  %2652 = vmatprep.subr.bf16.mxu1 %v3658_v59  ;;  %v68_v55 = vld [vmem:[%s4260_s1 + $0x28] sm:$0xff]  ;;  %v476_v60 = vld [vmem:[#allocation5 + $0x1b8] sm:$0xff]  ;;  %v3736_v61 = vpack.c.bf16 %v467_v49, %v463_v48  ;;  %v473_v0 = vld [vmem:[#allocation5 + $0x1a0] sm:$0xff]  ;;  %v3740_v1 = vpack.c.bf16 %v474_v54, %v470_v52 }
  0x53   :  { %341 = vmatmul.mubr.f32.gmra.mrb[2].mxu1 %v64_v62  ;;  %2622 = vmatpush1.bf16.msra.mxu0 %v3664_v63  ;;  %v469_v62 = vld [vmem:[#allocation5 + $0x180] sm:$0xff]  ;;  %v471_v3 = vld [vmem:[#allocation5 + $0x190] sm:$0xff]  ;;  %v3743_v6 = vpack.c.bf16 %v476_v60, %v472_v58  ;;  %v478_v7 = vld [vmem:[#allocation5 + $0x1c8] sm:$0xff] }
  0x54   :  { %2654 = vmatpush1.bf16.msra.mxu1 %v3668_v2  ;;  %233 = vmatprep.mubr.f32.mxu0 %v3357_v9  ;;  %v475_v4 = vld [vmem:[#allocation5 + $0x1b0] sm:$0xff]  ;;  %v482_v10 = vld [vmem:[#allocation5 + $0x1e8] sm:$0xff]  ;;  %v480_v14 = vld [vmem:[#allocation5 + $0x1d8] sm:$0xff] }
  0x55   :  { %346 = vmatprep.mubr.f32.mxu1 %v3357_v9  ;;  %2624 = vmatprep.subr.bf16.mxu0 %v3672_v5  ;;  %v69_v11 = vld [vmem:[%s4260_s1 + $0x30] sm:$0xff]  ;;  %v484_v15 = vld [vmem:[#allocation5 + $0x1f8] sm:$0xff]  ;;  %v3753_v17 = vpack.c.bf16 %v475_v4, %v471_v3  ;;  %v477_v18 = vld [vmem:[#allocation5 + $0x1c0] sm:$0xff]  ;;  %v3757_v21 = vpack.c.bf16 %v482_v10, %v478_v7 }
  0x56   :  { %234 = vmatmul.mubr.f32.gmra.mrb[4].mxu0 %v65_v12  ;;  %2656 = vmatprep.subr.bf16.mxu1 %v3675_v8  ;;  %v481_v20 = vld [vmem:[#allocation5 + $0x1e0] sm:$0xff]  ;;  %v479_v23 = vld [vmem:[#allocation5 + $0x1d0] sm:$0xff]  ;;  %v70_v27 = vld [vmem:[%s4260_s1 + $0x38] sm:$0xff] }
  0x57   :  { %347 = vmatmul.mubr.f32.gmra.mrb[4].mxu1 %v65_v12  ;;  %2626 = vmatpush1.bf16.msra.mxu0 %v3681_v13  ;;  %v3749_v12 = vpack.c.bf16 %v473_v0, %v469_v62  ;;  %v483_v24 = vld [vmem:[#allocation5 + $0x1f0] sm:$0xff]  ;;  %v3766_v28 = vpack.c.bf16 %v481_v20, %v477_v18  ;;  %v655_v31 = vld [vmem:[%s4261_s2] sm:$0xff]  ;;  %v2519_v34 = vld [vmem:[%s4261_s2 + $0x8] sm:$0xff]  ;;  %v137_v62 = vlaneseq }
  0x58   :  { %2658 = vmatpush1.bf16.msra.mxu1 %v3685_v16  ;;  %239 = vmatprep.mubr.f32.mxu0 %v3357_v9  ;;  %v3770_v30 = vpack.c.bf16 %v483_v24, %v479_v23  ;;  %v3782_v33 = vld [vmem:[%s4266_s7] sm:$0xff]  ;;  %v662_v36 = vsub.f32 1.0, %v655_v31  ;;  %v921_v37 = vsub.f32 1.0, %v2519_v34  ;;  %v2529_v42 = vld [vmem:[%s4261_s2 + $0x18] sm:$0xff]  ;;  %v2539_v49 = vld [vmem:[%s4261_s2 + $0x28] sm:$0xff] }
  0x59   :  { %352 = vmatprep.mubr.f32.mxu1 %v3357_v9  ;;  %2628 = vmatprep.subr.bf16.mxu0 %v3689_v19  ;;  %v1441_v45 = vsub.f32 1.0, %v2529_v42  ;;  %v2534_v46 = vld [vmem:[%s4261_s2 + $0x20] sm:$0xff]  ;;  %v1961_v52 = vsub.f32 1.0, %v2539_v49  ;;  %v2544_v54 = vld [vmem:[%s4261_s2 + $0x30] sm:$0xff]  ;;  %v2549_v58 = vld [vmem:[%s4261_s2 + $0x38] sm:$0xff]  ;;  %v138_v0 = vshrl.u32 %v137_v62, 7 }
  0x5a   :  { %240 = vmatmul.mubr.f32.gmra.mrb[6].mxu0 %v66_v25  ;;  %2660 = vmatprep.subr.bf16.mxu1 %v3692_v22  ;;  %v1701_v48 = vsub.f32 1.0, %v2534_v46  ;;  %v2481_v60 = vsub.f32 1.0, %v2549_v58  ;;  %v135_v4 = vld [vmem:[%s4264_s5] sm:$0xf] }
  0x5b   :  { %353 = vmatmul.mubr.f32.gmra.mrb[6].mxu1 %v66_v25  ;;  %2630 = vmatpush1.bf16.msra.mxu0 %v3698_v26  ;;  %v3760_v25 = vpack.c.bf16 %v484_v15, %v480_v14  ;;  %v139_v3 = vsub.s32 0, %v138_v0  ;;  %v143_v7 = vsub.s32 1, %v138_v0  ;;  %v151_v15 = vsub.s32 3, %v138_v0 }
  0x5c   :  { %2662 = vmatpush1.bf16.msra.mxu1 %v3702_v29  ;;  %245 = vmatprep.mubr.f32.mxu0 %v3357_v9 }
  0x5d   :  { %358 = vmatprep.mubr.f32.mxu1 %v3357_v9  ;;  %2632 = vmatprep.subr.bf16.mxu0 %v3706_v32  ;;  %v3849_v10 = vrot.slane %v135_v4, %v139_v3 }
  0x5e   :  { %246 = vmatmul.mubr.f32.gmra.mrb[8].mxu0 %v67_v38  ;;  %2664 = vmatprep.subr.bf16.mxu1 %v3709_v35 }
  0x5f   :  { %359 = vmatmul.mubr.f32.gmra.mrb[8].mxu1 %v67_v38  ;;  %2634 = vmatpush1.bf16.msra.mxu0 %v3715_v39  ;;  %v2524_v38 = vld [vmem:[%s4261_s2 + $0x10] sm:$0xff] }
  0x60   :  { %2666 = vmatpush1.bf16.msra.mxu1 %v3719_v43  ;;  %251 = vmatprep.mubr.f32.mxu0 %v3357_v9  ;;  %v1181_v40 = vsub.f32 1.0, %v2524_v38 }
  0x61   :  { %364 = vmatprep.mubr.f32.mxu1 %v3357_v9  ;;  %2636 = vmatprep.subr.bf16.mxu0 %v3723_v47 }
  0x62   :  { %252 = vmatmul.mubr.f32.gmra.mrb[10].mxu0 %v68_v55  ;;  %2668 = vmatprep.subr.bf16.mxu1 %v3726_v51 }
  0x63   :  { %365 = vmatmul.mubr.f32.gmra.mrb[10].mxu1 %v68_v55  ;;  %2638 = vmatpush1.bf16.msra.mxu0 %v3732_v57  ;;  %v2221_v55 = vsub.f32 1.0, %v2544_v54 }
  0x64   :  { %2670 = vmatpush1.bf16.msra.mxu1 %v3736_v61  ;;  %257 = vmatprep.mubr.f32.mxu0 %v3357_v9 }
  0x65   :  { %370 = vmatprep.mubr.f32.mxu1 %v3357_v9  ;;  %2640 = vmatprep.subr.bf16.mxu0 %v3740_v1 }
  0x66   :  { %258 = vmatmul.mubr.f32.gmra.mrb[12].mxu0 %v69_v11  ;;  %2672 = vmatprep.subr.bf16.mxu1 %v3743_v6 }
  0x67   :  { %371 = vmatmul.mubr.f32.gmra.mrb[12].mxu1 %v69_v11  ;;  %2642 = vmatpush1.bf16.msra.mxu0 %v3749_v12  ;;  %v3851_v11 = vrot.slane %v135_v4, %v143_v7 }
  0x68   :  { %2674 = vmatpush1.bf16.msra.mxu1 %v3753_v17  ;;  %263 = vmatprep.mubr.f32.mxu0 %v3357_v9 }
  0x69   :  { %376 = vmatprep.mubr.f32.mxu1 %v3357_v9  ;;  %2644 = vmatprep.subr.bf16.mxu0 %v3757_v21 }
  0x6a   :  { %264 = vmatmul.mubr.f32.gmra.mrb[14].mxu0 %v70_v27  ;;  %2676 = vmatprep.subr.bf16.mxu1 %v3760_v25 }
  0x6b   :  { %377 = vmatmul.mubr.f32.gmra.mrb[14].mxu1 %v70_v27  ;;  %2646 = vmatpush1.bf16.msra.mxu0 %v3766_v28 }
  0x6c   :  { %2678 = vmatpush1.bf16.msra.mxu1 %v3770_v30  ;;  %549 = vmatprep.mubr.f32.mxu0 %v3357_v9 }
  0x6d   :  { %620 = vmatprep.mubr.f32.mxu1 %v3357_v9  ;;  %658 = vperm.xlu0 %3198, %v655_v31   ;;  %v3855_v31 = vrot.slane %v135_v4, %v151_v15 }
  0x6e   :  { %550 = vmatmul.mubr.f32.vlgmr.msra.gmra.mrb[0].mxu0 %v3782_v33  ;;  %917 = vperm.xlu1 %3199, %v2519_v34   ;;  %v147_v34 = vsub.s32 2, %v138_v0 }
  0x6f   :  { %621 = vmatmul.mubr.f32.vlgmr.msra.gmra.mrb[0].mxu1 %v3782_v33  ;;  %2680 = vmatprep.subr.bf16.mxu0 %v3643_v41 }
  0x70   :  { %2712 = vmatprep.subr.bf16.mxu1 %v3645_v44  ;;  %2682 = vmatpush1.bf16.msra.mxu0 %v3650_v50 }
  0x71   :  { %665 = vperm.xlu0 %3198, %v662_v36   ;;  %2714 = vmatpush1.bf16.msra.mxu1 %v3653_v53 }
  0x72   :  { %924 = vperm.xlu1 %3199, %v921_v37   ;;  %2684 = vmatprep.subr.bf16.mxu0 %v3656_v56  ;;  %v3858_v37 = vrot.slane %v135_v4, %v147_v34  ;;  %v1200_v34 = vld [vmem:[#allocation5 + $0x8] sm:$0xff] }
  0x73   :  { %2716 = vmatprep.subr.bf16.mxu1 %v3658_v59  ;;  %807 = vmatprep.mubr.f32.mxu0 %v3357_v9 }
  0x74   :  { %2686 = vmatpush1.bf16.msra.mxu0 %v3664_v63  ;;  %878 = vmatprep.mubr.f32.mxu1 %v3357_v9 }
  0x75   :  { %1177 = vperm.xlu0 %3198, %v2524_v38   ;;  %2718 = vmatpush1.bf16.msra.mxu1 %v3668_v2 }
  0x76   :  { %2688 = vmatprep.subr.bf16.mxu0 %v3672_v5  ;;  %2720 = vmatprep.subr.bf16.mxu1 %v3675_v8 }
  0x77   :  { %1184 = vperm.xlu1 %3199, %v1181_v40  }
  0x78   :  { %2690 = vmatpush1.bf16.msra.mxu0 %v3681_v13 }
  0x79   :  { %1437 = vperm.xlu0 %3198, %v2529_v42   ;;  %2722 = vmatpush1.bf16.msra.mxu1 %v3685_v16 }
  0x7a   :  { %2692 = vmatprep.subr.bf16.mxu0 %v3689_v19  ;;  %2724 = vmatprep.subr.bf16.mxu1 %v3692_v22 }
  0x7b   :  { %1444 = vperm.xlu1 %3199, %v1441_v45  }
  0x7c   :  { %2694 = vmatpush1.bf16.msra.mxu0 %v3698_v26 }
  0x7d   :  { %1697 = vperm.xlu0 %3198, %v2534_v46   ;;  %2726 = vmatpush1.bf16.msra.mxu1 %v3702_v29 }
  0x7e   :  { %2696 = vmatprep.subr.bf16.mxu0 %v3706_v32  ;;  %2728 = vmatprep.subr.bf16.mxu1 %v3709_v35 }
  0x7f   :  { %1704 = vperm.xlu1 %3199, %v1701_v48  }
  0x80   :  { %2698 = vmatpush1.bf16.msra.mxu0 %v3715_v39 }
  0x81   :  { %1957 = vperm.xlu0 %3198, %v2539_v49   ;;  %2730 = vmatpush1.bf16.msra.mxu1 %v3719_v43 }
  0x82   :  { %2700 = vmatprep.subr.bf16.mxu0 %v3723_v47  ;;  %2732 = vmatprep.subr.bf16.mxu1 %v3726_v51 }
  0x83   :  { %1964 = vperm.xlu1 %3199, %v1961_v52  }
  0x84   :  { %2702 = vmatpush1.bf16.msra.mxu0 %v3732_v57 }
  0x85   :  { %2217 = vperm.xlu0 %3198, %v2544_v54   ;;  %2734 = vmatpush1.bf16.msra.mxu1 %v3736_v61 }
  0x86   :  { %2704 = vmatprep.subr.bf16.mxu0 %v3740_v1  ;;  %2736 = vmatprep.subr.bf16.mxu1 %v3743_v6 }
  0x87   :  { %2224 = vperm.xlu1 %3199, %v2221_v55   ;;  %v416_v55 = vld [vmem:[%s4267_s8] sm:$0xff] }
  0x88   :  { %2706 = vmatpush1.bf16.msra.mxu0 %v3749_v12 }
  0x89   :  { %2477 = vperm.xlu0 %3198, %v2549_v58   ;;  %2738 = vmatpush1.bf16.msra.mxu1 %v3753_v17 }
  0x8a   :  { %2708 = vmatprep.subr.bf16.mxu0 %v3757_v21  ;;  %2740 = vmatprep.subr.bf16.mxu1 %v3760_v25 }
  0x8b   :  { %2484 = vperm.xlu1 %3199, %v2481_v60  }
  0x8c   :  { %2710 = vmatpush1.bf16.msra.mxu0 %v3766_v28 }
  0x8d   :  { %2742 = vmatpush1.bf16.msra.mxu1 %v3770_v30  ;;  %2744 = vmatprep.subr.bf16.mxu0 %v3643_v41 }
  0x8e   :  { %2776 = vmatprep.subr.bf16.mxu1 %v3645_v44 }
  0xec   :  { %v659_v49 = vpop.permute.xlu0 %658 }
  0xf0   :  { %v666_v4 = vpop.permute.xlu0 %665 }
 0x141   :  { %v551_v14 = vpop.f32.mrb[0].mxu0 }
 0x142   :  { %v3127_v18 = vadd.f32 %v551_v14, %v3849_v10  ;;  %v622_v20 = vpop.f32.mrb[0].mxu1  ;;  %v553_v41 = vpop.f32.mrb[1].mxu0  ;;  %v671_v14 = vmul.f32 %v666_v4, %v416_v55 }
 0x143   :  { %v3128_v44 = vadd.f32 %v553_v41, %v3851_v11  ;;  %v624_v23 = vpop.f32.mrb[1].mxu1  ;;  %v3143_v40 = vadd.f32 %v622_v20, %v3858_v37 }
 0x144   :  { %v2513_v24 = vmul.f32 -1.442695, %v3127_v18  ;;  %v3144_v36 = vadd.f32 %v624_v23, %v3855_v31 }
 0x145   :  { %v2514_v27 = vmul.f32 -1.442695, %v3128_v44 }
 0x146   :  { %3200 = vpow2.f32 %v2513_v24  ;;  %v2515_v38 = vmul.f32 -1.442695, %v3144_v36  ;;  %v668_v24 = vmul.f32 %v666_v4, %v3782_v33  ;;  %v1204_v36 = vld [vmem:[#allocation5 + $0x28] sm:$0xff]  ;;  %v1207_v4 = vld [vmem:[#allocation5 + $0x40] sm:$0xff] }
 0x147   :  { %3202 = vpow2.f32 %v2514_v27 }
 0x148   :  { %3204 = vpow2.f32 %v2515_v38  ;;  %v1202_v38 = vld [vmem:[#allocation5 + $0x18] sm:$0xff] }
 0x149   :  { %3206 = vtanh.f32 %v3143_v40  ;;  %v3930_v40 = vpack.c.bf16 %v1204_v36, %v1200_v34  ;;  %v1235_v34 = vld [vmem:[#allocation5 + $0x120] sm:$0xff] }
 0x150   :  { %v3201_v42 = vpop.eup %3200 }
 0x151   :  { %v3203_v45 = vpop.eup %3202  ;;  %v634_v46 = vadd.f32 1.0, %v3201_v42  ;;  %v1206_v42 = vld [vmem:[#allocation5 + $0x38] sm:$0xff] }
 0x152   :  { %v640_v48 = vadd.f32 1.0, %v3203_v45  ;;  %v3205_v52 = vpop.eup %3204  ;;  %v1199_v45 = vld [vmem:[#allocation5] sm:$0xff] }
 0x153   :  { %3208 = vrcp.f32 %v634_v46  ;;  %v3207_v54 = vpop.eup %3206  ;;  %v647_v62 = vadd.f32 1.0, %v3205_v52  ;;  %v1203_v46 = vld [vmem:[#allocation5 + $0x20] sm:$0xff]  ;;  %v1201_v52 = vld [vmem:[#allocation5 + $0x10] sm:$0xff] }
 0x154   :  { %3210 = vrcp.f32 %v640_v48  ;;  %v3932_v48 = vpack.c.bf16 %v1206_v42, %v1202_v38  ;;  %v1233_v42 = vld [vmem:[#allocation5 + $0x110] sm:$0xff] }
 0x155   :  { %3212 = vrcp.f32 %v647_v62  ;;  %v1210_v62 = vld [vmem:[#allocation5 + $0x58] sm:$0xff] }
 0x15d   :  { %v3209_v58 = vpop.eup %3208 }
 0x15e   :  { %v3211_v60 = vpop.eup %3210  ;;  %v651_v0 = vmul.f32 %v3209_v58, %v3207_v54  ;;  %v1205_v54 = vld [vmem:[#allocation5 + $0x30] sm:$0xff]  ;;  %v1208_v58 = vld [vmem:[#allocation5 + $0x48] sm:$0xff] }
 0x15f   :  { %v650_v3 = vmul.f32 %v3211_v60, %v416_v55  ;;  %v3213_v20 = vpop.eup %3212  ;;  %v3937_v55 = vpack.c.bf16 %v1205_v54, %v1201_v52  ;;  %v1212_v60 = vld [vmem:[#allocation5 + $0x68] sm:$0xff] }
 0x160   :  { %v1244_v54 = vld [vmem:[#allocation5 + $0x168] sm:$0xff] }
 0x161   :  { %v652_v7 = vadd.f32 %v651_v0, %v650_v3  ;;  %v3942_v0 = vpack.c.bf16 %v1212_v60, %v1208_v58  ;;  %v1214_v3 = vld [vmem:[#allocation5 + $0x78] sm:$0xff] }
 0x162   :  { %v1242_v58 = vld [vmem:[#allocation5 + $0x158] sm:$0xff] }
 0x163   :  { %3214 = vtanh.f32 %v652_v7  ;;  %v670_v15 = vmul.f32 %v659_v49, %v652_v7  ;;  %v1211_v7 = vld [vmem:[#allocation5 + $0x60] sm:$0xff]  ;;  %v1246_v60 = vld [vmem:[#allocation5 + $0x178] sm:$0xff] }
 0x165   :  { %v3864_v18 = vadd.f32 %v671_v14, %v670_v15  ;;  %v3944_v14 = vpack.c.bf16 %v1214_v3, %v1210_v62  ;;  %v3946_v15 = vpack.c.bf16 %v1211_v7, %v1207_v4  ;;  %v3991_v3 = vpack.c.bf16 %v1246_v60, %v1242_v58  ;;  %v1239_v4 = vld [vmem:[#allocation5 + $0x140] sm:$0xff] }
 0x166   :  { %v1243_v7 = vld [vmem:[#allocation5 + $0x160] sm:$0xff] }
 0x16d   :  { %v3215_v41 = vpop.eup %3214 }
 0x16e   :  { %v654_v44 = vmul.f32 %v3215_v41, %v3213_v20  ;;  %v1209_v20 = vld [vmem:[#allocation5 + $0x50] sm:$0xff] }
 0x16f   :  { %v1213_v41 = vld [vmem:[#allocation5 + $0x70] sm:$0xff] }
 0x170   :  { %v661_v23 = vmul.f32 %v659_v49, %v654_v44  ;;  %v3934_v49 = vpack.c.bf16 %v1203_v46, %v1199_v45  ;;  %v3949_v44 = vpack.c.bf16 %v1213_v41, %v1209_v20  ;;  %v1237_v45 = vld [vmem:[#allocation5 + $0x130] sm:$0xff]  ;;  %v1240_v46 = vld [vmem:[#allocation5 + $0x148] sm:$0xff]  ;;  %v3994_v41 = vpack.c.bf16 %v1243_v7, %v1239_v4 }
 0x171   :  { %v3985_v52 = vpack.c.bf16 %v1237_v45, %v1233_v42  ;;  %v3989_v62 = vpack.c.bf16 %v1244_v54, %v1240_v46  ;;  %v1241_v20 = vld [vmem:[#allocation5 + $0x150] sm:$0xff] }
 0x172   :  { %673 = vst [vmem:[%s4265_s6] sm:$0xff] %v661_v23  ;;  %v3870_v27 = vadd.f32 %v668_v24, %v661_v23  ;;  %v1216_v23 = vld [vmem:[#allocation5 + $0x88] sm:$0xff]  ;;  %v1257_v42 = vld [vmem:[#allocation5 + $0x1d0] sm:$0xff] }
 0x173   :  { %v1220_v24 = vld [vmem:[#allocation5 + $0xa8] sm:$0xff]  ;;  %v1261_v45 = vld [vmem:[#allocation5 + $0x1f0] sm:$0xff] }
 0x174   :  { %808 = vmatmul.mubr.f32.vlgmr.msra.gmra.mrb[2].mxu0 %v3870_v27  ;;  %879 = vmatmul.mubr.f32.vlgmr.msra.gmra.mrb[2].mxu1 %v3870_v27  ;;  %v4021_v54 = vpack.c.bf16 %v1261_v45, %v1257_v42 }
 0x175   :  { %2746 = vmatpush1.bf16.msra.mxu0 %v3650_v50  ;;  %2778 = vmatpush1.bf16.msra.mxu1 %v3653_v53 }
 0x176   :  { %2748 = vmatprep.subr.bf16.mxu0 %v3656_v56  ;;  %2780 = vmatprep.subr.bf16.mxu1 %v3658_v59 }
 0x177   :  { %1067 = vmatprep.mubr.f32.mxu0 %v3357_v9  ;;  %1138 = vmatprep.mubr.f32.mxu1 %v3357_v9 }
 0x179   :  { %2750 = vmatpush1.bf16.msra.mxu0 %v3664_v63  ;;  %2782 = vmatpush1.bf16.msra.mxu1 %v3668_v2 }
 0x17a   :  { %2752 = vmatprep.subr.bf16.mxu0 %v3672_v5  ;;  %2784 = vmatprep.subr.bf16.mxu1 %v3675_v8 }
 0x17d   :  { %2754 = vmatpush1.bf16.msra.mxu0 %v3681_v13  ;;  %2786 = vmatpush1.bf16.msra.mxu1 %v3685_v16 }
 0x17e   :  { %2756 = vmatprep.subr.bf16.mxu0 %v3689_v19  ;;  %2788 = vmatprep.subr.bf16.mxu1 %v3692_v22 }
 0x181   :  { %2758 = vmatpush1.bf16.msra.mxu0 %v3698_v26  ;;  %2790 = vmatpush1.bf16.msra.mxu1 %v3702_v29 }
 0x182   :  { %2760 = vmatprep.subr.bf16.mxu0 %v3706_v32  ;;  %2792 = vmatprep.subr.bf16.mxu1 %v3709_v35 }
 0x185   :  { %2762 = vmatpush1.bf16.msra.mxu0 %v3715_v39  ;;  %2794 = vmatpush1.bf16.msra.mxu1 %v3719_v43 }
 0x186   :  { %2764 = vmatprep.subr.bf16.mxu0 %v3723_v47  ;;  %2796 = vmatprep.subr.bf16.mxu1 %v3726_v51 }
 0x189   :  { %2766 = vmatpush1.bf16.msra.mxu0 %v3732_v57  ;;  %2798 = vmatpush1.bf16.msra.mxu1 %v3736_v61 }
 0x18a   :  { %2768 = vmatprep.subr.bf16.mxu0 %v3740_v1  ;;  %2800 = vmatprep.subr.bf16.mxu1 %v3743_v6  ;;  %v3914_v6 = vpop.permute.xlu1 %917 }
 0x18d   :  { %2770 = vmatpush1.bf16.msra.mxu0 %v3749_v12  ;;  %2802 = vmatpush1.bf16.msra.mxu1 %v3753_v17 }
 0x18e   :  { %2772 = vmatprep.subr.bf16.mxu0 %v3757_v21  ;;  %2804 = vmatprep.subr.bf16.mxu1 %v3760_v25  ;;  %v3916_v25 = vpop.permute.xlu1 %924 }
 0x191   :  { %2774 = vmatpush1.bf16.msra.mxu0 %v3766_v28  ;;  %2806 = vmatpush1.bf16.msra.mxu1 %v3770_v30  ;;  %v927_v28 = vmul.f32 %v3916_v25, %v3870_v27  ;;  %v1218_v27 = vld [vmem:[#allocation5 + $0x98] sm:$0xff] }
 0x192   :  { %2808 = vmatprep.subr.bf16.mxu0 %v3930_v40  ;;  %2840 = vmatprep.subr.bf16.mxu1 %v3932_v48 }
 0x247   :  { %v809_v50 = vpop.f32.mrb[2].mxu0  ;;  %v880_v53 = vpop.f32.mrb[2].mxu1 }
 0x248   :  { %v3129_v56 = vadd.f32 %v809_v50, %v3849_v10  ;;  %v811_v59 = vpop.f32.mrb[3].mxu0  ;;  %v882_v63 = vpop.f32.mrb[3].mxu1  ;;  %v3145_v19 = vadd.f32 %v880_v53, %v3858_v37  ;;  %v3954_v50 = vpack.c.bf16 %v1220_v24, %v1216_v23  ;;  %v1222_v53 = vld [vmem:[#allocation5 + $0xb8] sm:$0xff]  ;;  %v1245_v23 = vld [vmem:[#allocation5 + $0x170] sm:$0xff]  ;;  %v1248_v24 = vld [vmem:[#allocation5 + $0x188] sm:$0xff] }
 0x249   :  { %v3130_v2 = vadd.f32 %v811_v59, %v3851_v11  ;;  %v3146_v13 = vadd.f32 %v882_v63, %v3855_v31  ;;  %v1219_v59 = vld [vmem:[#allocation5 + $0xa0] sm:$0xff]  ;;  %v3956_v63 = vpack.c.bf16 %v1222_v53, %v1218_v27  ;;  %v1252_v27 = vld [vmem:[#allocation5 + $0x1a8] sm:$0xff]  ;;  %v3998_v53 = vpack.c.bf16 %v1245_v23, %v1241_v20 }
 0x24a   :  { %v2516_v5 = vmul.f32 -1.442695, %v3129_v56  ;;  %v1215_v56 = vld [vmem:[#allocation5 + $0x80] sm:$0xff] }
 0x24b   :  { %v2517_v8 = vmul.f32 -1.442695, %v3130_v2  ;;  %v2518_v16 = vmul.f32 -1.442695, %v3146_v13  ;;  %v3958_v2 = vpack.c.bf16 %v1219_v59, %v1215_v56  ;;  %v4000_v56 = vpack.c.bf16 %v1252_v27, %v1248_v24  ;;  %v1250_v59 = vld [vmem:[#allocation5 + $0x198] sm:$0xff] }
 0x24c   :  { %3216 = vpow2.f32 %v2516_v5  ;;  %v1217_v5 = vld [vmem:[#allocation5 + $0x90] sm:$0xff] }
 0x24d   :  { %3218 = vpow2.f32 %v2517_v8  ;;  %v1221_v8 = vld [vmem:[#allocation5 + $0xb0] sm:$0xff] }
 0x24e   :  { %3220 = vpow2.f32 %v2518_v16  ;;  %v3961_v13 = vpack.c.bf16 %v1221_v8, %v1217_v5  ;;  %v1224_v16 = vld [vmem:[#allocation5 + $0xc8] sm:$0xff]  ;;  %v1254_v5 = vld [vmem:[#allocation5 + $0x1b8] sm:$0xff]  ;;  %v1247_v8 = vld [vmem:[#allocation5 + $0x180] sm:$0xff] }
 0x24f   :  { %3222 = vtanh.f32 %v3145_v19  ;;  %v1228_v19 = vld [vmem:[#allocation5 + $0xe8] sm:$0xff] }
 0x256   :  { %v3217_v22 = vpop.eup %3216 }
 0x257   :  { %v3219_v26 = vpop.eup %3218  ;;  %v892_v29 = vadd.f32 1.0, %v3217_v22  ;;  %v1226_v22 = vld [vmem:[#allocation5 + $0xd8] sm:$0xff] }
 0x258   :  { %v898_v32 = vadd.f32 1.0, %v3219_v26  ;;  %v3221_v35 = vpop.eup %3220  ;;  %v3966_v26 = vpack.c.bf16 %v1228_v19, %v1224_v16  ;;  %v4002_v16 = vpack.c.bf16 %v1254_v5, %v1250_v59  ;;  %v1251_v19 = vld [vmem:[#allocation5 + $0x1a0] sm:$0xff] }
 0x259   :  { %3224 = vrcp.f32 %v892_v29  ;;  %v3223_v39 = vpop.eup %3222  ;;  %v905_v51 = vadd.f32 1.0, %v3221_v35  ;;  %v1230_v29 = vld [vmem:[#allocation5 + $0xf8] sm:$0xff]  ;;  %v1227_v35 = vld [vmem:[#allocation5 + $0xe0] sm:$0xff] }
 0x25a   :  { %3226 = vrcp.f32 %v898_v32  ;;  %v1223_v32 = vld [vmem:[#allocation5 + $0xc0] sm:$0xff] }
 0x25b   :  { %3228 = vrcp.f32 %v905_v51  ;;  %v1229_v51 = vld [vmem:[#allocation5 + $0xf0] sm:$0xff] }
 0x263   :  { %v3225_v43 = vpop.eup %3224 }
 0x264   :  { %v3227_v47 = vpop.eup %3226  ;;  %v909_v57 = vmul.f32 %v3225_v43, %v3223_v39  ;;  %v3968_v39 = vpack.c.bf16 %v1230_v29, %v1226_v22  ;;  %v3970_v43 = vpack.c.bf16 %v1227_v35, %v1223_v32  ;;  %v1249_v22 = vld [vmem:[#allocation5 + $0x190] sm:$0xff]  ;;  %v4005_v32 = vpack.c.bf16 %v1251_v19, %v1247_v8  ;;  %v1256_v35 = vld [vmem:[#allocation5 + $0x1c8] sm:$0xff] }
 0x265   :  { %v908_v61 = vmul.f32 %v3227_v47, %v3864_v18  ;;  %v3229_v12 = vpop.eup %3228  ;;  %v1225_v47 = vld [vmem:[#allocation5 + $0xd0] sm:$0xff] }
 0x266   :  { %v1253_v29 = vld [vmem:[#allocation5 + $0x1b0] sm:$0xff] }
 0x267   :  { %v3911_v1 = vadd.f32 %v909_v57, %v908_v61  ;;  %v3973_v57 = vpack.c.bf16 %v1229_v51, %v1225_v47  ;;  %v1232_v61 = vld [vmem:[#allocation5 + $0x108] sm:$0xff]  ;;  %v1258_v51 = vld [vmem:[#allocation5 + $0x1d8] sm:$0xff] }
 0x268   :  { %v1260_v47 = vld [vmem:[#allocation5 + $0x1e8] sm:$0xff] }
 0x269   :  { %3230 = vtanh.f32 %v3911_v1 }
 0x273   :  { %v3231_v17 = vpop.eup %3230 }
 0x274   :  { %v912_v21 = vmul.f32 %v3231_v17, %v3229_v12  ;;  %v1236_v12 = vld [vmem:[#allocation5 + $0x128] sm:$0xff]  ;;  %v1234_v17 = vld [vmem:[#allocation5 + $0x118] sm:$0xff] }
 0x276   :  { %v920_v30 = vmul.f32 %v3914_v6, %v912_v21  ;;  %v3978_v21 = vpack.c.bf16 %v1236_v12, %v1232_v61  ;;  %v4009_v61 = vpack.c.bf16 %v1253_v29, %v1249_v22  ;;  %v4011_v12 = vpack.c.bf16 %v1260_v47, %v1256_v35 }
 0x277   :  { %v929_v47 = vmul.f32 %v3914_v6, %v3911_v1 }
 0x278   :  { %v3921_v33 = vadd.f32 %v927_v28, %v920_v30  ;;  %2520 = vst [vmem:[%s4265_s6 + $0x8] sm:$0xff] %v920_v30  ;;  %v1238_v28 = vld [vmem:[#allocation5 + $0x138] sm:$0xff]  ;;  %v1231_v30 = vld [vmem:[#allocation5 + $0x100] sm:$0xff] }
 0x279   :  { %v3980_v36 = vpack.c.bf16 %v1238_v28, %v1234_v17  ;;  %v3982_v38 = vpack.c.bf16 %v1235_v34, %v1231_v30  ;;  %v1262_v17 = vld [vmem:[#allocation5 + $0x1f8] sm:$0xff]  ;;  %v1255_v28 = vld [vmem:[#allocation5 + $0x1c0] sm:$0xff] }
 0x27a   :  { %1068 = vmatmul.mubr.f32.vlgmr.msra.gmra.mrb[4].mxu0 %v3921_v33  ;;  %1139 = vmatmul.mubr.f32.vlgmr.msra.gmra.mrb[4].mxu1 %v3921_v33  ;;  %v1259_v30 = vld [vmem:[#allocation5 + $0x1e0] sm:$0xff]  ;;  %v4014_v34 = vpack.c.bf16 %v1262_v17, %v1258_v51  ;;  %v930_v17 = vmul.f32 %v3916_v25, %v3864_v18  ;;  %v4044_v18 = vpop.permute.xlu1 %1184 }
 0x27b   :  { %1327 = vmatprep.mubr.f32.mxu0 %v3357_v9  ;;  %1398 = vmatprep.mubr.f32.mxu1 %v3357_v9  ;;  %v4017_v46 = vpack.c.bf16 %v1259_v30, %v1255_v28  ;;  %v1187_v25 = vmul.f32 %v4044_v18, %v3921_v33 }
 0x27c   :  { %2810 = vmatpush1.bf16.msra.mxu0 %v3934_v49  ;;  %2842 = vmatpush1.bf16.msra.mxu1 %v3937_v55  ;;  %v4036_v42 = vadd.f32 %v930_v17, %v929_v47 }
 0x27d   :  { %2812 = vmatprep.subr.bf16.mxu0 %v3942_v0  ;;  %2844 = vmatprep.subr.bf16.mxu1 %v3944_v14 }
 0x280   :  { %2814 = vmatpush1.bf16.msra.mxu0 %v3946_v15  ;;  %2846 = vmatpush1.bf16.msra.mxu1 %v3949_v44 }
 0x281   :  { %2816 = vmatprep.subr.bf16.mxu0 %v3954_v50  ;;  %2848 = vmatprep.subr.bf16.mxu1 %v3956_v63 }
 0x284   :  { %2818 = vmatpush1.bf16.msra.mxu0 %v3958_v2  ;;  %2850 = vmatpush1.bf16.msra.mxu1 %v3961_v13 }
 0x285   :  { %2820 = vmatprep.subr.bf16.mxu0 %v3966_v26  ;;  %2852 = vmatprep.subr.bf16.mxu1 %v3968_v39 }
 0x288   :  { %2822 = vmatpush1.bf16.msra.mxu0 %v3970_v43  ;;  %2854 = vmatpush1.bf16.msra.mxu1 %v3973_v57 }
 0x289   :  { %2824 = vmatprep.subr.bf16.mxu0 %v3978_v21  ;;  %2856 = vmatprep.subr.bf16.mxu1 %v3980_v36 }
 0x28c   :  { %2826 = vmatpush1.bf16.msra.mxu0 %v3982_v38  ;;  %2858 = vmatpush1.bf16.msra.mxu1 %v3985_v52 }
 0x28d   :  { %2828 = vmatprep.subr.bf16.mxu0 %v3989_v62  ;;  %2860 = vmatprep.subr.bf16.mxu1 %v3991_v3 }
 0x290   :  { %2830 = vmatpush1.bf16.msra.mxu0 %v3994_v41  ;;  %2862 = vmatpush1.bf16.msra.mxu1 %v3998_v53 }
 0x291   :  { %2832 = vmatprep.subr.bf16.mxu0 %v4000_v56  ;;  %2864 = vmatprep.subr.bf16.mxu1 %v4002_v16 }
 0x294   :  { %2834 = vmatpush1.bf16.msra.mxu0 %v4005_v32  ;;  %2866 = vmatpush1.bf16.msra.mxu1 %v4009_v61 }
 0x295   :  { %2836 = vmatprep.subr.bf16.mxu0 %v4011_v12  ;;  %2868 = vmatprep.subr.bf16.mxu1 %v4014_v34 }
 0x298   :  { %2838 = vmatpush1.bf16.msra.mxu0 %v4017_v46  ;;  %2870 = vmatpush1.bf16.msra.mxu1 %v4021_v54 }
 0x299   :  { %2872 = vmatprep.subr.bf16.mxu0 %v3930_v40  ;;  %2904 = vmatprep.subr.bf16.mxu1 %v3932_v48 }
 0x34d   :  { %v1069_v58 = vpop.f32.mrb[4].mxu0  ;;  %v1140_v60 = vpop.f32.mrb[4].mxu1 }
 0x34e   :  { %v3131_v4 = vadd.f32 %v1069_v58, %v3849_v10  ;;  %v1071_v7 = vpop.f32.mrb[5].mxu0  ;;  %v1142_v20 = vpop.f32.mrb[5].mxu1  ;;  %v3147_v8 = vadd.f32 %v1140_v60, %v3858_v37 }
 0x34f   :  { %v3132_v23 = vadd.f32 %v1071_v7, %v3851_v11  ;;  %v3148_v59 = vadd.f32 %v1142_v20, %v3855_v31 }
 0x350   :  { %v2521_v24 = vmul.f32 -1.442695, %v3131_v4 }
 0x351   :  { %v2522_v27 = vmul.f32 -1.442695, %v3132_v23  ;;  %v2523_v5 = vmul.f32 -1.442695, %v3148_v59  ;;  %v4042_v23 = vpop.permute.xlu0 %1177 }
 0x352   :  { %3232 = vpow2.f32 %v2521_v24 }
 0x353   :  { %3234 = vpow2.f32 %v2522_v27 }
 0x354   :  { %3236 = vpow2.f32 %v2523_v5 }
 0x355   :  { %3238 = vtanh.f32 %v3147_v8 }
 0x35c   :  { %v3233_v19 = vpop.eup %3232 }
 0x35d   :  { %v3235_v22 = vpop.eup %3234  ;;  %v1152_v29 = vadd.f32 1.0, %v3233_v19 }
 0x35e   :  { %v1158_v35 = vadd.f32 1.0, %v3235_v22  ;;  %v3237_v51 = vpop.eup %3236 }
 0x35f   :  { %3240 = vrcp.f32 %v1152_v29  ;;  %v3239_v28 = vpop.eup %3238  ;;  %v1165_v60 = vadd.f32 1.0, %v3237_v51 }
 0x360   :  { %3242 = vrcp.f32 %v1158_v35 }
 0x361   :  { %3244 = vrcp.f32 %v1165_v60 }
 0x369   :  { %v3241_v30 = vpop.eup %3240 }
 0x36a   :  { %v3243_v45 = vpop.eup %3242  ;;  %v1169_v58 = vmul.f32 %v3241_v30, %v3239_v28 }
 0x36b   :  { %v1168_v4 = vmul.f32 %v3243_v45, %v4036_v42  ;;  %v3245_v20 = vpop.eup %3244 }
 0x36d   :  { %v4039_v7 = vadd.f32 %v1169_v58, %v1168_v4 }
 0x36f   :  { %3246 = vtanh.f32 %v4039_v7  ;;  %v1189_v60 = vmul.f32 %v4042_v23, %v4039_v7 }
 0x379   :  { %v3247_v1 = vpop.eup %3246 }
 0x37a   :  { %v1172_v6 = vmul.f32 %v3247_v1, %v3245_v20  ;;  %v1190_v20 = vmul.f32 %v4044_v18, %v4036_v42  ;;  %v4106_v42 = vpop.permute.xlu1 %1444 }
 0x37c   :  { %v1180_v24 = vmul.f32 %v4042_v23, %v1172_v6 }
 0x37e   :  { %v4049_v27 = vadd.f32 %v1187_v25, %v1180_v24  ;;  %2525 = vst [vmem:[%s4265_s6 + $0x10] sm:$0xff] %v1180_v24  ;;  %v4098_v25 = vadd.f32 %v1190_v20, %v1189_v60 }
 0x380   :  { %1328 = vmatmul.mubr.f32.vlgmr.msra.gmra.mrb[6].mxu0 %v4049_v27  ;;  %1399 = vmatmul.mubr.f32.vlgmr.msra.gmra.mrb[6].mxu1 %v4049_v27 }
 0x381   :  { %2874 = vmatpush1.bf16.msra.mxu0 %v3934_v49  ;;  %2906 = vmatpush1.bf16.msra.mxu1 %v3937_v55 }
 0x382   :  { %2876 = vmatprep.subr.bf16.mxu0 %v3942_v0  ;;  %2908 = vmatprep.subr.bf16.mxu1 %v3944_v14 }
 0x383   :  { %1587 = vmatprep.mubr.f32.mxu0 %v3357_v9  ;;  %1658 = vmatprep.mubr.f32.mxu1 %v3357_v9 }
 0x385   :  { %2878 = vmatpush1.bf16.msra.mxu0 %v3946_v15  ;;  %2910 = vmatpush1.bf16.msra.mxu1 %v3949_v44 }
 0x386   :  { %2880 = vmatprep.subr.bf16.mxu0 %v3954_v50  ;;  %2912 = vmatprep.subr.bf16.mxu1 %v3956_v63 }
 0x389   :  { %2882 = vmatpush1.bf16.msra.mxu0 %v3958_v2  ;;  %2914 = vmatpush1.bf16.msra.mxu1 %v3961_v13 }
 0x38a   :  { %2884 = vmatprep.subr.bf16.mxu0 %v3966_v26  ;;  %2916 = vmatprep.subr.bf16.mxu1 %v3968_v39 }
 0x38d   :  { %2886 = vmatpush1.bf16.msra.mxu0 %v3970_v43  ;;  %2918 = vmatpush1.bf16.msra.mxu1 %v3973_v57 }
 0x38e   :  { %2888 = vmatprep.subr.bf16.mxu0 %v3978_v21  ;;  %2920 = vmatprep.subr.bf16.mxu1 %v3980_v36 }
 0x391   :  { %2890 = vmatpush1.bf16.msra.mxu0 %v3982_v38  ;;  %2922 = vmatpush1.bf16.msra.mxu1 %v3985_v52 }
 0x392   :  { %2892 = vmatprep.subr.bf16.mxu0 %v3989_v62  ;;  %2924 = vmatprep.subr.bf16.mxu1 %v3991_v3 }
 0x395   :  { %2894 = vmatpush1.bf16.msra.mxu0 %v3994_v41  ;;  %2926 = vmatpush1.bf16.msra.mxu1 %v3998_v53 }
 0x396   :  { %2896 = vmatprep.subr.bf16.mxu0 %v4000_v56  ;;  %2928 = vmatprep.subr.bf16.mxu1 %v4002_v16 }
 0x399   :  { %2898 = vmatpush1.bf16.msra.mxu0 %v4005_v32  ;;  %2930 = vmatpush1.bf16.msra.mxu1 %v4009_v61 }
 0x39a   :  { %2900 = vmatprep.subr.bf16.mxu0 %v4011_v12  ;;  %2932 = vmatprep.subr.bf16.mxu1 %v4014_v34 }
 0x39d   :  { %2902 = vmatpush1.bf16.msra.mxu0 %v4017_v46  ;;  %2934 = vmatpush1.bf16.msra.mxu1 %v4021_v54 }
 0x39e   :  { %2936 = vmatprep.subr.bf16.mxu0 %v3930_v40  ;;  %2968 = vmatprep.subr.bf16.mxu1 %v3932_v48 }
 0x453   :  { %v1329_v33 = vpop.f32.mrb[6].mxu0  ;;  %v1400_v59 = vpop.f32.mrb[6].mxu1 }
 0x454   :  { %v3133_v5 = vadd.f32 %v1329_v33, %v3849_v10  ;;  %v1331_v8 = vpop.f32.mrb[7].mxu0  ;;  %v1402_v19 = vpop.f32.mrb[7].mxu1  ;;  %v3149_v17 = vadd.f32 %v1400_v59, %v3858_v37 }
 0x455   :  { %v3134_v22 = vadd.f32 %v1331_v8, %v3851_v11  ;;  %v3150_v47 = vadd.f32 %v1402_v19, %v3855_v31 }
 0x456   :  { %v2526_v29 = vmul.f32 -1.442695, %v3133_v5 }
 0x457   :  { %v2527_v35 = vmul.f32 -1.442695, %v3134_v22  ;;  %v2528_v51 = vmul.f32 -1.442695, %v3150_v47  ;;  %v4104_v22 = vpop.permute.xlu0 %1437 }
 0x458   :  { %3248 = vpow2.f32 %v2526_v29  ;;  %v1447_v29 = vmul.f32 %v4106_v42, %v4049_v27 }
 0x459   :  { %3250 = vpow2.f32 %v2527_v35 }
 0x45a   :  { %3252 = vpow2.f32 %v2528_v51 }
 0x45b   :  { %3254 = vtanh.f32 %v3149_v17 }
 0x462   :  { %v3249_v28 = vpop.eup %3248 }
 0x463   :  { %v3251_v30 = vpop.eup %3250  ;;  %v1412_v45 = vadd.f32 1.0, %v3249_v28 }
 0x464   :  { %v1418_v58 = vadd.f32 1.0, %v3251_v30  ;;  %v3253_v4 = vpop.eup %3252 }
 0x465   :  { %3256 = vrcp.f32 %v1412_v45  ;;  %v3255_v1 = vpop.eup %3254  ;;  %v1425_v59 = vadd.f32 1.0, %v3253_v4 }
 0x466   :  { %3258 = vrcp.f32 %v1418_v58 }
 0x467   :  { %3260 = vrcp.f32 %v1425_v59  ;;  %v1450_v59 = vmul.f32 %v4106_v42, %v4098_v25 }
 0x46f   :  { %v3257_v6 = vpop.eup %3256 }
 0x470   :  { %v3259_v24 = vpop.eup %3258  ;;  %v1429_v33 = vmul.f32 %v3257_v6, %v3255_v1 }
 0x471   :  { %v1428_v5 = vmul.f32 %v3259_v24, %v4098_v25  ;;  %v3261_v19 = vpop.eup %3260 }
 0x473   :  { %v4101_v8 = vadd.f32 %v1429_v33, %v1428_v5 }
 0x475   :  { %3262 = vtanh.f32 %v4101_v8  ;;  %v1449_v24 = vmul.f32 %v4104_v22, %v4101_v8 }
 0x47f   :  { %v3263_v7 = vpop.eup %3262 }
 0x480   :  { %v1432_v23 = vmul.f32 %v3263_v7, %v3261_v19  ;;  %v4160_v7 = vadd.f32 %v1450_v59, %v1449_v24  ;;  %v2243_v24 = vld [vmem:[#allocation5 + $0x20] sm:$0xff] }
 0x482   :  { %v1440_v18 = vmul.f32 %v4104_v22, %v1432_v23 }
 0x484   :  { %v4111_v35 = vadd.f32 %v1447_v29, %v1440_v18  ;;  %2530 = vst [vmem:[%s4265_s6 + $0x18] sm:$0xff] %v1440_v18 }
 0x486   :  { %1588 = vmatmul.mubr.f32.vlgmr.msra.gmra.mrb[8].mxu0 %v4111_v35  ;;  %1659 = vmatmul.mubr.f32.vlgmr.msra.gmra.mrb[8].mxu1 %v4111_v35 }
 0x487   :  { %2938 = vmatpush1.bf16.msra.mxu0 %v3934_v49  ;;  %2970 = vmatpush1.bf16.msra.mxu1 %v3937_v55 }
 0x488   :  { %2940 = vmatprep.subr.bf16.mxu0 %v3942_v0  ;;  %2972 = vmatprep.subr.bf16.mxu1 %v3944_v14 }
 0x489   :  { %1847 = vmatprep.mubr.f32.mxu0 %v3357_v9  ;;  %1918 = vmatprep.mubr.f32.mxu1 %v3357_v9 }
 0x48b   :  { %2942 = vmatpush1.bf16.msra.mxu0 %v3946_v15  ;;  %2974 = vmatpush1.bf16.msra.mxu1 %v3949_v44 }
 0x48c   :  { %2944 = vmatprep.subr.bf16.mxu0 %v3954_v50  ;;  %2976 = vmatprep.subr.bf16.mxu1 %v3956_v63 }
 0x48f   :  { %2946 = vmatpush1.bf16.msra.mxu0 %v3958_v2  ;;  %2978 = vmatpush1.bf16.msra.mxu1 %v3961_v13 }
 0x490   :  { %2948 = vmatprep.subr.bf16.mxu0 %v3966_v26  ;;  %2980 = vmatprep.subr.bf16.mxu1 %v3968_v39 }
 0x493   :  { %2950 = vmatpush1.bf16.msra.mxu0 %v3970_v43  ;;  %2982 = vmatpush1.bf16.msra.mxu1 %v3973_v57 }
 0x494   :  { %2952 = vmatprep.subr.bf16.mxu0 %v3978_v21  ;;  %2984 = vmatprep.subr.bf16.mxu1 %v3980_v36 }
 0x497   :  { %2954 = vmatpush1.bf16.msra.mxu0 %v3982_v38  ;;  %2986 = vmatpush1.bf16.msra.mxu1 %v3985_v52 }
 0x498   :  { %2956 = vmatprep.subr.bf16.mxu0 %v3989_v62  ;;  %2988 = vmatprep.subr.bf16.mxu1 %v3991_v3 }
 0x49b   :  { %2958 = vmatpush1.bf16.msra.mxu0 %v3994_v41  ;;  %2990 = vmatpush1.bf16.msra.mxu1 %v3998_v53 }
 0x49c   :  { %2960 = vmatprep.subr.bf16.mxu0 %v4000_v56  ;;  %2992 = vmatprep.subr.bf16.mxu1 %v4002_v16 }
 0x49f   :  { %2962 = vmatpush1.bf16.msra.mxu0 %v4005_v32  ;;  %2994 = vmatpush1.bf16.msra.mxu1 %v4009_v61 }
 0x4a0   :  { %2964 = vmatprep.subr.bf16.mxu0 %v4011_v12  ;;  %2996 = vmatprep.subr.bf16.mxu1 %v4014_v34 }
 0x4a3   :  { %2966 = vmatpush1.bf16.msra.mxu0 %v4017_v46  ;;  %2998 = vmatpush1.bf16.msra.mxu1 %v4021_v54 }
 0x4a4   :  { %3000 = vmatprep.subr.bf16.mxu0 %v3930_v40  ;;  %3032 = vmatprep.subr.bf16.mxu1 %v3932_v48 }
 0x559   :  { %v1589_v27 = vpop.f32.mrb[8].mxu0  ;;  %v1660_v47 = vpop.f32.mrb[8].mxu1 }
 0x55a   :  { %v3135_v51 = vadd.f32 %v1589_v27, %v3849_v10  ;;  %v1591_v17 = vpop.f32.mrb[9].mxu0  ;;  %v1662_v28 = vpop.f32.mrb[9].mxu1  ;;  %v3151_v20 = vadd.f32 %v1660_v47, %v3858_v37 }
 0x55b   :  { %v3136_v30 = vadd.f32 %v1591_v17, %v3851_v11  ;;  %v3152_v60 = vadd.f32 %v1662_v28, %v3855_v31  ;;  %v1698_v17 = vpop.permute.xlu0 %1697  ;;  %v1705_v28 = vpop.permute.xlu1 %1704 }
 0x55c   :  { %v2531_v45 = vmul.f32 -1.442695, %v3135_v51  ;;  %v1707_v42 = vmul.f32 %v1705_v28, %v4111_v35 }
 0x55d   :  { %v2532_v58 = vmul.f32 -1.442695, %v3136_v30  ;;  %v2533_v4 = vmul.f32 -1.442695, %v3152_v60 }
 0x55e   :  { %3264 = vpow2.f32 %v2531_v45 }
 0x55f   :  { %3266 = vpow2.f32 %v2532_v58  ;;  %v4220_v35 = vpop.permute.xlu1 %1964 }
 0x560   :  { %3268 = vpow2.f32 %v2533_v4  ;;  %v2240_v4 = vld [vmem:[#allocation5 + $0x8] sm:$0xff] }
 0x561   :  { %3270 = vtanh.f32 %v3151_v20  ;;  %v2244_v20 = vld [vmem:[#allocation5 + $0x28] sm:$0xff] }
 0x568   :  { %v3265_v40 = vpop.eup %3264 }
 0x569   :  { %v3267_v1 = vpop.eup %3266  ;;  %v1672_v48 = vadd.f32 1.0, %v3265_v40  ;;  %v2242_v40 = vld [vmem:[#allocation5 + $0x18] sm:$0xff] }
 0x56a   :  { %v1678_v6 = vadd.f32 1.0, %v3267_v1  ;;  %v3269_v33 = vpop.eup %3268  ;;  %v3063_v1 = vpack.c.bf16 %v2244_v20, %v2240_v4 }
 0x56b   :  { %3272 = vrcp.f32 %v1672_v48  ;;  %v3271_v5 = vpop.eup %3270  ;;  %v1685_v29 = vadd.f32 1.0, %v3269_v33  ;;  %v2246_v48 = vld [vmem:[#allocation5 + $0x38] sm:$0xff] }
 0x56c   :  { %3274 = vrcp.f32 %v1678_v6  ;;  %v2239_v6 = vld [vmem:[#allocation5] sm:$0xff]  ;;  %v3095_v33 = vpack.c.bf16 %v2246_v48, %v2242_v40  ;;  %v2273_v40 = vld [vmem:[#allocation5 + $0x110] sm:$0xff]  ;;  %v2280_v48 = vld [vmem:[#allocation5 + $0x148] sm:$0xff] }
 0x56d   :  { %3276 = vrcp.f32 %v1685_v29  ;;  %v3065_v59 = vpack.c.bf16 %v2243_v24, %v2239_v6  ;;  %v2250_v29 = vld [vmem:[#allocation5 + $0x58] sm:$0xff]  ;;  %v2284_v24 = vld [vmem:[#allocation5 + $0x168] sm:$0xff] }
 0x575   :  { %v3273_v19 = vpop.eup %3272 }
 0x576   :  { %v3275_v23 = vpop.eup %3274  ;;  %v1689_v18 = vmul.f32 %v3273_v19, %v3271_v5  ;;  %v2241_v5 = vld [vmem:[#allocation5 + $0x10] sm:$0xff] }
 0x577   :  { %v1688_v27 = vmul.f32 %v3275_v23, %v4160_v7  ;;  %v3277_v51 = vpop.eup %3276  ;;  %v2245_v19 = vld [vmem:[#allocation5 + $0x30] sm:$0xff]  ;;  %v2248_v23 = vld [vmem:[#allocation5 + $0x48] sm:$0xff] }
 0x579   :  { %v4163_v47 = vadd.f32 %v1689_v18, %v1688_v27  ;;  %v2252_v18 = vld [vmem:[#allocation5 + $0x68] sm:$0xff]  ;;  %v2254_v27 = vld [vmem:[#allocation5 + $0x78] sm:$0xff] }
 0x57b   :  { %3278 = vtanh.f32 %v4163_v47 }
 0x585   :  { %v3279_v8 = vpop.eup %3278 }
 0x586   :  { %v1692_v22 = vmul.f32 %v3279_v8, %v3277_v51  ;;  %v2251_v51 = vld [vmem:[#allocation5 + $0x60] sm:$0xff]  ;;  %v3099_v8 = vpack.c.bf16 %v2254_v27, %v2250_v29  ;;  %v2288_v27 = vld [vmem:[#allocation5 + $0x188] sm:$0xff] }
 0x588   :  { %v1700_v25 = vmul.f32 %v1698_v17, %v1692_v22 }
 0x58a   :  { %v4167_v30 = vadd.f32 %v1707_v42, %v1700_v25  ;;  %2535 = vst [vmem:[%s4265_s6 + $0x20] sm:$0xff] %v1700_v25  ;;  %v2256_v42 = vld [vmem:[#allocation5 + $0x88] sm:$0xff] }
 0x58c   :  { %1848 = vmatmul.mubr.f32.vlgmr.msra.gmra.mrb[10].mxu0 %v4167_v30  ;;  %1919 = vmatmul.mubr.f32.vlgmr.msra.gmra.mrb[10].mxu1 %v4167_v30  ;;  %v1967_v58 = vmul.f32 %v4220_v35, %v4167_v30  ;;  %v2260_v30 = vld [vmem:[#allocation5 + $0xa8] sm:$0xff] }
 0x58d   :  { %3002 = vmatpush1.bf16.msra.mxu0 %v3934_v49  ;;  %3034 = vmatpush1.bf16.msra.mxu1 %v3937_v55 }
 0x58e   :  { %3004 = vmatprep.subr.bf16.mxu0 %v3942_v0  ;;  %3036 = vmatprep.subr.bf16.mxu1 %v3944_v14 }
 0x58f   :  { %2107 = vmatprep.mubr.f32.mxu0 %v3357_v9  ;;  %2178 = vmatprep.mubr.f32.mxu1 %v3357_v9 }
 0x591   :  { %3006 = vmatpush1.bf16.msra.mxu0 %v3946_v15  ;;  %3038 = vmatpush1.bf16.msra.mxu1 %v3949_v44 }
 0x592   :  { %3008 = vmatprep.subr.bf16.mxu0 %v3954_v50  ;;  %3040 = vmatprep.subr.bf16.mxu1 %v3956_v63 }
 0x595   :  { %3010 = vmatpush1.bf16.msra.mxu0 %v3958_v2  ;;  %3042 = vmatpush1.bf16.msra.mxu1 %v3961_v13 }
 0x596   :  { %3012 = vmatprep.subr.bf16.mxu0 %v3966_v26  ;;  %3044 = vmatprep.subr.bf16.mxu1 %v3968_v39 }
 0x599   :  { %3014 = vmatpush1.bf16.msra.mxu0 %v3970_v43  ;;  %3046 = vmatpush1.bf16.msra.mxu1 %v3973_v57 }
 0x59a   :  { %3016 = vmatprep.subr.bf16.mxu0 %v3978_v21  ;;  %3048 = vmatprep.subr.bf16.mxu1 %v3980_v36  ;;  %v1709_v36 = vmul.f32 %v1698_v17, %v4163_v47  ;;  %v2247_v47 = vld [vmem:[#allocation5 + $0x40] sm:$0xff]  ;;  %v2249_v17 = vld [vmem:[#allocation5 + $0x50] sm:$0xff] }
 0x59b   :  { %v3069_v22 = vpack.c.bf16 %v2251_v51, %v2247_v47  ;;  %v2292_v47 = vld [vmem:[#allocation5 + $0x1a8] sm:$0xff] }
 0x59d   :  { %3018 = vmatpush1.bf16.msra.mxu0 %v3982_v38  ;;  %3050 = vmatpush1.bf16.msra.mxu1 %v3985_v52  ;;  %v1710_v52 = vmul.f32 %v1705_v28, %v4160_v7  ;;  %v3097_v7 = vpack.c.bf16 %v2245_v19, %v2241_v5  ;;  %v2253_v28 = vld [vmem:[#allocation5 + $0x70] sm:$0xff]  ;;  %v3083_v5 = vpack.c.bf16 %v2284_v24, %v2280_v48 }
 0x59e   :  { %3020 = vmatprep.subr.bf16.mxu0 %v3989_v62  ;;  %3052 = vmatprep.subr.bf16.mxu1 %v3991_v3  ;;  %v3101_v25 = vpack.c.bf16 %v2253_v28, %v2249_v17  ;;  %v2294_v17 = vld [vmem:[#allocation5 + $0x1b8] sm:$0xff]  ;;  %v2287_v28 = vld [vmem:[#allocation5 + $0x180] sm:$0xff] }
 0x5a1   :  { %3022 = vmatpush1.bf16.msra.mxu0 %v3994_v41  ;;  %3054 = vmatpush1.bf16.msra.mxu1 %v3998_v53  ;;  %v4212_v41 = vadd.f32 %v1710_v52, %v1709_v36  ;;  %v2263_v36 = vld [vmem:[#allocation5 + $0xc0] sm:$0xff] }
 0x5a2   :  { %3024 = vmatprep.subr.bf16.mxu0 %v4000_v56  ;;  %3056 = vmatprep.subr.bf16.mxu1 %v4002_v16 }
 0x5a5   :  { %3026 = vmatpush1.bf16.msra.mxu0 %v4005_v32  ;;  %3058 = vmatpush1.bf16.msra.mxu1 %v4009_v61 }
 0x5a6   :  { %3028 = vmatprep.subr.bf16.mxu0 %v4011_v12  ;;  %3060 = vmatprep.subr.bf16.mxu1 %v4014_v34 }
 0x5a9   :  { %3030 = vmatpush1.bf16.msra.mxu0 %v4017_v46  ;;  %3062 = vmatpush1.bf16.msra.mxu1 %v4021_v54  ;;  %v4218_v54 = vpop.permute.xlu0 %1957 }
 0x5aa   :  { %3064 = vmatprep.subr.bf16.mxu0 %v3063_v1  ;;  %3096 = vmatprep.subr.bf16.mxu1 %v3095_v33  ;;  %v2277_v1 = vld [vmem:[#allocation5 + $0x130] sm:$0xff]  ;;  %v2282_v33 = vld [vmem:[#allocation5 + $0x158] sm:$0xff] }
 0x5ab   :  { %v3113_v6 = vpack.c.bf16 %v2277_v1, %v2273_v40  ;;  %v1970_v1 = vmul.f32 %v4220_v35, %v4212_v41 }
 0x65f   :  { %v1849_v49 = vpop.f32.mrb[10].mxu0  ;;  %v1920_v55 = vpop.f32.mrb[10].mxu1 }
 0x660   :  { %v3137_v0 = vadd.f32 %v1849_v49, %v3849_v10  ;;  %v1851_v14 = vpop.f32.mrb[11].mxu0  ;;  %v1922_v15 = vpop.f32.mrb[11].mxu1  ;;  %v3153_v26 = vadd.f32 %v1920_v55, %v3858_v37  ;;  %v2258_v49 = vld [vmem:[#allocation5 + $0x98] sm:$0xff]  ;;  %v3071_v55 = vpack.c.bf16 %v2260_v30, %v2256_v42  ;;  %v2291_v42 = vld [vmem:[#allocation5 + $0x1a0] sm:$0xff]  ;;  %v2289_v30 = vld [vmem:[#allocation5 + $0x190] sm:$0xff] }
 0x661   :  { %v3138_v44 = vadd.f32 %v1851_v14, %v3851_v11  ;;  %v3154_v2 = vadd.f32 %v1922_v15, %v3855_v31  ;;  %v2255_v14 = vld [vmem:[#allocation5 + $0x80] sm:$0xff] }
 0x662   :  { %v2536_v50 = vmul.f32 -1.442695, %v3137_v0  ;;  %v2262_v0 = vld [vmem:[#allocation5 + $0xb8] sm:$0xff]  ;;  %v2259_v15 = vld [vmem:[#allocation5 + $0xa0] sm:$0xff] }
 0x663   :  { %v2537_v63 = vmul.f32 -1.442695, %v3138_v44  ;;  %v2538_v13 = vmul.f32 -1.442695, %v3154_v2  ;;  %v3103_v44 = vpack.c.bf16 %v2262_v0, %v2258_v49  ;;  %v2261_v2 = vld [vmem:[#allocation5 + $0xb0] sm:$0xff]  ;;  %v2296_v0 = vld [vmem:[#allocation5 + $0x1c8] sm:$0xff] }
 0x664   :  { %3280 = vpow2.f32 %v2536_v50  ;;  %v3073_v50 = vpack.c.bf16 %v2259_v15, %v2255_v14  ;;  %v2293_v49 = vld [vmem:[#allocation5 + $0x1b0] sm:$0xff]  ;;  %v2300_v14 = vld [vmem:[#allocation5 + $0x1e8] sm:$0xff]  ;;  %v2298_v15 = vld [vmem:[#allocation5 + $0x1d8] sm:$0xff] }
 0x665   :  { %3282 = vpow2.f32 %v2537_v63  ;;  %v2257_v63 = vld [vmem:[#allocation5 + $0x90] sm:$0xff] }
 0x666   :  { %3284 = vpow2.f32 %v2538_v13  ;;  %v3105_v13 = vpack.c.bf16 %v2261_v2, %v2257_v63  ;;  %v2302_v63 = vld [vmem:[#allocation5 + $0x1f8] sm:$0xff]  ;;  %v2295_v2 = vld [vmem:[#allocation5 + $0x1c0] sm:$0xff] }
 0x667   :  { %3286 = vtanh.f32 %v3153_v26  ;;  %v2264_v26 = vld [vmem:[#allocation5 + $0xc8] sm:$0xff] }
 0x66e   :  { %v3281_v39 = vpop.eup %3280 }
 0x66f   :  { %v3283_v43 = vpop.eup %3282  ;;  %v1932_v57 = vadd.f32 1.0, %v3281_v39  ;;  %v2268_v39 = vld [vmem:[#allocation5 + $0xe8] sm:$0xff] }
 0x670   :  { %v1938_v21 = vadd.f32 1.0, %v3283_v43  ;;  %v3285_v38 = vpop.eup %3284  ;;  %v2266_v43 = vld [vmem:[#allocation5 + $0xd8] sm:$0xff] }
 0x671   :  { %3288 = vrcp.f32 %v1932_v57  ;;  %v3287_v62 = vpop.eup %3286  ;;  %v1945_v16 = vadd.f32 1.0, %v3285_v38  ;;  %v3075_v57 = vpack.c.bf16 %v2268_v39, %v2264_v26  ;;  %v2267_v38 = vld [vmem:[#allocation5 + $0xe0] sm:$0xff]  ;;  %v3123_v26 = vpack.c.bf16 %v2302_v63, %v2298_v15  ;;  %v2297_v39 = vld [vmem:[#allocation5 + $0x1d0] sm:$0xff] }
 0x672   :  { %3290 = vrcp.f32 %v1938_v21  ;;  %v2270_v21 = vld [vmem:[#allocation5 + $0xf8] sm:$0xff] }
 0x673   :  { %3292 = vrcp.f32 %v1945_v16  ;;  %v3107_v52 = vpack.c.bf16 %v2270_v21, %v2266_v43  ;;  %v2272_v16 = vld [vmem:[#allocation5 + $0x108] sm:$0xff]  ;;  %v2301_v43 = vld [vmem:[#allocation5 + $0x1f0] sm:$0xff] }
 0x674   :  { %v3125_v21 = vpack.c.bf16 %v2301_v43, %v2297_v39 }
 0x67b   :  { %v3289_v3 = vpop.eup %3288 }
 0x67c   :  { %v3291_v53 = vpop.eup %3290  ;;  %v1949_v56 = vmul.f32 %v3289_v3, %v3287_v62  ;;  %v3077_v62 = vpack.c.bf16 %v2267_v38, %v2263_v36  ;;  %v2265_v3 = vld [vmem:[#allocation5 + $0xd0] sm:$0xff] }
 0x67d   :  { %v1948_v32 = vmul.f32 %v3291_v53, %v4212_v41  ;;  %v3293_v12 = vpop.eup %3292  ;;  %v2269_v53 = vld [vmem:[#allocation5 + $0xf0] sm:$0xff] }
 0x67f   :  { %v4215_v61 = vadd.f32 %v1949_v56, %v1948_v32  ;;  %v3109_v56 = vpack.c.bf16 %v2269_v53, %v2265_v3  ;;  %v2276_v32 = vld [vmem:[#allocation5 + $0x128] sm:$0xff] }
 0x681   :  { %3294 = vtanh.f32 %v4215_v61 }
 0x68b   :  { %v3295_v34 = vpop.eup %3294 }
 0x68c   :  { %v1952_v46 = vmul.f32 %v3295_v34, %v3293_v12  ;;  %v2274_v12 = vld [vmem:[#allocation5 + $0x118] sm:$0xff]  ;;  %v3079_v34 = vpack.c.bf16 %v2276_v32, %v2272_v16 }
 0x68e   :  { %v1960_v45 = vmul.f32 %v4218_v54, %v1952_v46  ;;  %v2278_v46 = vld [vmem:[#allocation5 + $0x138] sm:$0xff] }
 0x68f   :  { %v3111_v4 = vpack.c.bf16 %v2278_v46, %v2274_v12 }
 0x690   :  { %v4225_v60 = vadd.f32 %v1967_v58, %v1960_v45  ;;  %2540 = vst [vmem:[%s4265_s6 + $0x28] sm:$0xff] %v1960_v45  ;;  %v2271_v45 = vld [vmem:[#allocation5 + $0x100] sm:$0xff] }
 0x691   :  { %v2275_v58 = vld [vmem:[#allocation5 + $0x120] sm:$0xff] }
 0x692   :  { %2108 = vmatmul.mubr.f32.vlgmr.msra.gmra.mrb[12].mxu0 %v4225_v60  ;;  %2179 = vmatmul.mubr.f32.vlgmr.msra.gmra.mrb[12].mxu1 %v4225_v60  ;;  %v3081_v20 = vpack.c.bf16 %v2275_v58, %v2271_v45 }
 0x693   :  { %2367 = vmatprep.mubr.f32.mxu0 %v3357_v9  ;;  %2438 = vmatprep.mubr.f32.mxu1 %v3357_v9  ;;  %v3067_v9 = vpack.c.bf16 %v2252_v18, %v2248_v23  ;;  %v2283_v23 = vld [vmem:[#allocation5 + $0x160] sm:$0xff]  ;;  %v2281_v18 = vld [vmem:[#allocation5 + $0x150] sm:$0xff] }
 0x694   :  { %3066 = vmatpush1.bf16.msra.mxu0 %v3065_v59  ;;  %3098 = vmatpush1.bf16.msra.mxu1 %v3097_v7  ;;  %v2286_v59 = vld [vmem:[#allocation5 + $0x178] sm:$0xff]  ;;  %v2279_v7 = vld [vmem:[#allocation5 + $0x140] sm:$0xff] }
 0x695   :  { %3068 = vmatprep.subr.bf16.mxu0 %v3067_v9  ;;  %3100 = vmatprep.subr.bf16.mxu1 %v3099_v8  ;;  %v3115_v19 = vpack.c.bf16 %v2286_v59, %v2282_v33  ;;  %v3085_v29 = vpack.c.bf16 %v2283_v23, %v2279_v7  ;;  %v2285_v9 = vld [vmem:[#allocation5 + $0x170] sm:$0xff]  ;;  %v3087_v8 = vpack.c.bf16 %v2292_v47, %v2288_v27  ;;  %v2225_v27 = vpop.permute.xlu1 %2224 }
 0x696   :  { %v3117_v51 = vpack.c.bf16 %v2285_v9, %v2281_v18  ;;  %v2218_v9 = vpop.permute.xlu0 %2217 }
 0x698   :  { %3070 = vmatpush1.bf16.msra.mxu0 %v3069_v22  ;;  %3102 = vmatpush1.bf16.msra.mxu1 %v3101_v25  ;;  %v2290_v22 = vld [vmem:[#allocation5 + $0x198] sm:$0xff] }
 0x699   :  { %3072 = vmatprep.subr.bf16.mxu0 %v3071_v55  ;;  %3104 = vmatprep.subr.bf16.mxu1 %v3103_v44  ;;  %v3119_v25 = vpack.c.bf16 %v2294_v17, %v2290_v22  ;;  %v3089_v55 = vpack.c.bf16 %v2291_v42, %v2287_v28  ;;  %v3121_v44 = vpack.c.bf16 %v2293_v49, %v2289_v30  ;;  %v2485_v43 = vpop.permute.xlu1 %2484 }
 0x69c   :  { %3074 = vmatpush1.bf16.msra.mxu0 %v3073_v50  ;;  %3106 = vmatpush1.bf16.msra.mxu1 %v3105_v13  ;;  %v3091_v50 = vpack.c.bf16 %v2300_v14, %v2296_v0  ;;  %v2299_v13 = vld [vmem:[#allocation5 + $0x1e0] sm:$0xff] }
 0x69d   :  { %3076 = vmatprep.subr.bf16.mxu0 %v3075_v57  ;;  %3108 = vmatprep.subr.bf16.mxu1 %v3107_v52  ;;  %v3093_v57 = vpack.c.bf16 %v2299_v13, %v2295_v2 }
 0x6a0   :  { %3078 = vmatpush1.bf16.msra.mxu0 %v3077_v62  ;;  %3110 = vmatpush1.bf16.msra.mxu1 %v3109_v56 }
 0x6a1   :  { %3080 = vmatprep.subr.bf16.mxu0 %v3079_v34  ;;  %3112 = vmatprep.subr.bf16.mxu1 %v3111_v4 }
 0x6a4   :  { %3082 = vmatpush1.bf16.msra.mxu0 %v3081_v20  ;;  %3114 = vmatpush1.bf16.msra.mxu1 %v3113_v6  ;;  %v1969_v20 = vmul.f32 %v4218_v54, %v4215_v61  ;;  %v2227_v54 = vmul.f32 %v2225_v27, %v4225_v60 }
 0x6a5   :  { %3084 = vmatprep.subr.bf16.mxu0 %v3083_v5  ;;  %3116 = vmatprep.subr.bf16.mxu1 %v3115_v19 }
 0x6a6   :  { %v1971_v24 = vadd.f32 %v1970_v1, %v1969_v20 }
 0x6a8   :  { %3086 = vmatpush1.bf16.msra.mxu0 %v3085_v29  ;;  %3118 = vmatpush1.bf16.msra.mxu1 %v3117_v51 }
 0x6a9   :  { %3088 = vmatprep.subr.bf16.mxu0 %v3087_v8  ;;  %3120 = vmatprep.subr.bf16.mxu1 %v3119_v25 }
 0x6ac   :  { %3090 = vmatpush1.bf16.msra.mxu0 %v3089_v55  ;;  %3122 = vmatpush1.bf16.msra.mxu1 %v3121_v44 }
 0x6ad   :  { %3092 = vmatprep.subr.bf16.mxu0 %v3091_v50  ;;  %3124 = vmatprep.subr.bf16.mxu1 %v3123_v26 }
 0x6b0   :  { %3094 = vmatpush1.bf16.msra.mxu0 %v3093_v57  ;;  %3126 = vmatpush1.bf16.msra.mxu1 %v3125_v21 }
 0x765   :  { %v2109_v36 = vpop.f32.mrb[12].mxu0  ;;  %v2180_v38 = vpop.f32.mrb[12].mxu1 }
 0x766   :  { %v3139_v52 = vadd.f32 %v2109_v36, %v3849_v10  ;;  %v2111_v62 = vpop.f32.mrb[13].mxu0  ;;  %v2182_v3 = vpop.f32.mrb[13].mxu1  ;;  %v3155_v34 = vadd.f32 %v2180_v38, %v3858_v37 }
 0x767   :  { %v3140_v53 = vadd.f32 %v2111_v62, %v3851_v11  ;;  %v3156_v32 = vadd.f32 %v2182_v3, %v3855_v31 }
 0x768   :  { %v2541_v56 = vmul.f32 -1.442695, %v3139_v52 }
 0x769   :  { %v2542_v16 = vmul.f32 -1.442695, %v3140_v53  ;;  %v2543_v12 = vmul.f32 -1.442695, %v3156_v32 }
 0x76a   :  { %3296 = vpow2.f32 %v2541_v56 }
 0x76b   :  { %3298 = vpow2.f32 %v2542_v16 }
 0x76c   :  { %3300 = vpow2.f32 %v2543_v12 }
 0x76d   :  { %3302 = vtanh.f32 %v3155_v34 }
 0x774   :  { %v3297_v46 = vpop.eup %3296 }
 0x775   :  { %v3299_v45 = vpop.eup %3298  ;;  %v2192_v58 = vadd.f32 1.0, %v3297_v46 }
 0x776   :  { %v2198_v4 = vadd.f32 1.0, %v3299_v45  ;;  %v3301_v40 = vpop.eup %3300 }
 0x777   :  { %3304 = vrcp.f32 %v2192_v58  ;;  %v3303_v48 = vpop.eup %3302  ;;  %v2205_v5 = vadd.f32 1.0, %v3301_v40 }
 0x778   :  { %3306 = vrcp.f32 %v2198_v4 }
 0x779   :  { %3308 = vrcp.f32 %v2205_v5 }
 0x781   :  { %v3305_v6 = vpop.eup %3304 }
 0x782   :  { %v3307_v33 = vpop.eup %3306  ;;  %v2209_v59 = vmul.f32 %v3305_v6, %v3303_v48 }
 0x783   :  { %v2208_v19 = vmul.f32 %v3307_v33, %v1971_v24  ;;  %v3309_v23 = vpop.eup %3308 }
 0x785   :  { %v2210_v7 = vadd.f32 %v2209_v59, %v2208_v19 }
 0x787   :  { %3310 = vtanh.f32 %v2210_v7 }
 0x791   :  { %v3311_v18 = vpop.eup %3310 }
 0x792   :  { %v2212_v29 = vmul.f32 %v3311_v18, %v3309_v23 }
 0x794   :  { %v2220_v61 = vmul.f32 %v2218_v9, %v2212_v29 }
 0x796   :  { %v2228_v47 = vadd.f32 %v2227_v54, %v2220_v61  ;;  %2545 = vst [vmem:[%s4265_s6 + $0x30] sm:$0xff] %v2220_v61 }
 0x798   :  { %2368 = vmatmul.mubr.f32.vlgmr.msra.gmra.mrb[14].mxu0 %v2228_v47  ;;  %2439 = vmatmul.mubr.f32.vlgmr.msra.gmra.mrb[14].mxu1 %v2228_v47  ;;  %v2487_v3 = vmul.f32 %v2485_v43, %v2228_v47 }
 0x86b   :  { %v2369_v41 = vpop.f32.mrb[14].mxu0  ;;  %v2440_v35 = vpop.f32.mrb[14].mxu1 }
 0x86c   :  { %v3141_v51 = vadd.f32 %v2369_v41, %v3849_v10  ;;  %v2371_v8 = vpop.f32.mrb[15].mxu0  ;;  %v2442_v22 = vpop.f32.mrb[15].mxu1  ;;  %v3157_v30 = vadd.f32 %v2440_v35, %v3858_v37  ;;  %v2229_v10 = vmul.f32 %v2218_v9, %v2210_v7 }
 0x86d   :  { %v3142_v17 = vadd.f32 %v2371_v8, %v3851_v11  ;;  %v3158_v60 = vadd.f32 %v2442_v22, %v3855_v31  ;;  %v2230_v11 = vmul.f32 %v2225_v27, %v1971_v24  ;;  %v2478_v37 = vpop.permute.xlu0 %2477 }
 0x86e   :  { %v2546_v28 = vmul.f32 -1.442695, %v3141_v51 }
 0x86f   :  { %v2547_v25 = vmul.f32 -1.442695, %v3142_v17  ;;  %v2548_v42 = vmul.f32 -1.442695, %v3158_v60  ;;  %v2231_v63 = vadd.f32 %v2230_v11, %v2229_v10 }
 0x870   :  { %3312 = vpow2.f32 %v2546_v28 }
 0x871   :  { %3314 = vpow2.f32 %v2547_v25  ;;  %v2490_v21 = vmul.f32 %v2485_v43, %v2231_v63 }
 0x872   :  { %3316 = vpow2.f32 %v2548_v42 }
 0x873   :  { %3318 = vtanh.f32 %v3157_v30 }
 0x87a   :  { %v3313_v49 = vpop.eup %3312 }
 0x87b   :  { %v3315_v55 = vpop.eup %3314  ;;  %v2452_v0 = vadd.f32 1.0, %v3313_v49 }
 0x87c   :  { %v2458_v14 = vadd.f32 1.0, %v3315_v55  ;;  %v3317_v15 = vpop.eup %3316 }
 0x87d   :  { %3320 = vrcp.f32 %v2452_v0  ;;  %v3319_v44 = vpop.eup %3318  ;;  %v2465_v31 = vadd.f32 1.0, %v3317_v15 }
 0x87e   :  { %3322 = vrcp.f32 %v2458_v14 }
 0x87f   :  { %3324 = vrcp.f32 %v2465_v31 }
 0x887   :  { %v3321_v50 = vpop.eup %3320 }
 0x888   :  { %v3323_v2 = vpop.eup %3322  ;;  %v2469_v13 = vmul.f32 %v3321_v50, %v3319_v44 }
 0x889   :  { %v2468_v26 = vmul.f32 %v3323_v2, %v2231_v63  ;;  %v3325_v38 = vpop.eup %3324 }
 0x88b   :  { %v2470_v39 = vadd.f32 %v2469_v13, %v2468_v26 }
 0x88d   :  { %3326 = vtanh.f32 %v2470_v39  ;;  %v2489_v57 = vmul.f32 %v2478_v37, %v2470_v39 }
 0x88f   :  { %v2491_v36 = vadd.f32 %v2490_v21, %v2489_v57 }
 0x891   :  { %2495 = vst [vmem:[%s4267_s8] sm:$0xff] %v2491_v36 }
 0x897   :  { %v3327_v52 = vpop.eup %3326 }
 0x898   :  { %v2472_v62 = vmul.f32 %v3327_v52, %v3325_v38 }
 0x89a   :  { %v2480_v53 = vmul.f32 %v2478_v37, %v2472_v62 }
 0x89c   :  { %v2488_v56 = vadd.f32 %v2487_v3, %v2480_v53  ;;  %2550 = vst [vmem:[%s4265_s6 + $0x38] sm:$0xff] %v2480_v53 }
 0x89e   :  { %2494 = vst [vmem:[%s4266_s7] sm:$0xff] %v2488_v56 }
 0x89f PF:  { %2508 = vsyncpa [#allocation6], 1 }

</bundles_post_ra>
